<compile_context>
chip_gen: v5e
topology: v5e:2x2
jax: 0.10.0
libtpu: 0.0.40
codegen_flags: <defaults>
</compile_context>

<pallas_src>
import jax
import jax.numpy as jnp
from jax.experimental import pallas as pl
from jax.experimental.pallas import tpu as pltpu


def _relu_select_matmul_kernel(x_ref, s_ref, w_ref, o_ref):
    """x_ref: [C_in, P]      full activations (f32), P = N*H*W
       s_ref: [P, M]         one-hot stride-2 selection matrix (bf16), M = N*H_out*W_out
       w_ref: [C_out, C_in]  conv weight (bf16, PyTorch layout, 1x1 kernel squeezed)
       o_ref: [C_out, M]     output (f32)
    """
    # Fused ReLU + cast to the MXU storage dtype (VPU work; kernel is DMA-bound so free).
    x = jnp.maximum(x_ref[...], 0.0).astype(s_ref.dtype)
    # Stride-2 spatial subsample as a one-hot selection matmul (MXU).  Exact: every output
    # column is a copy of a single input column, so f32-accumulate + cast back to bf16 is
    # lossless.
    y = jnp.dot(x, s_ref[...], preferred_element_type=jnp.float32).astype(w_ref.dtype)
    # 1x1 conv == plain matmul over channels (MXU, f32 accumulation).
    o_ref[...] = jnp.dot(w_ref[...], y, preferred_element_type=jnp.float32)


def relu_conv1x1_stride2(x_nchw, weight_oi):
    """x_nchw:    [N, C_in, H, W] float32.
    weight_oi: [C_out, C_in] in PyTorch layout, already in the MXU storage dtype
               (bf16 recommended; converted once at init, not per call).
    Returns [N, C_out, H_out, W_out] float32 (PyTorch Conv2d k=1, s=2, p=0 semantics)."""
    N, C_in, H, W = x_nchw.shape
    C_out = weight_oi.shape[0]
    H_out = (H - 1) // 2 + 1
    W_out = (W - 1) // 2 + 1
    HW, Mo = H * W, H_out * W_out
    P, M = N * HW, N * Mo

    # Channel-major slab [C_in, N*H*W].  For N == 1 this is a pure (bitcast) reshape —
    # no data movement, no extra kernel.  For N > 1 it costs one transpose (perf note
    # only; the module uses N == 1).
    x_cp = jnp.transpose(x_nchw, (1, 0, 2, 3)).reshape(C_in, P)

    # One-hot selection matrix implementing the stride-2 subsample (block-diagonal over
    # the batch for N > 1).  Built purely from compile-time constants -> folded by XLA,
    # zero runtime cost to construct; ~19 KB of extra HBM traffic at these shapes.
    p_idx = jnp.arange(P, dtype=jnp.int32)[:, None]           # [P, 1]
    m_idx = jnp.arange(M, dtype=jnp.int32)[None, :]           # [1, M]
    n_of_m = m_idx // Mo
    r = m_idx % Mo
    i_out = r // W_out
    j_out = r % W_out
    p_target = n_of_m * HW + (2 * i_out) * W + (2 * j_out)
    sel = (p_idx == p_target).astype(weight_oi.dtype)         # [P, M]

    cost = pl.CostEstimate(
        flops=2 * C_in * P * M + 2 * C_out * C_in * M,
        transcendentals=0,
        bytes_accessed=(x_cp.size * x_cp.dtype.itemsize
                        + sel.size * sel.dtype.itemsize
                        + weight_oi.size * weight_oi.dtype.itemsize
                        + C_out * M * 4),
    )

    out_cm = pl.pallas_call(
        _relu_select_matmul_kernel,
        out_shape=jax.ShapeDtypeStruct((C_out, M), jnp.float32),
        grid_spec=pltpu.PrefetchScalarGridSpec(
            num_scalar_prefetch=0,
            grid=(1,),
            in_specs=[
                pl.BlockSpec((C_in, P), lambda i: (0, 0)),     # activations, full block
                pl.BlockSpec((P, M), lambda i: (0, 0)),        # subsample selection matrix
                pl.BlockSpec((C_out, C_in), lambda i: (0, 0)), # weight, full block
            ],
            out_specs=pl.BlockSpec((C_out, M), lambda i: (0, 0)),
        ),
        compiler_params=pltpu.CompilerParams(
            dimension_semantics=("arbitrary",)),
        cost_estimate=cost,
    )(x_cp, sel, weight_oi)

    # Back to NCHW (reshape-only for N == 1).
    out = out_cm.reshape(C_out, N, H_out, W_out)
    return jnp.transpose(out, (1, 0, 2, 3))


if __name__ == "__main__":
    key = jax.random.PRNGKey(0)
    k_x, k_w = jax.random.split(key)

    # Shapes implied by the module's forward: x238 is [1, 432, 14, 14].
    N, C_in, H, W = 1, 432, 14, 14
    C_out = 1008

    x = jax.random.normal(k_x, (N, C_in, H, W), dtype=jnp.float32)
    # Synthetic Conv2d weight, PyTorch layout [C_out, C_in] (1x1 kernel squeezed).
    weight_f32 = jax.random.normal(k_w, (C_out, C_in), dtype=jnp.float32) * 0.02
    # One-time init cost (like the nn.Module holding its params): bf16 storage.
    weight = weight_f32.astype(jnp.bfloat16)

    fwd = jax.jit(relu_conv1x1_stride2)
    out = fwd(x, weight)
    jax.block_until_ready(out)

    H_out, W_out = (H - 1) // 2 + 1, (W - 1) // 2 + 1
    assert out.shape == (N, C_out, H_out, W_out)
    assert out.dtype == jnp.float32

    # Precision-matched reference (bf16 operands, f32 accumulation).
    x_sub = jnp.maximum(x[:, :, ::2, ::2], 0.0).astype(jnp.bfloat16)
    ref = jnp.einsum("nchw,oc->nohw", x_sub, weight,
                     preferred_element_type=jnp.float32)
    assert jnp.allclose(out, ref, atol=1e-2, rtol=1e-2)

    # Loose sanity check against pure-f32 module semantics (bf16 weights change numerics
    # slightly; errors are a few 1e-3 at these shapes).
    ref_f32 = jnp.einsum("nchw,oc->nohw",
                         jnp.maximum(x[:, :, ::2, ::2], 0.0), weight_f32)
    assert jnp.allclose(out, ref_f32, atol=5e-2, rtol=5e-2)

    print("KERNEL_OK")
</pallas_src>

<mosaic_0001>
module attributes {stable_mosaic.version = 11 : i64} {
  func.func @_relu_select_matmul_kernel(%arg0: i32, %arg1: memref<432x196xf32, #tpu.memory_space<vmem>>, %arg2: memref<196x49xbf16, #tpu.memory_space<vmem>>, %arg3: memref<1008x432xbf16, #tpu.memory_space<vmem>>, %arg4: memref<1008x49xf32, #tpu.memory_space<vmem>>) attributes {dimension_semantics = [#tpu.dimension_semantics<arbitrary>], iteration_bounds = array<i64: 1>, scalar_prefetch = 0 : i64, scratch_operands = 0 : i64, tpu.core_type = #tpu.core_type<tc>, window_params = [{pipeline_mode = #tpu.pipeline_mode<synchronous>, transform_indices = @transform_0, window_bounds = array<i64: 432, 196>}, {pipeline_mode = #tpu.pipeline_mode<synchronous>, transform_indices = @transform_1, window_bounds = array<i64: 196, 49>}, {pipeline_mode = #tpu.pipeline_mode<synchronous>, transform_indices = @transform_2, window_bounds = array<i64: 1008, 432>}, {pipeline_mode = #tpu.pipeline_mode<synchronous>, transform_indices = @transform_3, window_bounds = array<i64: 1008, 49>}]} {
    %c0 = arith.constant 0 : index
    %c0_0 = arith.constant 0 : index
    %0 = vector.load %arg1[%c0, %c0_0] : memref<432x196xf32, #tpu.memory_space<vmem>>, vector<432x196xf32>
    %cst = arith.constant 0.000000e+00 : f32
    %1 = vector.broadcast %cst : f32 to vector<432x196xf32>
    %2 = arith.maximumf %0, %1 : vector<432x196xf32>
    %3 = arith.truncf %2 : vector<432x196xf32> to vector<432x196xbf16>
    %c0_1 = arith.constant 0 : index
    %c0_2 = arith.constant 0 : index
    %4 = vector.load %arg2[%c0_1, %c0_2] : memref<196x49xbf16, #tpu.memory_space<vmem>>, vector<196x49xbf16>
    %cst_3 = arith.constant dense<0.000000e+00> : vector<432x49xf32>
    %5 = tpu.matmul %3, %4, %cst_3 {dimension_numbers = #tpu.dot_dimension_numbers<[1], [0], [0], [1], [0, 0, 1, 1], [], []>} : vector<432x196xbf16>, vector<196x49xbf16>, vector<432x49xf32> -> vector<432x49xf32>
    %6 = arith.truncf %5 : vector<432x49xf32> to vector<432x49xbf16>
    %c0_4 = arith.constant 0 : index
    %c0_5 = arith.constant 0 : index
    %7 = vector.load %arg3[%c0_4, %c0_5] : memref<1008x432xbf16, #tpu.memory_space<vmem>>, vector<1008x432xbf16>
    %cst_6 = arith.constant dense<0.000000e+00> : vector<1008x49xf32>
    %8 = tpu.matmul %7, %6, %cst_6 {dimension_numbers = #tpu.dot_dimension_numbers<[1], [0], [0], [1], [0, 0, 1, 1], [], []>} : vector<1008x432xbf16>, vector<432x49xbf16>, vector<1008x49xf32> -> vector<1008x49xf32>
    %c0_7 = arith.constant 0 : index
    %c0_8 = arith.constant 0 : index
    %9 = vector.load %arg4[%c0_7, %c0_8] : memref<1008x49xf32, #tpu.memory_space<vmem>>, vector<1008x49xf32>
    tpu.vector_store %arg4[%c0_7, %c0_8], %8 {strides = array<i32>} : memref<1008x49xf32, #tpu.memory_space<vmem>>, vector<1008x49xf32>,
    return
  }
  func.func @transform_0(%arg0: i32) -> (i32, i32) {
    %c0_i32 = arith.constant 0 : i32
    %c0_i32_0 = arith.constant 0 : i32
    %c0_i32_1 = arith.constant 0 : i32
    return %c0_i32, %c0_i32_0 : i32, i32
  }
  func.func @transform_1(%arg0: i32) -> (i32, i32) {
    %c0_i32 = arith.constant 0 : i32
    %c0_i32_0 = arith.constant 0 : i32
    %c0_i32_1 = arith.constant 0 : i32
    return %c0_i32, %c0_i32_0 : i32, i32
  }
  func.func @transform_2(%arg0: i32) -> (i32, i32) {
    %c0_i32 = arith.constant 0 : i32
    %c0_i32_0 = arith.constant 0 : i32
    %c0_i32_1 = arith.constant 0 : i32
    return %c0_i32, %c0_i32_0 : i32, i32
  }
  func.func @transform_3(%arg0: i32) -> (i32, i32) {
    %c0_i32 = arith.constant 0 : i32
    %c0_i32_0 = arith.constant 0 : i32
    %c0_i32_1 = arith.constant 0 : i32
    return %c0_i32, %c0_i32_0 : i32, i32
  }
}

</mosaic_0001>

<bundles_post_ra>
// kernel: relu_conv1x1_stride2.1
= control target key start
LH: loop header
LB: loop body
LE: loop exit
PB: predicated region body
PF: predicated region fallthrough
CT: control target
= control target key end

     0   :  { %vm467_vm0 = vcmask 1041408   ;;  %vm385_vm1 = vcmask 556032   ;;  %vm2235_vm2 = vcmask 392192   ;;  %vm3721_vm3 = vcmask 400384   ;;  %s8667_s1 = inlined_call_operand.vmem [shape: bf16[196,49], index: 1, kind: input, shape index: {}]   ;;  %s8668_s0 = inlined_call_operand.vmem [shape: f32[432,196], index: 0, kind: input, shape index: {}]   ;;  %s8669_s2 = inlined_call_operand.vmem [shape: bf16[1008,432], index: 2, kind: input, shape index: {}]   ;;  %s8670_s3 = inlined_call_operand.vmem [shape: f32[1008,49], index: 3, kind: output, shape index: {}]  }
   0x1   :  { %v5005_v0 = vld [vmem:[%s8667_s1 + $0x38] sm:$0xff]  ;;  %v309_v1 = vld [vmem:[%s8667_s1 + $0x60] sm:$0x3]  ;;  %v5004_v3 = vld [vmem:[%s8667_s1 + $0x30] sm:$0xff] }
   0x2   :  { %v359_v2 = vunpack.c.l.b16 %v309_v1  ;;  %471 = vmatpush.bf16.msra.mxu0 %v5005_v0  ;;  %5262 = vmatpush.bf16.msra.mxu2 %v5005_v0  ;;  %v5003_v6 = vld [vmem:[%s8667_s1 + $0x28] sm:$0xff]  ;;  %v5009_v7 = vld [vmem:[%s8667_s1 + $0x58] sm:$0xff]  ;;  %v5002_v8 = vld [vmem:[%s8667_s1 + $0x20] sm:$0xff] }
   0x3   :  { %v5008_v9 = vld [vmem:[%s8667_s1 + $0x50] sm:$0xff]  ;;  %v5001_v10 = vld [vmem:[%s8667_s1 + $0x18] sm:$0xff]  ;;  %v5007_v11 = vld [vmem:[%s8667_s1 + $0x48] sm:$0xff] }
   0x4   :  { %v372_v4 = vpack.c.b16 %v359_v2, %v359_v2  ;;  %v72_v12 = vld [vmem:[%s8668_s0 + $0x1c8] sm:$0xff]  ;;  %v74_v13 = vld [vmem:[%s8668_s0 + $0x1d8] sm:$0xff]  ;;  %v5000_v16 = vld [vmem:[%s8667_s1 + $0x10] sm:$0xff] }
   0x5   :  { %v16_v14 = vld [vmem:[%s8668_s0 + $0x8] sm:$0xff]  ;;  %v18_v15 = vld [vmem:[%s8668_s0 + $0x18] sm:$0xff]  ;;  %v180_v17 = vmax.f32 %v72_v12, 0.0  ;;  %v182_v18 = vmax.f32 %v74_v13, 0.0  ;;  %v5006_v19 = vld [vmem:[%s8667_s1 + $0x40] sm:$0xff] }
   0x6   :  { %v469_v5 = vsel %vm467_vm0, %v372_v4, 0  ;;  %472 = vmatpush.bf16.msra.mxu0 %v5004_v3  ;;  %5263 = vmatpush.bf16.msra.mxu2 %v5004_v3  ;;  %v124_v20 = vmax.f32 %v16_v14, 0.0  ;;  %v126_v21 = vmax.f32 %v18_v15, 0.0  ;;  %v4999_v23 = vld [vmem:[%s8667_s1 + $0x8] sm:$0xff]  ;;  %v15_v24 = vld [vmem:[%s8668_s0] sm:$0xff]  ;;  %v17_v25 = vld [vmem:[%s8668_s0 + $0x10] sm:$0xff] }
   0x7   :  { %5270 = vmatpush.bf16.msra.mxu3 %v469_v5  ;;  %618 = vmatpush.bf16.msra.mxu1 %v469_v5  ;;  %v260_v22 = vpack.c.bf16 %v182_v18, %v180_v17  ;;  %v71_v26 = vld [vmem:[%s8668_s0 + $0x1c0] sm:$0xff]  ;;  %v73_v27 = vld [vmem:[%s8668_s0 + $0x1d0] sm:$0xff]  ;;  %v123_v29 = vmax.f32 %v15_v24, 0.0  ;;  %v125_v30 = vmax.f32 %v17_v25, 0.0  ;;  %v76_v36 = vld [vmem:[%s8668_s0 + $0x1e8] sm:$0xff] }
   0x8   :  { %v232_v28 = vpack.c.bf16 %v126_v21, %v124_v20  ;;  %v4998_v31 = vld [vmem:[%s8667_s1] sm:$0xff]  ;;  %v179_v32 = vmax.f32 %v71_v26, 0.0  ;;  %v181_v33 = vmax.f32 %v73_v27, 0.0  ;;  %v78_v37 = vld [vmem:[%s8668_s0 + $0x1f8] sm:$0xff]  ;;  %v20_v38 = vld [vmem:[%s8668_s0 + $0x28] sm:$0xff]  ;;  %v184_v40 = vmax.f32 %v76_v36, 0.0 }
   0x9   :  { %v231_v34 = vpack.c.bf16 %v125_v30, %v123_v29  ;;  %v22_v39 = vld [vmem:[%s8668_s0 + $0x38] sm:$0xff]  ;;  %v186_v41 = vmax.f32 %v78_v37, 0.0  ;;  %v128_v42 = vmax.f32 %v20_v38, 0.0  ;;  %v19_v45 = vld [vmem:[%s8668_s0 + $0x20] sm:$0xff]  ;;  %v21_v46 = vld [vmem:[%s8668_s0 + $0x30] sm:$0xff] }
   0xa   :  { %473 = vmatpush.bf16.msra.mxu0 %v5003_v6  ;;  %5264 = vmatpush.bf16.msra.mxu2 %v5003_v6  ;;  %v259_v35 = vpack.c.bf16 %v181_v33, %v179_v32  ;;  %v130_v43 = vmax.f32 %v22_v39, 0.0  ;;  %v75_v47 = vld [vmem:[%s8668_s0 + $0x1e0] sm:$0xff]  ;;  %v77_v48 = vld [vmem:[%s8668_s0 + $0x1f0] sm:$0xff]  ;;  %v127_v50 = vmax.f32 %v19_v45, 0.0  ;;  %v129_v51 = vmax.f32 %v21_v46, 0.0  ;;  %v80_v56 = vld [vmem:[%s8668_s0 + $0x208] sm:$0xff] }
   0xb   :  { %5271 = vmatpush.bf16.msra.mxu3 %v5009_v7  ;;  %619 = vmatpush.bf16.msra.mxu1 %v5009_v7  ;;  %v262_v44 = vpack.c.bf16 %v186_v41, %v184_v40  ;;  %v183_v52 = vmax.f32 %v75_v47, 0.0  ;;  %v185_v53 = vmax.f32 %v77_v48, 0.0  ;;  %v82_v57 = vld [vmem:[%s8668_s0 + $0x218] sm:$0xff]  ;;  %v24_v58 = vld [vmem:[%s8668_s0 + $0x48] sm:$0xff]  ;;  %v188_v60 = vmax.f32 %v80_v56, 0.0  ;;  %v23_v1 = vld [vmem:[%s8668_s0 + $0x40] sm:$0xff] }
   0xc   :  { %v234_v49 = vpack.c.bf16 %v130_v43, %v128_v42  ;;  %v233_v54 = vpack.c.bf16 %v129_v51, %v127_v50  ;;  %v26_v59 = vld [vmem:[%s8668_s0 + $0x58] sm:$0xff]  ;;  %v190_v61 = vmax.f32 %v82_v57, 0.0  ;;  %v132_v62 = vmax.f32 %v24_v58, 0.0  ;;  %v25_v2 = vld [vmem:[%s8668_s0 + $0x50] sm:$0xff]  ;;  %v79_v3 = vld [vmem:[%s8668_s0 + $0x200] sm:$0xff] }
   0xd   :  { %v261_v55 = vpack.c.bf16 %v185_v53, %v183_v52  ;;  %v134_v63 = vmax.f32 %v26_v59, 0.0  ;;  %v81_v4 = vld [vmem:[%s8668_s0 + $0x210] sm:$0xff]  ;;  %v131_v6 = vmax.f32 %v23_v1, 0.0  ;;  %v133_v7 = vmax.f32 %v25_v2, 0.0  ;;  %v84_v12 = vld [vmem:[%s8668_s0 + $0x228] sm:$0xff]  ;;  %v86_v13 = vld [vmem:[%s8668_s0 + $0x238] sm:$0xff] }
   0xe   :  { %474 = vmatpush.bf16.msra.mxu0 %v5002_v8  ;;  %5265 = vmatpush.bf16.msra.mxu2 %v5002_v8  ;;  %v264_v0 = vpack.c.bf16 %v190_v61, %v188_v60  ;;  %v187_v8 = vmax.f32 %v79_v3, 0.0  ;;  %v28_v14 = vld [vmem:[%s8668_s0 + $0x68] sm:$0xff]  ;;  %v30_v15 = vld [vmem:[%s8668_s0 + $0x78] sm:$0xff]  ;;  %v194_v17 = vmax.f32 %v86_v13, 0.0  ;;  %v27_v21 = vld [vmem:[%s8668_s0 + $0x60] sm:$0xff] }
   0xf   :  { %5272 = vmatpush.bf16.msra.mxu3 %v5008_v9  ;;  %620 = vmatpush.bf16.msra.mxu1 %v5008_v9  ;;  %v236_v5 = vpack.c.bf16 %v134_v63, %v132_v62  ;;  %v189_v9 = vmax.f32 %v81_v4, 0.0  ;;  %v136_v18 = vmax.f32 %v28_v14, 0.0  ;;  %v85_v24 = vld [vmem:[%s8668_s0 + $0x230] sm:$0xff]  ;;  %v135_v26 = vmax.f32 %v27_v21, 0.0  ;;  %v88_v32 = vld [vmem:[%s8668_s0 + $0x248] sm:$0xff]  ;;  %v90_v33 = vld [vmem:[%s8668_s0 + $0x258] sm:$0xff] }
  0x10   :  { %v193_v29 = vmax.f32 %v85_v24, 0.0  ;;  %v196_v36 = vmax.f32 %v88_v32, 0.0  ;;  %v198_v37 = vmax.f32 %v90_v33, 0.0  ;;  %v31_v41 = vld [vmem:[%s8668_s0 + $0x80] sm:$0xff]  ;;  %v33_v42 = vld [vmem:[%s8668_s0 + $0x90] sm:$0xff]  ;;  %v92_v52 = vld [vmem:[%s8668_s0 + $0x268] sm:$0xff] }
  0x11   :  { %v87_v43 = vld [vmem:[%s8668_s0 + $0x240] sm:$0xff]  ;;  %v139_v46 = vmax.f32 %v31_v41, 0.0  ;;  %v141_v47 = vmax.f32 %v33_v42, 0.0  ;;  %v94_v53 = vld [vmem:[%s8668_s0 + $0x278] sm:$0xff]  ;;  %v200_v56 = vmax.f32 %v92_v52, 0.0  ;;  %v37_v62 = vld [vmem:[%s8668_s0 + $0xb0] sm:$0xff] }
  0x12   :  { %475 = vmatpush.bf16.msra.mxu0 %v5001_v10  ;;  %5266 = vmatpush.bf16.msra.mxu2 %v5001_v10  ;;  %v235_v10 = vpack.c.bf16 %v133_v7, %v131_v6  ;;  %v268_v40 = vpack.c.bf16 %v198_v37, %v196_v36  ;;  %v195_v48 = vmax.f32 %v87_v43, 0.0  ;;  %v202_v57 = vmax.f32 %v94_v53, 0.0  ;;  %v35_v61 = vld [vmem:[%s8668_s0 + $0xa0] sm:$0xff] }
  0x13   :  { %5273 = vmatpush.bf16.msra.mxu3 %v5007_v11  ;;  %621 = vmatpush.bf16.msra.mxu1 %v5007_v11  ;;  %v263_v11 = vpack.c.bf16 %v189_v9, %v187_v8  ;;  %v239_v50 = vpack.c.bf16 %v141_v47, %v139_v46  ;;  %v91_v63 = vld [vmem:[%s8668_s0 + $0x260] sm:$0xff]  ;;  %v143_v2 = vmax.f32 %v35_v61, 0.0  ;;  %v145_v3 = vmax.f32 %v37_v62, 0.0  ;;  %v96_v8 = vld [vmem:[%s8668_s0 + $0x288] sm:$0xff]  ;;  %v98_v9 = vld [vmem:[%s8668_s0 + $0x298] sm:$0xff] }
  0x14   :  { %v270_v60 = vpack.c.bf16 %v202_v57, %v200_v56  ;;  %v199_v4 = vmax.f32 %v91_v63, 0.0  ;;  %v206_v13 = vmax.f32 %v98_v9, 0.0  ;;  %v43_v37 = vld [vmem:[%s8668_s0 + $0xe0] sm:$0xff]  ;;  %v110_v9 = vld [vmem:[%s8668_s0 + $0x2f8] sm:$0xff] }
  0x15   :  { %v241_v6 = vpack.c.bf16 %v145_v3, %v143_v2  ;;  %v151_v42 = vmax.f32 %v43_v37, 0.0  ;;  %v47_v57 = vld [vmem:[%s8668_s0 + $0x100] sm:$0xff] }
  0x16   :  { %476 = vmatpush.bf16.msra.mxu0 %v5000_v16  ;;  %5267 = vmatpush.bf16.msra.mxu2 %v5000_v16  ;;  %v192_v16 = vmax.f32 %v84_v12, 0.0  ;;  %v204_v12 = vmax.f32 %v96_v8, 0.0  ;;  %v155_v63 = vmax.f32 %v47_v57, 0.0  ;;  %v108_v8 = vld [vmem:[%s8668_s0 + $0x2e8] sm:$0xff] }
  0x17   :  { %5274 = vmatpush.bf16.msra.mxu3 %v5006_v19  ;;  %622 = vmatpush.bf16.msra.mxu1 %v5006_v19  ;;  %v138_v19 = vmax.f32 %v30_v15, 0.0 }
  0x18   :  { %v266_v20 = vpack.c.bf16 %v194_v17, %v192_v16  ;;  %v272_v16 = vpack.c.bf16 %v206_v13, %v204_v12  ;;  %v39_v17 = vld [vmem:[%s8668_s0 + $0xc0] sm:$0xff]  ;;  %v54_v12 = vld [vmem:[%s8668_s0 + $0x138] sm:$0xff]  ;;  %v216_v13 = vmax.f32 %v108_v8, 0.0 }
  0x19   :  { %v238_v25 = vpack.c.bf16 %v138_v19, %v136_v18  ;;  %v41_v18 = vld [vmem:[%s8668_s0 + $0xd0] sm:$0xff]  ;;  %v95_v19 = vld [vmem:[%s8668_s0 + $0x280] sm:$0xff] }
  0x1a   :  { %3914 = vmatmul.msk.bf16.vlgmr.msra.gmra.mxu3 %vm385_vm1, %v260_v22  ;;  %477 = vmatpush.bf16.msra.mxu0 %v4999_v23  ;;  %v29_v22 = vld [vmem:[%s8668_s0 + $0x70] sm:$0xff]  ;;  %v203_v24 = vmax.f32 %v95_v19, 0.0 }
  0x1b   :  { %5268 = vmatpush.bf16.msra.mxu2 %v4999_v23  ;;  %3900 = vmatmul.msk.bf16.vlgmr.msra.gmra.mxu1 %vm385_vm1, %v232_v28  ;;  %v83_v23 = vld [vmem:[%s8668_s0 + $0x220] sm:$0xff]  ;;  %v137_v27 = vmax.f32 %v29_v22, 0.0  ;;  %v147_v22 = vmax.f32 %v39_v17, 0.0 }
  0x1c   :  { %v191_v28 = vmax.f32 %v83_v23, 0.0  ;;  %v149_v23 = vmax.f32 %v41_v18, 0.0 }
  0x1d   :  { %v237_v30 = vpack.c.bf16 %v137_v27, %v135_v26 }
  0x1e   :  { %478 = vmatpush.bf16.msra.mxu0 %v4998_v31  ;;  %v243_v26 = vpack.c.bf16 %v149_v23, %v147_v22  ;;  %v53_v22 = vld [vmem:[%s8668_s0 + $0x130] sm:$0xff] }
  0x1f   :  { %5269 = vmatpush.bf16.msra.mxu2 %v4998_v31  ;;  %v265_v31 = vpack.c.bf16 %v193_v29, %v191_v28  ;;  %v100_v28 = vld [vmem:[%s8668_s0 + $0x2a8] sm:$0xff]  ;;  %v102_v29 = vld [vmem:[%s8668_s0 + $0x2b8] sm:$0xff] }
  0x20   :  { %v208_v32 = vmax.f32 %v100_v28, 0.0  ;;  %v210_v33 = vmax.f32 %v102_v29, 0.0  ;;  %v161_v29 = vmax.f32 %v53_v22, 0.0 }
  0x21   :  { %479 = vmatmul.bf16.vlgmr.msra.gmra.mxu0 %v231_v34  ;;  %v32_v34 = vld [vmem:[%s8668_s0 + $0x88] sm:$0xff] }
  0x22   :  { %549 = vmatmul.bf16.vlgmr.msra.gmra.mxu2 %v259_v35  ;;  %v34_v35 = vld [vmem:[%s8668_s0 + $0x98] sm:$0xff]  ;;  %v140_v38 = vmax.f32 %v32_v34, 0.0  ;;  %v274_v36 = vpack.c.bf16 %v210_v33, %v208_v32 }
  0x23   :  { %v142_v39 = vmax.f32 %v34_v35, 0.0 }
  0x25   :  { %v240_v45 = vpack.c.bf16 %v142_v39, %v140_v38  ;;  %v45_v38 = vld [vmem:[%s8668_s0 + $0xf0] sm:$0xff]  ;;  %v99_v39 = vld [vmem:[%s8668_s0 + $0x2a0] sm:$0xff] }
  0x26   :  { %v153_v43 = vmax.f32 %v45_v38, 0.0 }
  0x28   :  { %v245_v46 = vpack.c.bf16 %v153_v43, %v151_v42  ;;  %v56_v42 = vld [vmem:[%s8668_s0 + $0x148] sm:$0xff]  ;;  %v58_v43 = vld [vmem:[%s8668_s0 + $0x158] sm:$0xff] }
  0x2a   :  { %3915 = vmatmul.msk.bf16.gmra.mxu3 %vm385_vm1, %v262_v44  ;;  %v89_v44 = vld [vmem:[%s8668_s0 + $0x250] sm:$0xff] }
  0x2b   :  { %3901 = vmatmul.msk.bf16.gmra.mxu1 %vm385_vm1, %v234_v49  ;;  %v197_v49 = vmax.f32 %v89_v44, 0.0  ;;  %v207_v44 = vmax.f32 %v99_v39, 0.0  ;;  %v112_v39 = vld [vmem:[%s8668_s0 + $0x308] sm:$0xff] }
  0x2d   :  { %v267_v51 = vpack.c.bf16 %v197_v49, %v195_v48  ;;  %v104_v48 = vld [vmem:[%s8668_s0 + $0x2c8] sm:$0xff]  ;;  %v106_v49 = vld [vmem:[%s8668_s0 + $0x2d8] sm:$0xff] }
  0x2e   :  { %v212_v52 = vmax.f32 %v104_v48, 0.0  ;;  %v214_v53 = vmax.f32 %v106_v49, 0.0 }
  0x30   :  { %v276_v56 = vpack.c.bf16 %v214_v53, %v212_v52  ;;  %v55_v52 = vld [vmem:[%s8668_s0 + $0x140] sm:$0xff]  ;;  %v57_v53 = vld [vmem:[%s8668_s0 + $0x150] sm:$0xff] }
  0x31   :  { %484 = vmatmul.bf16.gmra.mxu0 %v233_v54  ;;  %v36_v54 = vld [vmem:[%s8668_s0 + $0xa8] sm:$0xff] }
  0x32   :  { %554 = vmatmul.bf16.gmra.mxu2 %v261_v55  ;;  %v38_v55 = vld [vmem:[%s8668_s0 + $0xb8] sm:$0xff]  ;;  %v144_v58 = vmax.f32 %v36_v54, 0.0 }
  0x33   :  { %v146_v59 = vmax.f32 %v38_v55, 0.0 }
  0x35   :  { %v242_v1 = vpack.c.bf16 %v146_v59, %v144_v58  ;;  %v49_v58 = vld [vmem:[%s8668_s0 + $0x110] sm:$0xff]  ;;  %v103_v59 = vld [vmem:[%s8668_s0 + $0x2c0] sm:$0xff] }
  0x3a   :  { %3916 = vmatmul.msk.bf16.gmra.mxu3 %vm385_vm1, %v264_v0  ;;  %v93_v0 = vld [vmem:[%s8668_s0 + $0x270] sm:$0xff] }
  0x3b   :  { %3902 = vmatmul.msk.bf16.gmra.mxu1 %vm385_vm1, %v236_v5  ;;  %v201_v5 = vmax.f32 %v93_v0, 0.0  ;;  %v157_v0 = vmax.f32 %v49_v58, 0.0 }
  0x3d   :  { %v269_v7 = vpack.c.bf16 %v201_v5, %v199_v4  ;;  %v247_v4 = vpack.c.bf16 %v157_v0, %v155_v63 }
  0x41   :  { %489 = vmatmul.bf16.gmra.mxu0 %v235_v10  ;;  %v40_v10 = vld [vmem:[%s8668_s0 + $0xc8] sm:$0xff] }
  0x42   :  { %559 = vmatmul.bf16.gmra.mxu2 %v263_v11  ;;  %v42_v11 = vld [vmem:[%s8668_s0 + $0xd8] sm:$0xff]  ;;  %v148_v14 = vmax.f32 %v40_v10, 0.0 }
  0x43   :  { %v150_v15 = vmax.f32 %v42_v11, 0.0  ;;  %v52_v11 = vld [vmem:[%s8668_s0 + $0x128] sm:$0xff] }
  0x45   :  { %v244_v21 = vpack.c.bf16 %v150_v15, %v148_v14  ;;  %v218_v14 = vmax.f32 %v110_v9, 0.0  ;;  %v160_v15 = vmax.f32 %v52_v11, 0.0 }
  0x4a   :  { %3917 = vmatmul.msk.bf16.gmra.mxu3 %vm385_vm1, %v266_v20  ;;  %v97_v20 = vld [vmem:[%s8668_s0 + $0x290] sm:$0xff] }
  0x4b   :  { %3903 = vmatmul.msk.bf16.gmra.mxu1 %vm385_vm1, %v238_v25  ;;  %v205_v25 = vmax.f32 %v97_v20, 0.0  ;;  %v278_v20 = vpack.c.bf16 %v218_v14, %v216_v13  ;;  %v118_v13 = vld [vmem:[%s8668_s0 + $0x338] sm:$0xff] }
  0x4d   :  { %v271_v27 = vpack.c.bf16 %v205_v25, %v203_v24  ;;  %v107_v24 = vld [vmem:[%s8668_s0 + $0x2e0] sm:$0xff]  ;;  %v109_v25 = vld [vmem:[%s8668_s0 + $0x2f0] sm:$0xff] }
  0x4e   :  { %v217_v32 = vmax.f32 %v109_v25, 0.0 }
  0x51   :  { %494 = vmatmul.bf16.gmra.mxu0 %v237_v30  ;;  %v44_v30 = vld [vmem:[%s8668_s0 + $0xe8] sm:$0xff] }
  0x52   :  { %564 = vmatmul.bf16.gmra.mxu2 %v265_v31  ;;  %v46_v31 = vld [vmem:[%s8668_s0 + $0xf8] sm:$0xff]  ;;  %v152_v34 = vmax.f32 %v44_v30, 0.0 }
  0x53   :  { %v154_v35 = vmax.f32 %v46_v31, 0.0  ;;  %v215_v31 = vmax.f32 %v107_v24, 0.0 }
  0x55   :  { %v246_v41 = vpack.c.bf16 %v154_v35, %v152_v34  ;;  %v277_v37 = vpack.c.bf16 %v217_v32, %v215_v31  ;;  %v115_v31 = vld [vmem:[%s8668_s0 + $0x320] sm:$0xff]  ;;  %v117_v32 = vld [vmem:[%s8668_s0 + $0x330] sm:$0xff] }
  0x5a   :  { %3918 = vmatmul.msk.bf16.gmra.mxu3 %vm385_vm1, %v268_v40  ;;  %v101_v40 = vld [vmem:[%s8668_s0 + $0x2b0] sm:$0xff] }
  0x5b   :  { %3904 = vmatmul.msk.bf16.gmra.mxu1 %vm385_vm1, %v240_v45  ;;  %v209_v45 = vmax.f32 %v101_v40, 0.0  ;;  %v114_v40 = vld [vmem:[%s8668_s0 + $0x318] sm:$0xff] }
  0x5d   :  { %v273_v47 = vpack.c.bf16 %v209_v45, %v207_v44  ;;  %v220_v44 = vmax.f32 %v112_v39, 0.0  ;;  %v222_v45 = vmax.f32 %v114_v40, 0.0  ;;  %v225_v39 = vmax.f32 %v117_v32, 0.0  ;;  %v69_v32 = vld [vmem:[%s8668_s0 + $0x1b0] sm:$0xff] }
  0x61   :  { %499 = vmatmul.bf16.gmra.mxu0 %v239_v50  ;;  %v48_v50 = vld [vmem:[%s8668_s0 + $0x108] sm:$0xff] }
  0x62   :  { %569 = vmatmul.bf16.gmra.mxu2 %v267_v51  ;;  %v50_v51 = vld [vmem:[%s8668_s0 + $0x118] sm:$0xff]  ;;  %v156_v54 = vmax.f32 %v48_v50, 0.0 }
  0x63   :  { %v158_v55 = vmax.f32 %v50_v51, 0.0  ;;  %v280_v51 = vpack.c.bf16 %v222_v45, %v220_v44 }
  0x65   :  { %v248_v61 = vpack.c.bf16 %v158_v55, %v156_v54  ;;  %v111_v55 = vld [vmem:[%s8668_s0 + $0x300] sm:$0xff] }
  0x6a   :  { %3919 = vmatmul.msk.bf16.gmra.mxu3 %vm385_vm1, %v270_v60  ;;  %v105_v60 = vld [vmem:[%s8668_s0 + $0x2d0] sm:$0xff] }
  0x6b   :  { %3905 = vmatmul.msk.bf16.gmra.mxu1 %vm385_vm1, %v242_v1  ;;  %v211_v1 = vmax.f32 %v103_v59, 0.0  ;;  %v213_v2 = vmax.f32 %v105_v60, 0.0  ;;  %v163_v59 = vmax.f32 %v55_v52, 0.0  ;;  %v165_v60 = vmax.f32 %v57_v53, 0.0 }
  0x71   :  { %504 = vmatmul.bf16.gmra.mxu0 %v241_v6  ;;  %v275_v6 = vpack.c.bf16 %v213_v2, %v211_v1 }
  0x72   :  { %574 = vmatmul.bf16.gmra.mxu2 %v269_v7 }
  0x7a   :  { %3920 = vmatmul.msk.bf16.gmra.mxu3 %vm385_vm1, %v272_v16  ;;  %v162_v16 = vmax.f32 %v54_v12, 0.0  ;;  %v116_v12 = vld [vmem:[%s8668_s0 + $0x328] sm:$0xff] }
  0x7b   :  { %3906 = vmatmul.msk.bf16.gmra.mxu1 %vm385_vm1, %v244_v21  ;;  %v51_v21 = vld [vmem:[%s8668_s0 + $0x120] sm:$0xff] }
  0x7c   :  { %v159_v28 = vmax.f32 %v51_v21, 0.0 }
  0x7e   :  { %v249_v35 = vpack.c.bf16 %v161_v29, %v159_v28  ;;  %v59_v28 = vld [vmem:[%s8668_s0 + $0x160] sm:$0xff]  ;;  %v61_v29 = vld [vmem:[%s8668_s0 + $0x170] sm:$0xff] }
  0x81   :  { %509 = vmatmul.bf16.gmra.mxu0 %v243_v26  ;;  %v250_v26 = vpack.c.bf16 %v162_v16, %v160_v15  ;;  %v62_v16 = vld [vmem:[%s8668_s0 + $0x178] sm:$0xff] }
  0x82   :  { %579 = vmatmul.bf16.gmra.mxu2 %v271_v27  ;;  %v170_v21 = vmax.f32 %v62_v16, 0.0 }
  0x8a   :  { %3921 = vmatmul.msk.bf16.gmra.mxu3 %vm385_vm1, %v274_v36 }
  0x8b   :  { %3907 = vmatmul.msk.bf16.gmra.mxu1 %vm385_vm1, %v246_v41 }
  0x91   :  { %514 = vmatmul.bf16.gmra.mxu0 %v245_v46  ;;  %v164_v46 = vmax.f32 %v56_v42, 0.0 }
  0x92   :  { %584 = vmatmul.bf16.gmra.mxu2 %v273_v47  ;;  %v166_v47 = vmax.f32 %v58_v43, 0.0 }
  0x94   :  { %v252_v57 = vpack.c.bf16 %v166_v47, %v164_v46  ;;  %v120_v46 = vld [vmem:[%s8668_s0 + $0x348] sm:$0xff]  ;;  %v122_v47 = vld [vmem:[%s8668_s0 + $0x358] sm:$0xff] }
  0x95   :  { %v230_v52 = vmax.f32 %v122_v47, 0.0 }
  0x98   :  { %v624_v62 = vpop.f32.mrf.mxu1 }
  0x9a   :  { %3922 = vmatmul.msk.bf16.gmra.mxu3 %vm385_vm1, %v276_v56  ;;  %v113_v56 = vld [vmem:[%s8668_s0 + $0x310] sm:$0xff] }
  0x9b   :  { %3908 = vmatmul.msk.bf16.gmra.mxu1 %vm385_vm1, %v248_v61  ;;  %v221_v63 = vmax.f32 %v113_v56, 0.0 }
  0x9d   :  { %v5568_v3 = vpop.f32.mrf.mxu3 }
  0x9e   :  { %v480_v5 = vpop.f32.mrf.mxu0 }
  0x9f   :  { %v5570_v7 = vadd.f32 %v624_v62, %v480_v5  ;;  %v219_v62 = vmax.f32 %v111_v55, 0.0 }
  0xa0   :  { %v626_v10 = vpop.f32.mrf.mxu1 }
  0xa1   :  { %519 = vmatmul.bf16.gmra.mxu0 %v247_v4  ;;  %v251_v4 = vpack.c.bf16 %v165_v60, %v163_v59 }
  0xa2   :  { %589 = vmatmul.bf16.gmra.mxu2 %v275_v6 }
  0xa5   :  { %v550_v17 = vpop.f32.mrf.mxu2  ;;  %v696_v18 = vpop.f32.mrf.mxu3 }
  0xa6   :  { %v482_v19 = vpop.f32.mrf.mxu0  ;;  %v695_v5 = vadd.f32 %v5568_v3, %v550_v17  ;;  %v60_v3 = vld [vmem:[%s8668_s0 + $0x168] sm:$0xff] }
  0xa7   :  { %v5590_v23 = vadd.f32 %v626_v10, %v482_v19  ;;  %v279_v10 = vpack.c.bf16 %v221_v63, %v219_v62  ;;  %v226_v19 = vmax.f32 %v118_v13, 0.0  ;;  %v63_v62 = vld [vmem:[%s8668_s0 + $0x180] sm:$0xff]  ;;  %v65_v63 = vld [vmem:[%s8668_s0 + $0x190] sm:$0xff] }
  0xa8   :  { %v629_v27 = vpop.f32.mrf.mxu1 }
  0xa9   :  { %v759_v30 = vpack.c.bf16 %v5590_v23, %v5570_v7 }
  0xaa   :  { %3923 = vmatmul.msk.bf16.gmra.mxu3 %vm385_vm1, %v278_v20  ;;  %v168_v20 = vmax.f32 %v60_v3, 0.0 }
  0xab   :  { %3909 = vmatmul.msk.bf16.gmra.mxu1 %vm385_vm1, %v250_v26 }
  0xad   :  { %v552_v33 = vpop.f32.mrf.mxu2  ;;  %v699_v34 = vpop.f32.mrf.mxu3 }
  0xae   :  { %v485_v36 = vpop.f32.mrf.mxu0  ;;  %v697_v6 = vadd.f32 %v696_v18, %v552_v33  ;;  %v224_v18 = vmax.f32 %v116_v12, 0.0  ;;  %v254_v33 = vpack.c.bf16 %v170_v21, %v168_v20 }
  0xaf   :  { %v5602_v38 = vadd.f32 %v629_v27, %v485_v36  ;;  %v169_v36 = vmax.f32 %v61_v29, 0.0 }
  0xb0   :  { %v631_v41 = vpop.f32.mrf.mxu1  ;;  %v773_v17 = vpack.c.bf16 %v697_v6, %v695_v5  ;;  %v282_v27 = vpack.c.bf16 %v226_v19, %v224_v18  ;;  %v171_v5 = vmax.f32 %v63_v62, 0.0  ;;  %v173_v6 = vmax.f32 %v65_v63, 0.0  ;;  %v68_v18 = vld [vmem:[%s8668_s0 + $0x1a8] sm:$0xff]  ;;  %v70_v19 = vld [vmem:[%s8668_s0 + $0x1b8] sm:$0xff] }
  0xb1   :  { %524 = vmatmul.bf16.gmra.mxu0 %v249_v35  ;;  %v167_v35 = vmax.f32 %v59_v28, 0.0  ;;  %v176_v20 = vmax.f32 %v68_v18, 0.0  ;;  %v178_v21 = vmax.f32 %v70_v19, 0.0 }
  0xb2   :  { %594 = vmatmul.bf16.gmra.mxu2 %v277_v37  ;;  %v223_v37 = vmax.f32 %v115_v31, 0.0  ;;  %v255_v13 = vpack.c.bf16 %v173_v6, %v171_v5  ;;  %v67_v31 = vld [vmem:[%s8668_s0 + $0x1a0] sm:$0xff] }
  0xb3   :  { %v253_v42 = vpack.c.bf16 %v169_v36, %v167_v35  ;;  %v175_v35 = vmax.f32 %v67_v31, 0.0  ;;  %v177_v36 = vmax.f32 %v69_v32, 0.0 }
  0xb4   :  { %v281_v44 = vpack.c.bf16 %v225_v39, %v223_v37 }
  0xb5   :  { %v555_v48 = vpop.f32.mrf.mxu2  ;;  %v701_v49 = vpop.f32.mrf.mxu3 }
  0xb6   :  { %v487_v50 = vpop.f32.mrf.mxu0  ;;  %v700_v0 = vadd.f32 %v699_v34, %v555_v48 }
  0xb7   :  { %v5622_v54 = vadd.f32 %v631_v41, %v487_v50  ;;  %v66_v50 = vld [vmem:[%s8668_s0 + $0x198] sm:$0xff] }
  0xb8   :  { %v634_v58 = vpop.f32.mrf.mxu1  ;;  %v174_v55 = vmax.f32 %v66_v50, 0.0 }
  0xb9   :  { %v760_v61 = vpack.c.bf16 %v5622_v54, %v5602_v38 }
  0xba   :  { %3924 = vmatmul.msk.bf16.gmra.mxu3 %vm385_vm1, %v280_v51  ;;  %v228_v51 = vmax.f32 %v120_v46, 0.0 }
  0xbb   :  { %3910 = vmatmul.msk.bf16.gmra.mxu1 %vm385_vm1, %v252_v57 }
  0xbc   :  { %v284_v60 = vpack.c.bf16 %v230_v52, %v228_v51 }
  0xbd   :  { %v557_v1 = vpop.f32.mrf.mxu2  ;;  %v704_v2 = vpop.f32.mrf.mxu3 }
  0xbe   :  { %v702_v8 = vadd.f32 %v701_v49, %v557_v1  ;;  %v490_v9 = vpop.f32.mrf.mxu0  ;;  %v64_v49 = vld [vmem:[%s8668_s0 + $0x188] sm:$0xff]  ;;  %v121_v1 = vld [vmem:[%s8668_s0 + $0x350] sm:$0xff] }
  0xbf   :  { %v5635_v11 = vadd.f32 %v634_v58, %v490_v9  ;;  %v172_v53 = vmax.f32 %v64_v49, 0.0  ;;  %v229_v9 = vmax.f32 %v121_v1, 0.0 }
  0xc0   :  { %v774_v14 = vpack.c.bf16 %v702_v8, %v700_v0  ;;  %v5643_v15 = vpop.f32.mrf.mxu1  ;;  %v119_v0 = vld [vmem:[%s8668_s0 + $0x340] sm:$0xff] }
  0xc1   :  { %529 = vmatmul.bf16.gmra.mxu0 %v251_v4  ;;  %v227_v8 = vmax.f32 %v119_v0, 0.0 }
  0xc2   :  { %599 = vmatmul.bf16.gmra.mxu2 %v279_v10  ;;  %2749 = vmatpush.bf16.msrb.mxu3 %v774_v14 }
  0xc3   :  { %v283_v3 = vpack.c.bf16 %v229_v9, %v227_v8 }
  0xc5   :  { %v560_v22 = vpop.f32.mrf.mxu2  ;;  %v5651_v24 = vpop.f32.mrf.mxu3 }
  0xc6   :  { %v5653_v25 = vadd.f32 %v704_v2, %v560_v22  ;;  %2750 = vmatpush.bf16.msrb.mxu3 %v773_v17  ;;  %v5655_v26 = vpop.f32.mrf.mxu0  ;;  %v256_v2 = vpack.c.bf16 %v174_v55, %v172_v53 }
  0xc8   :  { %v639_v34 = vpop.f32.mrf.mxu1 }
  0xca   :  { %3925 = vmatmul.msk.bf16.gmra.mxu3 %vm385_vm1, %v282_v27 }
  0xcb   :  { %3911 = vmatmul.msk.bf16.gmra.mxu1 %vm385_vm1, %v254_v33  ;;  %v258_v33 = vpack.c.bf16 %v178_v21, %v176_v20 }
  0xcd   :  { %v5671_v40 = vpop.f32.mrf.mxu2  ;;  %v709_v41 = vpop.f32.mrf.mxu3 }
  0xce   :  { %v495_v43 = vpop.f32.mrf.mxu0 }
  0xcf   :  { %v5673_v45 = vadd.f32 %v639_v34, %v495_v43 }
  0xd0   :  { %v5681_v48 = vpop.f32.mrf.mxu1 }
  0xd1   :  { %534 = vmatmul.bf16.gmra.mxu0 %v253_v42 }
  0xd2   :  { %604 = vmatmul.bf16.gmra.mxu2 %v281_v44 }
  0xd5   :  { %v565_v56 = vpop.f32.mrf.mxu2  ;;  %v5689_v57 = vpop.f32.mrf.mxu3 }
  0xd6   :  { %v5691_v58 = vadd.f32 %v709_v41, %v565_v56  ;;  %v5693_v59 = vpop.f32.mrf.mxu0  ;;  %v257_v41 = vpack.c.bf16 %v177_v36, %v175_v35 }
  0xd8   :  { %v644_v4 = vpop.f32.mrf.mxu1 }
  0xda   :  { %3926 = vmatmul.msk.bf16.gmra.mxu3 %vm385_vm1, %v284_v60 }
  0xdb   :  { %3912 = vmatmul.msk.bf16.gmra.mxu1 %vm385_vm1, %v256_v2 }
  0xdd   :  { %v5709_v10 = vpop.f32.mrf.mxu2  ;;  %v714_v12 = vpop.f32.mrf.mxu3 }
  0xde   :  { %v500_v14 = vpop.f32.mrf.mxu0 }
  0xdf   :  { %v5711_v16 = vadd.f32 %v644_v4, %v500_v14 }
  0xe0   :  { %v646_v17 = vpop.f32.mrf.mxu1 }
  0xe1   :  { %539 = vmatmul.bf16.gmra.mxu0 %v255_v13 }
  0xe2   :  { %609 = vmatmul.bf16.gmra.mxu2 %v283_v3 }
  0xe5   :  { %v570_v22 = vpop.f32.mrf.mxu2  ;;  %v5719_v27 = vpop.f32.mrf.mxu3 }
  0xe6   :  { %v5721_v28 = vadd.f32 %v714_v12, %v570_v22  ;;  %v502_v29 = vpop.f32.mrf.mxu0 }
  0xe8   :  { %v649_v34 = vpop.f32.mrf.mxu1 }
  0xeb   :  { %3913 = vmatmul.msk.bf16.gmra.mxu1 %vm385_vm1, %v258_v33 }
  0xed   :  { %v5730_v37 = vpop.f32.mrf.mxu2  ;;  %v719_v39 = vpop.f32.mrf.mxu3 }
  0xee   :  { %v505_v42 = vpop.f32.mrf.mxu0 }
  0xef   :  { %v650_v33 = vadd.f32 %v649_v34, %v505_v42  ;;  %v637_v34 = vadd.f32 %v5643_v15, %v5655_v26 }
  0xf0   :  { %v651_v43 = vpop.f32.mrf.mxu1 }
  0xf1   :  { %544 = vmatmul.bf16.gmra.mxu0 %v257_v41 }
  0xf5   :  { %v575_v44 = vpop.f32.mrf.mxu2  ;;  %v5732_v46 = vpop.f32.mrf.mxu3 }
  0xf6   :  { %v5734_v47 = vadd.f32 %v719_v39, %v575_v44  ;;  %v507_v49 = vpop.f32.mrf.mxu0  ;;  %v647_v39 = vadd.f32 %v646_v17, %v502_v29  ;;  %v642_v44 = vadd.f32 %v5681_v48, %v5693_v59 }
  0xf7   :  { %v652_v20 = vadd.f32 %v651_v43, %v507_v49 }
  0xf8   :  { %v654_v50 = vpop.f32.mrf.mxu1  ;;  %v763_v43 = vpack.c.bf16 %v647_v39, %v5711_v16  ;;  %v762_v42 = vpack.c.bf16 %v642_v44, %v5673_v45  ;;  %v707_v39 = vadd.f32 %v5651_v24, %v5671_v40  ;;  %v5012_v24 = vld [vmem:[%s8669_s2 + $0xc] sm:$0xf0] }
  0xf9   :  { %v764_v41 = vpack.c.bf16 %v652_v20, %v650_v33 }
  0xfd   :  { %v5736_v51 = vpop.f32.mrf.mxu2  ;;  %v724_v52 = vpop.f32.mrf.mxu3 }
  0xfe   :  { %v510_v53 = vpop.f32.mrf.mxu0 }
  0xff   :  { %v655_v19 = vadd.f32 %v654_v50, %v510_v53 }
 0x100   :  { %v656_v55 = vpop.f32.mrf.mxu1 }
 0x105   :  { %v580_v56 = vpop.f32.mrf.mxu2  ;;  %v5738_v60 = vpop.f32.mrf.mxu3 }
 0x106   :  { %v5740_v62 = vadd.f32 %v724_v52, %v580_v56  ;;  %v512_v63 = vpop.f32.mrf.mxu0 }
 0x107   :  { %v657_v3 = vadd.f32 %v656_v55, %v512_v63  ;;  %v761_v55 = vpack.c.bf16 %v637_v34, %v5635_v11 }
 0x108   :  { %v659_v0 = vpop.f32.mrf.mxu1 }
 0x109   :  { %v765_v31 = vpack.c.bf16 %v657_v3, %v655_v19 }
 0x10d   :  { %v5742_v1 = vpop.f32.mrf.mxu2  ;;  %v729_v2 = vpop.f32.mrf.mxu3 }
 0x10e   :  { %v515_v4 = vpop.f32.mrf.mxu0 }
 0x10f   :  { %v660_v12 = vadd.f32 %v659_v0, %v515_v4 }
 0x110   :  { %v661_v5 = vpop.f32.mrf.mxu1 }
 0x115   :  { %v585_v6 = vpop.f32.mrf.mxu2  ;;  %v731_v8 = vpop.f32.mrf.mxu3 }
 0x116   :  { %v517_v9 = vpop.f32.mrf.mxu0 }
 0x117   :  { %v662_v13 = vadd.f32 %v661_v5, %v517_v9 }
 0x118   :  { %v664_v14 = vpop.f32.mrf.mxu1 }
 0x119   :  { %v766_v18 = vpack.c.bf16 %v662_v13, %v660_v12 }
 0x11b   :  { %2425 = vmatpush.bf16.msrb.mxu2 %v766_v18  ;;  %v727_v18 = vadd.f32 %v5738_v60, %v5742_v1  ;;  %v712_v1 = vadd.f32 %v5689_v57, %v5709_v10 }
 0x11d   :  { %v587_v21 = vpop.f32.mrf.mxu2  ;;  %v734_v22 = vpop.f32.mrf.mxu3 }
 0x11e   :  { %v520_v32 = vpop.f32.mrf.mxu0  ;;  %v732_v3 = vadd.f32 %v731_v8, %v587_v21  ;;  %v717_v8 = vadd.f32 %v5719_v27, %v5730_v37  ;;  %v775_v27 = vpack.c.bf16 %v707_v39, %v5653_v25  ;;  %v5010_v39 = vld [vmem:[%s8669_s2 + $0x4] sm:$0xf] }
 0x11f   :  { %v5744_v35 = vadd.f32 %v664_v14, %v520_v32  ;;  %2426 = vmatpush.bf16.msrb.mxu2 %v765_v31  ;;  %v730_v14 = vadd.f32 %v729_v2, %v585_v6  ;;  %v779_v31 = vpack.c.bf16 %v727_v18, %v5740_v62 }
 0x120   :  { %v5746_v36 = vpop.f32.mrf.mxu1  ;;  %v777_v33 = vpack.c.bf16 %v717_v8, %v5721_v28 }
 0x121   :  { %v780_v19 = vpack.c.bf16 %v732_v3, %v730_v14 }
 0x123   :  { %2427 = vmatpush.bf16.msrb.mxu2 %v764_v41  ;;  %v776_v41 = vpack.c.bf16 %v712_v1, %v5691_v58  ;;  %v3953_v1 = vld [vmem:[%s8669_s2 + $0x28] sm:$0xf] }
 0x125   :  { %v590_v52 = vpop.f32.mrf.mxu2  ;;  %v736_v50 = vpop.f32.mrf.mxu3 }
 0x126   :  { %v5751_v49 = vpop.f32.mrf.mxu0  ;;  %v735_v4 = vadd.f32 %v734_v22, %v590_v52  ;;  %v722_v22 = vadd.f32 %v5732_v46, %v5736_v51 }
 0x127   :  { %2428 = vmatpush.bf16.msrb.mxu2 %v763_v43 }
 0x128   :  { %v669_v53 = vpop.f32.mrf.mxu1  ;;  %v778_v21 = vpack.c.bf16 %v722_v22, %v5734_v47 }
 0x12b   :  { %2429 = vmatpush.bf16.msrb.mxu2 %v762_v42 }
 0x12d   :  { %v592_v17 = vpop.f32.mrf.mxu2  ;;  %v739_v29 = vpop.f32.mrf.mxu3 }
 0x12e   :  { %v525_v56 = vpop.f32.mrf.mxu0  ;;  %v737_v5 = vadd.f32 %v736_v50, %v592_v17  ;;  %v3929_v50 = vld [vmem:[%s8669_s2] sm:$0xf] }
 0x12f   :  { %v5757_v48 = vadd.f32 %v669_v53, %v525_v56  ;;  %2430 = vmatpush.bf16.msrb.mxu2 %v761_v55  ;;  %v3930_v40 = vor.u32 %v5012_v24, %v3929_v50  ;;  %v3937_v56 = vld [vmem:[%s8669_s2 + $0x8] sm:$0xf]  ;;  %v3947_v50 = vld [vmem:[%s8669_s2 + $0x30] sm:$0xf0] }
 0x130   :  { %v5759_v59 = vpop.f32.mrf.mxu1 }
 0x133   :  { %2431 = vmatpush.bf16.msrb.mxu2 %v760_v61  ;;  %v781_v61 = vpack.c.bf16 %v737_v5, %v735_v4  ;;  %v3945_v4 = vld [vmem:[%s8669_s2 + $0x20] sm:$0xf]  ;;  %v5016_v5 = vld [vmem:[%s8669_s2 + $0x2c] sm:$0xf0] }
 0x135   :  { %v595_v16 = vpop.f32.mrf.mxu2  ;;  %v741_v63 = vpop.f32.mrf.mxu3 }
 0x136   :  { %v5764_v15 = vpop.f32.mrf.mxu0  ;;  %v740_v11 = vadd.f32 %v739_v29, %v595_v16  ;;  %v5013_v16 = vld [vmem:[%s8669_s2 + $0x14] sm:$0xf0] }
 0x137   :  { %2432 = vmatpush.bf16.msrb.mxu2 %v759_v30 }
 0x138   :  { %v674_v26 = vpop.f32.mrf.mxu1 }
 0x13a   :  { %2433 = vmatmul.bf16.vlgmr.msrb.gmra.mxu2 %v3930_v40  ;;  %v3985_v40 = vld [vmem:[%s8669_s2 + $0x68] sm:$0xf] }
 0x13d   :  { %v597_v45 = vpop.f32.mrf.mxu2  ;;  %v5769_v0 = vpop.f32.mrf.mxu3 }
 0x13e   :  { %v742_v9 = vadd.f32 %v741_v63, %v597_v45  ;;  %v530_v12 = vpop.f32.mrf.mxu0 }
 0x13f   :  { %v5771_v13 = vadd.f32 %v674_v26, %v530_v12  ;;  %v3938_v26 = vor.u32 %v5013_v16, %v3937_v56  ;;  %v3963_v56 = vld [vmem:[%s8669_s2 + $0x50] sm:$0xf0] }
 0x140   :  { %v782_v38 = vpack.c.bf16 %v742_v9, %v740_v11  ;;  %v5773_v54 = vpop.f32.mrf.mxu1 }
 0x142   :  { %3073 = vmatpush.bf16.msrb.mxu1 %v782_v38  ;;  %v5011_v38 = vld [vmem:[%s8669_s2 + $0xc] sm:$0xf] }
 0x145   :  { %v600_v7 = vpop.f32.mrf.mxu2  ;;  %v746_v23 = vpop.f32.mrf.mxu3 }
 0x146   :  { %3074 = vmatpush.bf16.msrb.mxu1 %v781_v61  ;;  %v5775_v30 = vpop.f32.mrf.mxu0  ;;  %v745_v11 = vadd.f32 %v5769_v0, %v600_v7  ;;  %v3939_v0 = vld [vmem:[%s8669_s2 + $0x18] sm:$0xf0]  ;;  %v3946_v7 = vor.u32 %v5016_v5, %v3945_v4  ;;  %v5032_v4 = vld [vmem:[%s8669_s2 + $0xac] sm:$0xf0]  ;;  %v5027_v5 = vld [vmem:[%s8669_s2 + $0x8c] sm:$0xf] }
 0x147   :  { %v677_v8 = vadd.f32 %v5773_v54, %v5775_v30  ;;  %v3961_v54 = vld [vmem:[%s8669_s2 + $0x40] sm:$0xf]  ;;  %v5020_v30 = vld [vmem:[%s8669_s2 + $0x4c] sm:$0xf0] }
 0x148   :  { %v5779_v20 = vpop.f32.mrf.mxu1 }
 0x14a   :  { %3075 = vmatpush.bf16.msrb.mxu1 %v780_v19  ;;  %v3942_v19 = vor.u32 %v5011_v38, %v3939_v0  ;;  %2438 = vmatmul.bf16.gmra.mxu2 %v3946_v7  ;;  %v5022_v0 = vld [vmem:[%s8669_s2 + $0x64] sm:$0xf]  ;;  %v5033_v7 = vld [vmem:[%s8669_s2 + $0xb4] sm:$0xf0] }
 0x14d   :  { %v602_v32 = vpop.f32.mrf.mxu2  ;;  %v749_v2 = vpop.f32.mrf.mxu3 }
 0x14e   :  { %3076 = vmatpush.bf16.msrb.mxu1 %v779_v31  ;;  %v5784_v6 = vpop.f32.mrf.mxu0  ;;  %v747_v45 = vadd.f32 %v746_v23, %v602_v32 }
 0x150   :  { %v681_v60 = vpop.f32.mrf.mxu1  ;;  %v783_v3 = vpack.c.bf16 %v747_v45, %v745_v11  ;;  %v4009_v45 = vld [vmem:[%s8669_s2 + $0xa0] sm:$0xf] }
 0x152   :  { %3077 = vmatpush.bf16.msrb.mxu1 %v778_v21 }
 0x155   :  { %v605_v46 = vpop.f32.mrf.mxu2  ;;  %v751_v62 = vpop.f32.mrf.mxu3 }
 0x156   :  { %3078 = vmatpush.bf16.msrb.mxu1 %v777_v33  ;;  %v537_v51 = vpop.f32.mrf.mxu0  ;;  %v750_v34 = vadd.f32 %v749_v2, %v605_v46  ;;  %v680_v2 = vadd.f32 %v5779_v20, %v5784_v6  ;;  %v5017_v33 = vld [vmem:[%s8669_s2 + $0x34] sm:$0xf0]  ;;  %v672_v46 = vadd.f32 %v5759_v59, %v5764_v15  ;;  %v769_v20 = vpack.c.bf16 %v677_v8, %v5771_v13  ;;  %v5015_v6 = vld [vmem:[%s8669_s2 + $0x2c] sm:$0xf]  ;;  %v5026_v8 = vld [vmem:[%s8669_s2 + $0x84] sm:$0xf] }
 0x157   :  { %v682_v31 = vadd.f32 %v681_v60, %v537_v51  ;;  %v3954_v60 = vor.u32 %v5017_v33, %v3953_v1  ;;  %v3955_v51 = vld [vmem:[%s8669_s2 + $0x38] sm:$0xf0]  ;;  %v3962_v59 = vor.u32 %v5020_v30, %v3961_v54  ;;  %v667_v15 = vadd.f32 %v5746_v36, %v5751_v49  ;;  %v3969_v36 = vld [vmem:[%s8669_s2 + $0x48] sm:$0xf]  ;;  %v5021_v49 = vld [vmem:[%s8669_s2 + $0x54] sm:$0xf0] }
 0x158   :  { %v684_v44 = vpop.f32.mrf.mxu1  ;;  %v768_v13 = vpack.c.bf16 %v672_v46, %v5757_v48  ;;  %v3970_v48 = vor.u32 %v5021_v49, %v3969_v36  ;;  %v4033_v33 = vld [vmem:[%s8669_s2 + $0xc8] sm:$0xf]  ;;  %v5040_v54 = vld [vmem:[%s8669_s2 + $0xec] sm:$0xf0]  ;;  %v5035_v30 = vld [vmem:[%s8669_s2 + $0xcc] sm:$0xf] }
 0x159   :  { %v770_v21 = vpack.c.bf16 %v682_v31, %v680_v2  ;;  %v4019_v31 = vld [vmem:[%s8669_s2 + $0xb8] sm:$0xf0]  ;;  %v5044_v36 = vld [vmem:[%s8669_s2 + $0x10c] sm:$0xf0]  ;;  %v5039_v49 = vld [vmem:[%s8669_s2 + $0xec] sm:$0xf] }
 0x15a   :  { %3079 = vmatpush.bf16.msrb.mxu1 %v776_v41  ;;  %v3931_v41 = vld [vmem:[%s8669_s2 + $0x10] sm:$0xf0]  ;;  %2443 = vmatmul.bf16.gmra.mxu2 %v3962_v59 }
 0x15d   :  { %v607_v37 = vpop.f32.mrf.mxu2  ;;  %v754_v52 = vpop.f32.mrf.mxu3 }
 0x15e   :  { %3080 = vmatpush.bf16.msrb.mxu1 %v775_v27  ;;  %v540_v47 = vpop.f32.mrf.mxu0  ;;  %v752_v42 = vadd.f32 %v751_v62, %v607_v37  ;;  %v3958_v62 = vor.u32 %v5015_v6, %v3955_v51  ;;  %v3934_v27 = vor.u32 %v5010_v39, %v3931_v41  ;;  %v3977_v37 = vld [vmem:[%s8669_s2 + $0x60] sm:$0xf]  ;;  %v4035_v6 = vld [vmem:[%s8669_s2 + $0xd8] sm:$0xf0]  ;;  %v4049_v39 = vld [vmem:[%s8669_s2 + $0xe8] sm:$0xf] }
 0x15f   :  { %v685_v22 = vadd.f32 %v684_v44, %v540_v47  ;;  %v767_v44 = vpack.c.bf16 %v667_v15, %v5744_v35  ;;  %v5024_v35 = vld [vmem:[%s8669_s2 + $0x6c] sm:$0xf0]  ;;  %v5019_v47 = vld [vmem:[%s8669_s2 + $0x4c] sm:$0xf]  ;;  %v4038_v59 = vor.u32 %v5035_v30, %v4035_v6  ;;  %v5030_v15 = vld [vmem:[%s8669_s2 + $0xa4] sm:$0xf] }
 0x160   :  { %v686_v57 = vpop.f32.mrf.mxu1  ;;  %v784_v63 = vpack.c.bf16 %v752_v42, %v750_v34  ;;  %v5023_v34 = vld [vmem:[%s8669_s2 + $0x6c] sm:$0xf]  ;;  %v3987_v42 = vld [vmem:[%s8669_s2 + $0x78] sm:$0xf0]  ;;  %v5041_v41 = vld [vmem:[%s8669_s2 + $0xf4] sm:$0xf0] }
 0x161   :  { %3081 = vmatmul.bf16.vlgmr.msrb.gmra.mxu1 %v3938_v26  ;;  %v5029_v26 = vld [vmem:[%s8669_s2 + $0x94] sm:$0xf0] }
 0x165   :  { %v610_v10 = vpop.f32.mrf.mxu2  ;;  %v756_v58 = vpop.f32.mrf.mxu3 }
 0x166   :  { %v542_v28 = vpop.f32.mrf.mxu0  ;;  %v755_v43 = vadd.f32 %v754_v52, %v610_v10  ;;  %v3971_v52 = vld [vmem:[%s8669_s2 + $0x58] sm:$0xf0] }
 0x167   :  { %v687_v23 = vadd.f32 %v686_v57, %v542_v28  ;;  %v3978_v57 = vor.u32 %v5024_v35, %v3977_v37  ;;  %v3974_v10 = vor.u32 %v5019_v47, %v3971_v52  ;;  %v5014_v28 = vld [vmem:[%s8669_s2 + $0x24] sm:$0xf]  ;;  %v4027_v52 = vld [vmem:[%s8669_s2 + $0xd0] sm:$0xf0] }
 0x168   :  { %v689_v53 = vpop.f32.mrf.mxu1  ;;  %v3950_v24 = vor.u32 %v5014_v28, %v3947_v50  ;;  %v5034_v47 = vld [vmem:[%s8669_s2 + $0xc4] sm:$0xf]  ;;  %v4065_v50 = vld [vmem:[%s8669_s2 + $0x108] sm:$0xf] }
 0x169   :  { %v771_v32 = vpack.c.bf16 %v687_v23, %v685_v22  ;;  %v5031_v22 = vld [vmem:[%s8669_s2 + $0xac] sm:$0xf] }
 0x16a   :  { %2448 = vmatmul.bf16.gmra.mxu2 %v3978_v57  ;;  %v4022_v2 = vor.u32 %v5031_v22, %v4019_v31  ;;  %v4030_v57 = vor.u32 %v5034_v47, %v4027_v52  ;;  %v4059_v22 = vld [vmem:[%s8669_s2 + $0x110] sm:$0xf0]  ;;  %v4113_v52 = vld [vmem:[%s8669_s2 + $0x168] sm:$0xf] }
 0x16d   :  { %v612_v25 = vpop.f32.mrf.mxu2 }
 0x16e   :  { %v757_v17 = vadd.f32 %v756_v58, %v612_v25  ;;  %v545_v29 = vpop.f32.mrf.mxu0  ;;  %v5025_v58 = vld [vmem:[%s8669_s2 + $0x74] sm:$0xf0]  ;;  %v5028_v25 = vld [vmem:[%s8669_s2 + $0x8c] sm:$0xf0] }
 0x16f   :  { %v690_v61 = vadd.f32 %v689_v53, %v545_v29  ;;  %v3993_v53 = vld [vmem:[%s8669_s2 + $0x80] sm:$0xf]  ;;  %v3990_v29 = vor.u32 %v5023_v34, %v3987_v42 }
 0x170   :  { %v785_v55 = vpack.c.bf16 %v757_v17, %v755_v43  ;;  %v691_v12 = vpop.f32.mrf.mxu1  ;;  %v3986_v43 = vor.u32 %v5025_v58, %v3985_v40  ;;  %v3994_v17 = vor.u32 %v5028_v25, %v3993_v53  ;;  %v5043_v58 = vld [vmem:[%s8669_s2 + $0x10c] sm:$0xf]  ;;  %v4073_v42 = vld [vmem:[%s8669_s2 + $0x120] sm:$0xf] }
 0x171   :  { %3086 = vmatmul.bf16.gmra.mxu1 %v3954_v60  ;;  %v5037_v60 = vld [vmem:[%s8669_s2 + $0xd4] sm:$0xf0] }
 0x172   :  { %3402 = vmatpush.bf16.msrb.mxu0 %v785_v55  ;;  %v5018_v55 = vld [vmem:[%s8669_s2 + $0x44] sm:$0xf]  ;;  %v4034_v46 = vor.u32 %v5037_v60, %v4033_v33 }
 0x173   :  { %v3966_v16 = vor.u32 %v5018_v55, %v3963_v56  ;;  %v5038_v56 = vld [vmem:[%s8669_s2 + $0xe4] sm:$0xf] }
 0x176   :  { %3403 = vmatpush.bf16.msrb.mxu0 %v784_v63  ;;  %v547_v9 = vpop.f32.mrf.mxu0  ;;  %v4001_v63 = vld [vmem:[%s8669_s2 + $0x88] sm:$0xf] }
 0x177   :  { %v692_v14 = vadd.f32 %v691_v12, %v547_v9  ;;  %v4002_v11 = vor.u32 %v5029_v26, %v4001_v63  ;;  %v4003_v9 = vld [vmem:[%s8669_s2 + $0x98] sm:$0xf0]  ;;  %v4010_v12 = vor.u32 %v5032_v4, %v4009_v45  ;;  %v4081_v45 = vld [vmem:[%s8669_s2 + $0x128] sm:$0xf] }
 0x178   :  { %v4006_v38 = vor.u32 %v5027_v5, %v4003_v9  ;;  %v5049_v5 = vld [vmem:[%s8669_s2 + $0x134] sm:$0xf0] }
 0x179   :  { %v772_v18 = vpack.c.bf16 %v692_v14, %v690_v61  ;;  %v3979_v61 = vld [vmem:[%s8669_s2 + $0x70] sm:$0xf0]  ;;  %v4082_v9 = vor.u32 %v5049_v5, %v4081_v45 }
 0x17a   :  { %3404 = vmatpush.bf16.msrb.mxu0 %v783_v3  ;;  %2453 = vmatmul.bf16.gmra.mxu2 %v3994_v17  ;;  %v3982_v14 = vor.u32 %v5022_v0, %v3979_v61  ;;  %v4017_v3 = vld [vmem:[%s8669_s2 + $0xa8] sm:$0xf]  ;;  %v5048_v17 = vld [vmem:[%s8669_s2 + $0x12c] sm:$0xf0] }
 0x17b   :  { %2751 = vmatpush.bf16.msrb.mxu3 %v772_v18  ;;  %v4018_v23 = vor.u32 %v5033_v7, %v4017_v3  ;;  %v4025_v18 = vld [vmem:[%s8669_s2 + $0xc0] sm:$0xf]  ;;  %v4074_v55 = vor.u32 %v5048_v17, %v4073_v42  ;;  %v5052_v7 = vld [vmem:[%s8669_s2 + $0x14c] sm:$0xf0] }
 0x17c   :  { %v4089_v3 = vld [vmem:[%s8669_s2 + $0x140] sm:$0xf] }
 0x17d   :  { %4935 = vmatmul.msk.bf16.vlgmr.msrb.gmra.mxu0 %vm2235_vm2, %v3942_v19  ;;  %v5036_v19 = vld [vmem:[%s8669_s2 + $0xcc] sm:$0xf0]  ;;  %v4121_v17 = vld [vmem:[%s8669_s2 + $0x180] sm:$0xf] }
 0x17f   :  { %2752 = vmatpush.bf16.msrb.mxu3 %v771_v32  ;;  %v4026_v32 = vor.u32 %v5036_v19, %v4025_v18  ;;  %v4090_v18 = vor.u32 %v5052_v7, %v4089_v3  ;;  %v5042_v19 = vld [vmem:[%s8669_s2 + $0x104] sm:$0xf]  ;;  %v5061_v7 = vld [vmem:[%s8669_s2 + $0x194] sm:$0xf0] }
 0x180   :  { %v4062_v31 = vor.u32 %v5042_v19, %v4059_v22  ;;  %v4131_v19 = vld [vmem:[%s8669_s2 + $0x198] sm:$0xf0] }
 0x181   :  { %3091 = vmatmul.bf16.gmra.mxu1 %v3970_v48  ;;  %v4051_v48 = vld [vmem:[%s8669_s2 + $0xf8] sm:$0xf0] }
 0x182   :  { %v4054_v35 = vor.u32 %v5039_v49, %v4051_v48 }
 0x183   :  { %2753 = vmatpush.bf16.msrb.mxu3 %v770_v21  ;;  %v3995_v21 = vld [vmem:[%s8669_s2 + $0x90] sm:$0xf0] }
 0x184   :  { %v3998_v1 = vor.u32 %v5026_v8, %v3995_v21  ;;  %v4097_v8 = vld [vmem:[%s8669_s2 + $0x148] sm:$0xf] }
 0x187   :  { %2754 = vmatpush.bf16.msrb.mxu3 %v769_v20  ;;  %v4041_v20 = vld [vmem:[%s8669_s2 + $0xe0] sm:$0xf] }
 0x188   :  { %v4042_v51 = vor.u32 %v5040_v54, %v4041_v20  ;;  %v5051_v20 = vld [vmem:[%s8669_s2 + $0x14c] sm:$0xf]  ;;  %v4099_v54 = vld [vmem:[%s8669_s2 + $0x158] sm:$0xf0] }
 0x18a   :  { %2458 = vmatmul.bf16.gmra.mxu2 %v4010_v12  ;;  %v5047_v12 = vld [vmem:[%s8669_s2 + $0x12c] sm:$0xf] }
 0x18b   :  { %2755 = vmatpush.bf16.msrb.mxu3 %v768_v13  ;;  %v4011_v13 = vld [vmem:[%s8669_s2 + $0xb0] sm:$0xf0] }
 0x18d   :  { %4936 = vmatmul.msk.bf16.gmra.mxu0 %vm2235_vm2, %v3958_v62  ;;  %v4014_v62 = vor.u32 %v5030_v15, %v4011_v13  ;;  %v4105_v15 = vld [vmem:[%s8669_s2 + $0x160] sm:$0xf]  ;;  %v5056_v13 = vld [vmem:[%s8669_s2 + $0x16c] sm:$0xf0] }
 0x18f   :  { %2756 = vmatpush.bf16.msrb.mxu3 %v767_v44  ;;  %v4050_v44 = vor.u32 %v5041_v41, %v4049_v39  ;;  %v4106_v41 = vor.u32 %v5056_v13, %v4105_v15 }
 0x191   :  { %3096 = vmatmul.bf16.gmra.mxu1 %v3986_v43  ;;  %v4067_v43 = vld [vmem:[%s8669_s2 + $0x118] sm:$0xf0] }
 0x192   :  { %2757 = vmatmul.bf16.vlgmr.msrb.gmra.mxu3 %v3934_v27  ;;  %v4057_v27 = vld [vmem:[%s8669_s2 + $0x100] sm:$0xf]  ;;  %v4070_v25 = vor.u32 %v5043_v58, %v4067_v43  ;;  %v5055_v58 = vld [vmem:[%s8669_s2 + $0x16c] sm:$0xf]  ;;  %v4115_v43 = vld [vmem:[%s8669_s2 + $0x178] sm:$0xf0] }
 0x193   :  { %v4058_v37 = vor.u32 %v5044_v36, %v4057_v27  ;;  %v4075_v27 = vld [vmem:[%s8669_s2 + $0x130] sm:$0xf0] }
 0x19a   :  { %2463 = vmatmul.bf16.gmra.mxu2 %v4026_v32 }
 0x19d   :  { %4937 = vmatmul.msk.bf16.gmra.mxu0 %vm2235_vm2, %v3974_v10 }
 0x1a1   :  { %3101 = vmatmul.bf16.gmra.mxu1 %v4002_v11 }
 0x1a2   :  { %2762 = vmatmul.bf16.gmra.mxu3 %v3950_v24  ;;  %v5045_v24 = vld [vmem:[%s8669_s2 + $0x114] sm:$0xf0] }
 0x1a3   :  { %v4066_v40 = vor.u32 %v5045_v24, %v4065_v50 }
 0x1aa   :  { %2468 = vmatmul.bf16.gmra.mxu2 %v4042_v51  ;;  %v4102_v51 = vor.u32 %v5051_v20, %v4099_v54  ;;  %v4107_v20 = vld [vmem:[%s8669_s2 + $0x170] sm:$0xf0] }
 0x1ad   :  { %4938 = vmatmul.msk.bf16.gmra.mxu0 %vm2235_vm2, %v3990_v29 }
 0x1b1   :  { %3106 = vmatmul.bf16.gmra.mxu1 %v4018_v23 }
 0x1b2   :  { %2767 = vmatmul.bf16.gmra.mxu3 %v3966_v16  ;;  %v4043_v16 = vld [vmem:[%s8669_s2 + $0xf0] sm:$0xf0] }
 0x1b3   :  { %v4046_v63 = vor.u32 %v5038_v56, %v4043_v16 }
 0x1ba   :  { %2473 = vmatmul.bf16.gmra.mxu2 %v4058_v37 }
 0x1bd   :  { %4939 = vmatmul.msk.bf16.gmra.mxu0 %vm2235_vm2, %v4006_v38  ;;  %v2434_v10 = vpop.f32.mrf.mxu2  ;;  %v4083_v38 = vld [vmem:[%s8669_s2 + $0x138] sm:$0xf0] }
 0x1be   :  { %v4086_v61 = vor.u32 %v5047_v12, %v4083_v38  ;;  %v4129_v38 = vld [vmem:[%s8669_s2 + $0x188] sm:$0xf] }
 0x1c1   :  { %3111 = vmatmul.bf16.gmra.mxu1 %v4034_v46 }
 0x1c2   :  { %2772 = vmatmul.bf16.gmra.mxu3 %v3982_v14 }
 0x1c5   :  { %v6020_v53 = vpop.f32.mrf.mxu2 }
 0x1ca   :  { %2478 = vmatmul.bf16.gmra.mxu2 %v4074_v55 }
 0x1cd   :  { %4940 = vmatmul.msk.bf16.gmra.mxu0 %vm2235_vm2, %v4022_v2  ;;  %v6037_v26 = vpop.f32.mrf.mxu2 }
 0x1d1   :  { %3116 = vmatmul.bf16.gmra.mxu1 %v4050_v44  ;;  %v5046_v44 = vld [vmem:[%s8669_s2 + $0x124] sm:$0xf] }
 0x1d2   :  { %2777 = vmatmul.bf16.gmra.mxu3 %v3998_v1  ;;  %v5053_v1 = vld [vmem:[%s8669_s2 + $0x154] sm:$0xf0]  ;;  %v4078_v48 = vor.u32 %v5046_v44, %v4075_v27 }
 0x1d3   :  { %v4098_v33 = vor.u32 %v5053_v1, %v4097_v8  ;;  %v4137_v1 = vld [vmem:[%s8669_s2 + $0x1a0] sm:$0xf]  ;;  %v5065_v27 = vld [vmem:[%s8669_s2 + $0x1b4] sm:$0xf0] }
 0x1d5   :  { %v6053_v0 = vpop.f32.mrf.mxu2 }
 0x1da   :  { %2483 = vmatmul.bf16.gmra.mxu2 %v4090_v18  ;;  %v5059_v18 = vld [vmem:[%s8669_s2 + $0x18c] sm:$0xf] }
 0x1db   :  { %v4134_v8 = vor.u32 %v5059_v18, %v4131_v19  ;;  %v4139_v18 = vld [vmem:[%s8669_s2 + $0x1b0] sm:$0xf0] }
 0x1dd   :  { %4941 = vmatmul.msk.bf16.gmra.mxu0 %vm2235_vm2, %v4038_v59  ;;  %v6070_v32 = vpop.f32.mrf.mxu2 }
 0x1de   :  { %v3082_v28 = vpop.f32.mrf.mxu1 }
 0x1e1   :  { %3121 = vmatmul.bf16.gmra.mxu1 %v4066_v40 }
 0x1e2   :  { %2782 = vmatmul.bf16.gmra.mxu3 %v4014_v62 }
 0x1e5   :  { %v6088_v30 = vpop.f32.mrf.mxu2 }
 0x1e6   :  { %v6022_v34 = vpop.f32.mrf.mxu1 }
 0x1ea   :  { %2488 = vmatmul.bf16.gmra.mxu2 %v4106_v41 }
 0x1ed   :  { %4942 = vmatmul.msk.bf16.gmra.mxu0 %vm2235_vm2, %v4054_v35  ;;  %v6112_v37 = vpop.f32.mrf.mxu2 }
 0x1ee   :  { %v6039_v11 = vpop.f32.mrf.mxu1 }
 0x1f1   :  { %3126 = vmatmul.bf16.gmra.mxu1 %v4082_v9 }
 0x1f2   :  { %2787 = vmatmul.bf16.gmra.mxu3 %v4030_v57 }
 0x1f6   :  { %v6055_v14 = vpop.f32.mrf.mxu1 }
 0x1fa   :  { %v3406_v29 = vpop.f32.mrf.mxu0 }
 0x1fd   :  { %4943 = vmatmul.msk.bf16.gmra.mxu0 %vm2235_vm2, %v4070_v25 }
 0x1fe   :  { %v6072_v2 = vpop.f32.mrf.mxu1 }
 0x201   :  { %3131 = vmatmul.bf16.gmra.mxu1 %v4098_v33 }
 0x202   :  { %2792 = vmatmul.bf16.gmra.mxu3 %v4046_v63  ;;  %v3408_v4 = vpop.f32.mrf.mxu0  ;;  %v5050_v63 = vld [vmem:[%s8669_s2 + $0x144] sm:$0xf] }
 0x206   :  { %v6090_v59 = vpop.f32.mrf.mxu1 }
 0x20a   :  { %v3411_v23 = vpop.f32.mrf.mxu0 }
 0x20d   :  { %4944 = vmatmul.msk.bf16.gmra.mxu0 %vm2235_vm2, %v4086_v61 }
 0x20e   :  { %v6115_v47 = vpop.f32.mrf.mxu1 }
 0x212   :  { %2797 = vmatmul.bf16.gmra.mxu3 %v4062_v31  ;;  %v6077_v21 = vpop.f32.mrf.mxu0 }
 0x215   :  { %v2758_v60 = vpop.f32.mrf.mxu3 }
 0x216   :  { %v2759_v46 = vadd.f32 %v2758_v60, %v2434_v10  ;;  %v6137_v42 = vpop.f32.mrf.mxu1 }
 0x218   :  { %v3083_v6 = vadd.f32 %v3082_v28, %v2759_v46  ;;  %v5057_v28 = vld [vmem:[%s8669_s2 + $0x174] sm:$0xf0] }
 0x219   :  { %v4114_v50 = vor.u32 %v5057_v28, %v4113_v52  ;;  %v4153_v28 = vld [vmem:[%s8669_s2 + $0x1c0] sm:$0xf] }
 0x21a   :  { %v3407_v62 = vadd.f32 %v3406_v29, %v3083_v6  ;;  %v6098_v39 = vpop.f32.mrf.mxu0  ;;  %v5060_v29 = vld [vmem:[%s8669_s2 + $0x18c] sm:$0xf0] }
 0x21b   :  { %3136 = vmatmul.bf16.gmra.mxu1 %v4114_v50  ;;  %v4122_v16 = vor.u32 %v5060_v29, %v4121_v17 }
 0x21c   :  { %3722 = vst.msk [vmem:[%s8670_s3] sm:$0xff] %vm3721_vm3, %v3407_v62 }
 0x21d   :  { %v2760_v36 = vpop.f32.mrf.mxu3  ;;  %4945 = vmatmul.msk.bf16.gmra.mxu0 %vm2235_vm2, %v4102_v51  ;;  %2493 = vmatmul.bf16.gmra.mxu2 %v4122_v16 }
 0x21e   :  { %v2761_v49 = vadd.f32 %v2760_v36, %v6020_v53  ;;  %v6134_v53 = vpop.f32.mrf.mxu2  ;;  %v6162_v12 = vpop.f32.mrf.mxu1 }
 0x220   :  { %v3085_v35 = vadd.f32 %v6022_v34, %v2761_v49  ;;  %v4118_v34 = vor.u32 %v5055_v58, %v4115_v43  ;;  %v5063_v49 = vld [vmem:[%s8669_s2 + $0x1ac] sm:$0xf]  ;;  %v4123_v58 = vld [vmem:[%s8669_s2 + $0x190] sm:$0xf0] }
 0x222   :  { %v3409_v57 = vadd.f32 %v3408_v4, %v3085_v35  ;;  %2802 = vmatmul.bf16.gmra.mxu3 %v4078_v48  ;;  %v3418_v10 = vpop.f32.mrf.mxu0  ;;  %v4147_v48 = vld [vmem:[%s8669_s2 + $0x1b8] sm:$0xf0] }
 0x224   :  { %3723 = vst.msk [vmem:[%s8670_s3 + $0x8] sm:$0xff] %vm3721_vm3, %v3409_v57  ;;  %v4150_v57 = vor.u32 %v5063_v49, %v4147_v48  ;;  %v5066_v49 = vld [vmem:[%s8669_s2 + $0x1c4] sm:$0xf] }
 0x225   :  { %v2763_v24 = vpop.f32.mrf.mxu3 }
 0x226   :  { %v2764_v40 = vadd.f32 %v2763_v24, %v6037_v26  ;;  %v4091_v26 = vld [vmem:[%s8669_s2 + $0x150] sm:$0xf0]  ;;  %v6159_v5 = vpop.f32.mrf.mxu2 }
 0x227   :  { %v4094_v4 = vor.u32 %v5050_v63, %v4091_v26  ;;  %v5069_v26 = vld [vmem:[%s8669_s2 + $0x1d4] sm:$0xf0] }
 0x228   :  { %v3088_v25 = vadd.f32 %v6039_v11, %v2764_v40 }
 0x22a   :  { %v3412_v55 = vadd.f32 %v3411_v23, %v3088_v25  ;;  %v6145_v56 = vpop.f32.mrf.mxu0 }
 0x22c   :  { %3724 = vst.msk [vmem:[%s8670_s3 + $0x10] sm:$0xff] %vm3721_vm3, %v3412_v55 }
 0x22d   :  { %v2765_v11 = vpop.f32.mrf.mxu3  ;;  %4946 = vmatmul.msk.bf16.gmra.mxu0 %vm2235_vm2, %v4118_v34 }
 0x22e   :  { %v2766_v45 = vadd.f32 %v2765_v11, %v6053_v0  ;;  %v4130_v0 = vor.u32 %v5061_v7, %v4129_v38  ;;  %v6182_v22 = vpop.f32.mrf.mxu2  ;;  %v4169_v7 = vld [vmem:[%s8669_s2 + $0x1e0] sm:$0xf] }
 0x230   :  { %v3090_v9 = vadd.f32 %v6055_v14, %v2766_v45  ;;  %3141 = vmatmul.bf16.gmra.mxu1 %v4130_v0  ;;  %v5067_v45 = vld [vmem:[%s8669_s2 + $0x1cc] sm:$0xf] }
 0x232   :  { %v3414_v61 = vadd.f32 %v6077_v21, %v3090_v9  ;;  %2807 = vmatmul.bf16.gmra.mxu3 %v4094_v4  ;;  %v3423_v3 = vpop.f32.mrf.mxu0  ;;  %v6185_v21 = vpop.f32.mrf.mxu1  ;;  %v4163_v4 = vld [vmem:[%s8669_s2 + $0x1d8] sm:$0xf0] }
 0x234   :  { %3725 = vst.msk [vmem:[%s8670_s3 + $0x18] sm:$0xff] %vm3721_vm3, %v3414_v61  ;;  %v4166_v61 = vor.u32 %v5067_v45, %v4163_v4  ;;  %v5070_v45 = vld [vmem:[%s8669_s2 + $0x1e4] sm:$0xf] }
 0x235   :  { %v2768_v14 = vpop.f32.mrf.mxu3 }
 0x236   :  { %v2769_v23 = vadd.f32 %v2768_v14, %v6070_v32  ;;  %v5064_v32 = vld [vmem:[%s8669_s2 + $0x1ac] sm:$0xf0]  ;;  %v6208_v15 = vpop.f32.mrf.mxu2 }
 0x237   :  { %v4138_v46 = vor.u32 %v5064_v32, %v4137_v1 }
 0x238   :  { %v3093_v31 = vadd.f32 %v6072_v2, %v2769_v23  ;;  %v5054_v2 = vld [vmem:[%s8669_s2 + $0x164] sm:$0xf] }
 0x239   :  { %2498 = vmatmul.bf16.gmra.mxu2 %v4138_v46  ;;  %v4110_v51 = vor.u32 %v5054_v2, %v4107_v20  ;;  %v5073_v20 = vld [vmem:[%s8669_s2 + $0x1f4] sm:$0xf0] }
 0x23a   :  { %v3417_v33 = vadd.f32 %v6098_v39, %v3093_v31  ;;  %v6194_v60 = vpop.f32.mrf.mxu0  ;;  %v6211_v62 = vpop.f32.mrf.mxu1  ;;  %v4145_v39 = vld [vmem:[%s8669_s2 + $0x1a8] sm:$0xf] }
 0x23b   :  { %v4146_v36 = vor.u32 %v5065_v27, %v4145_v39  ;;  %v4185_v27 = vld [vmem:[%s8669_s2 + $0x200] sm:$0xf] }
 0x23c   :  { %3726 = vst.msk [vmem:[%s8670_s3 + $0x20] sm:$0xff] %vm3721_vm3, %v3417_v33 }
 0x23d   :  { %v2770_v54 = vpop.f32.mrf.mxu3  ;;  %4947 = vmatmul.msk.bf16.gmra.mxu0 %vm2235_vm2, %v4134_v8 }
 0x23e   :  { %v2771_v6 = vadd.f32 %v2770_v54, %v6088_v30  ;;  %v6230_v35 = vpop.f32.mrf.mxu2 }
 0x240   :  { %v3095_v13 = vadd.f32 %v6090_v59, %v2771_v6  ;;  %3146 = vmatmul.bf16.gmra.mxu1 %v4146_v36  ;;  %v5071_v6 = vld [vmem:[%s8669_s2 + $0x1ec] sm:$0xf] }
 0x242   :  { %v3419_v41 = vadd.f32 %v3418_v10, %v3095_v13  ;;  %2812 = vmatmul.bf16.gmra.mxu3 %v4110_v51  ;;  %v3428_v44 = vpop.f32.mrf.mxu0  ;;  %v6233_v10 = vpop.f32.mrf.mxu1  ;;  %v4179_v51 = vld [vmem:[%s8669_s2 + $0x1f8] sm:$0xf0] }
 0x244   :  { %3727 = vst.msk [vmem:[%s8670_s3 + $0x28] sm:$0xff] %vm3721_vm3, %v3419_v41  ;;  %v4182_v41 = vor.u32 %v5071_v6, %v4179_v51  ;;  %v5074_v6 = vld [vmem:[%s8669_s2 + $0x204] sm:$0xf] }
 0x245   :  { %v2773_v30 = vpop.f32.mrf.mxu3 }
 0x246   :  { %v2774_v59 = vadd.f32 %v2773_v30, %v6112_v37  ;;  %v5068_v37 = vld [vmem:[%s8669_s2 + $0x1cc] sm:$0xf0]  ;;  %v6256_v17 = vpop.f32.mrf.mxu2 }
 0x247   :  { %v4154_v40 = vor.u32 %v5068_v37, %v4153_v28 }
 0x248   :  { %v3098_v52 = vadd.f32 %v6115_v47, %v2774_v59  ;;  %v5058_v47 = vld [vmem:[%s8669_s2 + $0x184] sm:$0xf] }
 0x249   :  { %2503 = vmatmul.bf16.gmra.mxu2 %v4154_v40  ;;  %v4126_v34 = vor.u32 %v5058_v47, %v4123_v58  ;;  %v5077_v58 = vld [vmem:[%s8669_s2 + $0x214] sm:$0xf0] }
 0x24a   :  { %v3422_v50 = vadd.f32 %v6145_v56, %v3098_v52  ;;  %v6242_v24 = vpop.f32.mrf.mxu0  ;;  %v6259_v55 = vpop.f32.mrf.mxu1  ;;  %v4161_v56 = vld [vmem:[%s8669_s2 + $0x1c8] sm:$0xf] }
 0x24b   :  { %v4162_v11 = vor.u32 %v5069_v26, %v4161_v56  ;;  %v4201_v26 = vld [vmem:[%s8669_s2 + $0x220] sm:$0xf] }
 0x24c   :  { %3728 = vst.msk [vmem:[%s8670_s3 + $0x30] sm:$0xff] %vm3721_vm3, %v3422_v50 }
 0x24d   :  { %v2775_v43 = vpop.f32.mrf.mxu3  ;;  %4948 = vmatmul.msk.bf16.gmra.mxu0 %vm2235_vm2, %v4150_v57 }
 0x24e   :  { %v2776_v25 = vadd.f32 %v2775_v43, %v6134_v53  ;;  %v6278_v9 = vpop.f32.mrf.mxu2 }
 0x250   :  { %v3100_v29 = vadd.f32 %v6137_v42, %v2776_v25  ;;  %3151 = vmatmul.bf16.gmra.mxu1 %v4162_v11  ;;  %v5075_v25 = vld [vmem:[%s8669_s2 + $0x20c] sm:$0xf] }
 0x252   :  { %v3424_v16 = vadd.f32 %v3423_v3, %v3100_v29  ;;  %2817 = vmatmul.bf16.gmra.mxu3 %v4126_v34  ;;  %v3433_v63 = vpop.f32.mrf.mxu0  ;;  %v6281_v3 = vpop.f32.mrf.mxu1  ;;  %v4195_v34 = vld [vmem:[%s8669_s2 + $0x218] sm:$0xf0] }
 0x254   :  { %3729 = vst.msk [vmem:[%s8670_s3 + $0x38] sm:$0xff] %vm3721_vm3, %v3424_v16  ;;  %v4198_v16 = vor.u32 %v5075_v25, %v4195_v34  ;;  %v5078_v25 = vld [vmem:[%s8669_s2 + $0x224] sm:$0xf] }
 0x255   :  { %v2778_v53 = vpop.f32.mrf.mxu3 }
 0x256   :  { %v2779_v42 = vadd.f32 %v2778_v53, %v6159_v5  ;;  %v5072_v5 = vld [vmem:[%s8669_s2 + $0x1ec] sm:$0xf0]  ;;  %v6304_v1 = vpop.f32.mrf.mxu2 }
 0x257   :  { %v4170_v23 = vor.u32 %v5072_v5, %v4169_v7 }
 0x258   :  { %v3103_v38 = vadd.f32 %v6162_v12, %v2779_v42  ;;  %v5062_v12 = vld [vmem:[%s8669_s2 + $0x1a4] sm:$0xf] }
 0x259   :  { %2508 = vmatmul.bf16.gmra.mxu2 %v4170_v23  ;;  %v4142_v8 = vor.u32 %v5062_v12, %v4139_v18  ;;  %v5081_v18 = vld [vmem:[%s8669_s2 + $0x234] sm:$0xf0] }
 0x25a   :  { %v3427_v0 = vadd.f32 %v6194_v60, %v3103_v38  ;;  %v6290_v14 = vpop.f32.mrf.mxu0  ;;  %v6307_v33 = vpop.f32.mrf.mxu1  ;;  %v4177_v60 = vld [vmem:[%s8669_s2 + $0x1e8] sm:$0xf] }
 0x25b   :  { %v4178_v54 = vor.u32 %v5073_v20, %v4177_v60 }
 0x25c   :  { %3730 = vst.msk [vmem:[%s8670_s3 + $0x40] sm:$0xff] %vm3721_vm3, %v3427_v0  ;;  %v4209_v0 = vld [vmem:[%s8669_s2 + $0x228] sm:$0xf] }
 0x25d   :  { %v2780_v19 = vpop.f32.mrf.mxu3  ;;  %4949 = vmatmul.msk.bf16.gmra.mxu0 %vm2235_vm2, %v4166_v61 }
 0x25e   :  { %v2781_v31 = vadd.f32 %v2780_v19, %v6182_v22  ;;  %v6326_v13 = vpop.f32.mrf.mxu2  ;;  %v4210_v19 = vor.u32 %v5081_v18, %v4209_v0 }
 0x260   :  { %v3105_v32 = vadd.f32 %v6185_v21, %v2781_v31  ;;  %3156 = vmatmul.bf16.gmra.mxu1 %v4178_v54  ;;  %v5079_v31 = vld [vmem:[%s8669_s2 + $0x22c] sm:$0xf] }
 0x262   :  { %v3429_v46 = vadd.f32 %v3428_v44, %v3105_v32  ;;  %2822 = vmatmul.bf16.gmra.mxu3 %v4142_v8  ;;  %v3438_v2 = vpop.f32.mrf.mxu0  ;;  %v6329_v44 = vpop.f32.mrf.mxu1  ;;  %v4211_v8 = vld [vmem:[%s8669_s2 + $0x238] sm:$0xf0] }
 0x264   :  { %3731 = vst.msk [vmem:[%s8670_s3 + $0x48] sm:$0xff] %vm3721_vm3, %v3429_v46  ;;  %v4214_v46 = vor.u32 %v5079_v31, %v4211_v8  ;;  %v4219_v31 = vld [vmem:[%s8669_s2 + $0x250] sm:$0xf0] }
 0x265   :  { %v2783_v22 = vpop.f32.mrf.mxu3 }
 0x266   :  { %v2784_v21 = vadd.f32 %v2783_v22, %v6208_v15  ;;  %v5076_v15 = vld [vmem:[%s8669_s2 + $0x20c] sm:$0xf0]  ;;  %v6350_v28 = vpop.f32.mrf.mxu2 }
 0x267   :  { %v4186_v59 = vor.u32 %v5076_v15, %v4185_v27 }
 0x268   :  { %v3108_v39 = vadd.f32 %v6211_v62, %v2784_v21  ;;  %v4155_v62 = vld [vmem:[%s8669_s2 + $0x1d0] sm:$0xf0] }
 0x269   :  { %2513 = vmatmul.bf16.gmra.mxu2 %v4186_v59  ;;  %v4158_v57 = vor.u32 %v5066_v49, %v4155_v62  ;;  %v5085_v62 = vld [vmem:[%s8669_s2 + $0x254] sm:$0xf0] }
 0x26a   :  { %v3432_v36 = vadd.f32 %v6242_v24, %v3108_v39  ;;  %v3441_v30 = vpop.f32.mrf.mxu0  ;;  %v6353_v50 = vpop.f32.mrf.mxu1  ;;  %v4193_v24 = vld [vmem:[%s8669_s2 + $0x208] sm:$0xf] }
 0x26b   :  { %v4194_v43 = vor.u32 %v5077_v58, %v4193_v24 }
 0x26c   :  { %3732 = vst.msk [vmem:[%s8670_s3 + $0x50] sm:$0xff] %vm3721_vm3, %v3432_v36  ;;  %v4225_v36 = vld [vmem:[%s8669_s2 + $0x248] sm:$0xf] }
 0x26d   :  { %v2785_v48 = vpop.f32.mrf.mxu3  ;;  %4950 = vmatmul.msk.bf16.gmra.mxu0 %vm2235_vm2, %v4182_v41 }
 0x26e   :  { %v2786_v52 = vadd.f32 %v2785_v48, %v6230_v35  ;;  %v6372_v29 = vpop.f32.mrf.mxu2  ;;  %v4226_v48 = vor.u32 %v5085_v62, %v4225_v36 }
 0x270   :  { %v3110_v37 = vadd.f32 %v6233_v10, %v2786_v52  ;;  %3161 = vmatmul.bf16.gmra.mxu1 %v4194_v43  ;;  %v5083_v52 = vld [vmem:[%s8669_s2 + $0x24c] sm:$0xf] }
 0x272   :  { %v3434_v40 = vadd.f32 %v3433_v63, %v3110_v37  ;;  %2827 = vmatmul.bf16.gmra.mxu3 %v4158_v57  ;;  %v3443_v47 = vpop.f32.mrf.mxu0  ;;  %v6375_v63 = vpop.f32.mrf.mxu1  ;;  %v4227_v57 = vld [vmem:[%s8669_s2 + $0x258] sm:$0xf0] }
 0x274   :  { %3733 = vst.msk [vmem:[%s8670_s3 + $0x58] sm:$0xff] %vm3721_vm3, %v3434_v40  ;;  %v4230_v40 = vor.u32 %v5083_v52, %v4227_v57  ;;  %v4235_v52 = vld [vmem:[%s8669_s2 + $0x270] sm:$0xf0] }
 0x275   :  { %v2788_v35 = vpop.f32.mrf.mxu3 }
 0x276   :  { %v2789_v10 = vadd.f32 %v2788_v35, %v6256_v17  ;;  %v5080_v17 = vld [vmem:[%s8669_s2 + $0x22c] sm:$0xf0]  ;;  %v6396_v7 = vpop.f32.mrf.mxu2 }
 0x277   :  { %v4202_v42 = vor.u32 %v5080_v17, %v4201_v26 }
 0x278   :  { %v3113_v56 = vadd.f32 %v6259_v55, %v2789_v10  ;;  %v4171_v55 = vld [vmem:[%s8669_s2 + $0x1f0] sm:$0xf0] }
 0x279   :  { %2518 = vmatmul.bf16.gmra.mxu2 %v4202_v42  ;;  %v4174_v61 = vor.u32 %v5070_v45, %v4171_v55  ;;  %v5089_v55 = vld [vmem:[%s8669_s2 + $0x274] sm:$0xf0] }
 0x27a   :  { %v3437_v11 = vadd.f32 %v6290_v14, %v3113_v56  ;;  %v3446_v53 = vpop.f32.mrf.mxu0  ;;  %v6402_v12 = vpop.f32.mrf.mxu1 }
 0x27c   :  { %3734 = vst.msk [vmem:[%s8670_s3 + $0x60] sm:$0xff] %vm3721_vm3, %v3437_v11  ;;  %v4241_v11 = vld [vmem:[%s8669_s2 + $0x268] sm:$0xf] }
 0x27d   :  { %v2790_v4 = vpop.f32.mrf.mxu3  ;;  %4951 = vmatmul.msk.bf16.gmra.mxu0 %vm2235_vm2, %v4198_v16 }
 0x27e   :  { %v2791_v38 = vadd.f32 %v2790_v4, %v6278_v9  ;;  %v6418_v32 = vpop.f32.mrf.mxu2  ;;  %v4242_v4 = vor.u32 %v5089_v55, %v4241_v11 }
 0x280   :  { %v3115_v5 = vadd.f32 %v6281_v3, %v2791_v38  ;;  %3166 = vmatmul.bf16.gmra.mxu1 %v4210_v19  ;;  %v5087_v38 = vld [vmem:[%s8669_s2 + $0x26c] sm:$0xf] }
 0x282   :  { %v3439_v14 = vadd.f32 %v3438_v2, %v3115_v5  ;;  %2832 = vmatmul.bf16.gmra.mxu3 %v4174_v61  ;;  %v3448_v23 = vpop.f32.mrf.mxu0  ;;  %v4217_v2 = vld [vmem:[%s8669_s2 + $0x240] sm:$0xf]  ;;  %v6429_v22 = vpop.f32.mrf.mxu1  ;;  %v4243_v61 = vld [vmem:[%s8669_s2 + $0x278] sm:$0xf0] }
 0x284   :  { %3735 = vst.msk [vmem:[%s8670_s3 + $0x68] sm:$0xff] %vm3721_vm3, %v3439_v14  ;;  %v4246_v14 = vor.u32 %v5087_v38, %v4243_v61  ;;  %v4251_v38 = vld [vmem:[%s8669_s2 + $0x290] sm:$0xf0] }
 0x285   :  { %v2793_v9 = vpop.f32.mrf.mxu3 }
 0x286   :  { %v2794_v3 = vadd.f32 %v2793_v9, %v6304_v1  ;;  %v5084_v1 = vld [vmem:[%s8669_s2 + $0x24c] sm:$0xf0]  ;;  %v6443_v27 = vpop.f32.mrf.mxu2 }
 0x287   :  { %v4218_v21 = vor.u32 %v5084_v1, %v4217_v2 }
 0x288   :  { %v3118_v60 = vadd.f32 %v6307_v33, %v2794_v3  ;;  %v4187_v33 = vld [vmem:[%s8669_s2 + $0x210] sm:$0xf0] }
 0x289   :  { %2523 = vmatmul.bf16.gmra.mxu2 %v4218_v21  ;;  %v4190_v41 = vor.u32 %v5074_v6, %v4187_v33  ;;  %v5093_v33 = vld [vmem:[%s8669_s2 + $0x294] sm:$0xf0] }
 0x28a   :  { %v3442_v20 = vadd.f32 %v3441_v30, %v3118_v60  ;;  %v6427_v54 = vpop.f32.mrf.mxu0  ;;  %v6449_v49 = vpop.f32.mrf.mxu1 }
 0x28c   :  { %3736 = vst.msk [vmem:[%s8670_s3 + $0x70] sm:$0xff] %vm3721_vm3, %v3442_v20  ;;  %v4257_v20 = vld [vmem:[%s8669_s2 + $0x288] sm:$0xf] }
 0x28d   :  { %v2795_v51 = vpop.f32.mrf.mxu3  ;;  %4952 = vmatmul.msk.bf16.gmra.mxu0 %vm2235_vm2, %v4214_v46 }
 0x28e   :  { %v2796_v39 = vadd.f32 %v2795_v51, %v6326_v13  ;;  %v6465_v37 = vpop.f32.mrf.mxu2  ;;  %v4258_v51 = vor.u32 %v5093_v33, %v4257_v20 }
 0x290   :  { %v3120_v15 = vadd.f32 %v6329_v44, %v2796_v39  ;;  %3171 = vmatmul.bf16.gmra.mxu1 %v4226_v48  ;;  %v5091_v39 = vld [vmem:[%s8669_s2 + $0x28c] sm:$0xf] }
 0x292   :  { %v3444_v30 = vadd.f32 %v3443_v47, %v3120_v15  ;;  %2837 = vmatmul.bf16.gmra.mxu3 %v4190_v41  ;;  %v3453_v59 = vpop.f32.mrf.mxu0  ;;  %v4233_v47 = vld [vmem:[%s8669_s2 + $0x260] sm:$0xf]  ;;  %v6476_v35 = vpop.f32.mrf.mxu1  ;;  %v4259_v41 = vld [vmem:[%s8669_s2 + $0x298] sm:$0xf0] }
 0x294   :  { %3737 = vst.msk [vmem:[%s8670_s3 + $0x78] sm:$0xff] %vm3721_vm3, %v3444_v30  ;;  %v4262_v30 = vor.u32 %v5091_v39, %v4259_v41  ;;  %v4267_v39 = vld [vmem:[%s8669_s2 + $0x2b0] sm:$0xf0] }
 0x295   :  { %v2798_v13 = vpop.f32.mrf.mxu3 }
 0x296   :  { %v2799_v44 = vadd.f32 %v2798_v13, %v6350_v28  ;;  %v5088_v28 = vld [vmem:[%s8669_s2 + $0x26c] sm:$0xf0]  ;;  %v6490_v26 = vpop.f32.mrf.mxu2 }
 0x297   :  { %v4234_v10 = vor.u32 %v5088_v28, %v4233_v47 }
 0x298   :  { %v3123_v24 = vadd.f32 %v6353_v50, %v2799_v44  ;;  %v4203_v50 = vld [vmem:[%s8669_s2 + $0x230] sm:$0xf0] }
 0x299   :  { %2528 = vmatmul.bf16.gmra.mxu2 %v4234_v10  ;;  %v4206_v16 = vor.u32 %v5078_v25, %v4203_v50  ;;  %v5097_v50 = vld [vmem:[%s8669_s2 + $0x2b4] sm:$0xf0] }
 0x29a   :  { %v3447_v58 = vadd.f32 %v3446_v53, %v3123_v24  ;;  %v6474_v43 = vpop.f32.mrf.mxu0  ;;  %v6496_v45 = vpop.f32.mrf.mxu1 }
 0x29c   :  { %3738 = vst.msk [vmem:[%s8670_s3 + $0x80] sm:$0xff] %vm3721_vm3, %v3447_v58  ;;  %v4273_v58 = vld [vmem:[%s8669_s2 + $0x2a8] sm:$0xf] }
 0x29d   :  { %v2800_v34 = vpop.f32.mrf.mxu3  ;;  %4953 = vmatmul.msk.bf16.gmra.mxu0 %vm2235_vm2, %v4230_v40 }
 0x29e   :  { %v2801_v56 = vadd.f32 %v2800_v34, %v6372_v29  ;;  %v6512_v5 = vpop.f32.mrf.mxu2  ;;  %v4274_v34 = vor.u32 %v5097_v50, %v4273_v58 }
 0x2a0   :  { %v3125_v17 = vadd.f32 %v6375_v63, %v2801_v56  ;;  %3176 = vmatmul.bf16.gmra.mxu1 %v4242_v4  ;;  %v5095_v56 = vld [vmem:[%s8669_s2 + $0x2ac] sm:$0xf] }
 0x2a2   :  { %v3449_v53 = vadd.f32 %v3448_v23, %v3125_v17  ;;  %2842 = vmatmul.bf16.gmra.mxu3 %v4206_v16  ;;  %v3458_v42 = vpop.f32.mrf.mxu0  ;;  %v4249_v23 = vld [vmem:[%s8669_s2 + $0x280] sm:$0xf]  ;;  %v6524_v9 = vpop.f32.mrf.mxu1  ;;  %v4275_v16 = vld [vmem:[%s8669_s2 + $0x2b8] sm:$0xf0] }
 0x2a4   :  { %3739 = vst.msk [vmem:[%s8670_s3 + $0x88] sm:$0xff] %vm3721_vm3, %v3449_v53  ;;  %v4278_v53 = vor.u32 %v5095_v56, %v4275_v16  ;;  %v4283_v56 = vld [vmem:[%s8669_s2 + $0x2d0] sm:$0xf0] }
 0x2a5   :  { %v2803_v29 = vpop.f32.mrf.mxu3 }
 0x2a6   :  { %v2804_v63 = vadd.f32 %v2803_v29, %v6396_v7  ;;  %v5092_v7 = vld [vmem:[%s8669_s2 + $0x28c] sm:$0xf0]  ;;  %v6538_v2 = vpop.f32.mrf.mxu2 }
 0x2a7   :  { %v4250_v3 = vor.u32 %v5092_v7, %v4249_v23 }
 0x2a8   :  { %v3128_v0 = vadd.f32 %v6402_v12, %v2804_v63  ;;  %v5082_v12 = vld [vmem:[%s8669_s2 + $0x244] sm:$0xf] }
 0x2a9   :  { %2533 = vmatmul.bf16.gmra.mxu2 %v4250_v3  ;;  %v4222_v46 = vor.u32 %v5082_v12, %v4219_v31  ;;  %v5101_v31 = vld [vmem:[%s8669_s2 + $0x2d4] sm:$0xf0] }
 0x2aa   :  { %v3452_v18 = vadd.f32 %v6427_v54, %v3128_v0  ;;  %v6522_v19 = vpop.f32.mrf.mxu0 }
 0x2ac   :  { %3740 = vst.msk [vmem:[%s8670_s3 + $0x90] sm:$0xff] %vm3721_vm3, %v3452_v18  ;;  %v4289_v18 = vld [vmem:[%s8669_s2 + $0x2c8] sm:$0xf] }
 0x2ad   :  { %v2805_v8 = vpop.f32.mrf.mxu3  ;;  %4954 = vmatmul.msk.bf16.gmra.mxu0 %vm2235_vm2, %v4246_v14  ;;  %v6544_v6 = vpop.f32.mrf.mxu1 }
 0x2ae   :  { %v2806_v60 = vadd.f32 %v2805_v8, %v6418_v32  ;;  %v6560_v15 = vpop.f32.mrf.mxu2  ;;  %v4290_v8 = vor.u32 %v5101_v31, %v4289_v18 }
 0x2b0   :  { %v3130_v1 = vadd.f32 %v6429_v22, %v2806_v60  ;;  %3181 = vmatmul.bf16.gmra.mxu1 %v4258_v51  ;;  %v5099_v60 = vld [vmem:[%s8669_s2 + $0x2cc] sm:$0xf] }
 0x2b2   :  { %v3454_v54 = vadd.f32 %v3453_v59, %v3130_v1  ;;  %2847 = vmatmul.bf16.gmra.mxu3 %v4222_v46  ;;  %v3463_v21 = vpop.f32.mrf.mxu0  ;;  %v4265_v59 = vld [vmem:[%s8669_s2 + $0x2a0] sm:$0xf]  ;;  %v4291_v46 = vld [vmem:[%s8669_s2 + $0x2d8] sm:$0xf0] }
 0x2b4   :  { %3741 = vst.msk [vmem:[%s8670_s3 + $0x98] sm:$0xff] %vm3721_vm3, %v3454_v54  ;;  %v4294_v54 = vor.u32 %v5099_v60, %v4291_v46  ;;  %v4299_v60 = vld [vmem:[%s8669_s2 + $0x2f0] sm:$0xf0] }
 0x2b5   :  { %v2808_v32 = vpop.f32.mrf.mxu3  ;;  %v6572_v13 = vpop.f32.mrf.mxu1 }
 0x2b6   :  { %v2809_v22 = vadd.f32 %v2808_v32, %v6443_v27  ;;  %v5096_v27 = vld [vmem:[%s8669_s2 + $0x2ac] sm:$0xf0] }
 0x2b7   :  { %v4266_v44 = vor.u32 %v5096_v27, %v4265_v59 }
 0x2b8   :  { %v3133_v36 = vadd.f32 %v6449_v49, %v2809_v22  ;;  %v5086_v49 = vld [vmem:[%s8669_s2 + $0x264] sm:$0xf] }
 0x2b9   :  { %2538 = vmatmul.bf16.gmra.mxu2 %v4266_v44  ;;  %v4238_v40 = vor.u32 %v5086_v49, %v4235_v52  ;;  %v5105_v52 = vld [vmem:[%s8669_s2 + $0x2f4] sm:$0xf0] }
 0x2ba   :  { %v3457_v62 = vadd.f32 %v6474_v43, %v3133_v36  ;;  %v6570_v48 = vpop.f32.mrf.mxu0 }
 0x2bc   :  { %3742 = vst.msk [vmem:[%s8670_s3 + $0xa0] sm:$0xff] %vm3721_vm3, %v3457_v62  ;;  %v6586_v47 = vpop.f32.mrf.mxu2  ;;  %v4305_v62 = vld [vmem:[%s8669_s2 + $0x2e8] sm:$0xf] }
 0x2bd   :  { %v2810_v57 = vpop.f32.mrf.mxu3  ;;  %4955 = vmatmul.msk.bf16.gmra.mxu0 %vm2235_vm2, %v4262_v30  ;;  %v6592_v25 = vpop.f32.mrf.mxu1 }
 0x2be   :  { %v2811_v24 = vadd.f32 %v2810_v57, %v6465_v37  ;;  %v4306_v57 = vor.u32 %v5105_v52, %v4305_v62 }
 0x2c0   :  { %v3135_v28 = vadd.f32 %v6476_v35, %v2811_v24  ;;  %3186 = vmatmul.bf16.gmra.mxu1 %v4274_v34  ;;  %v5103_v24 = vld [vmem:[%s8669_s2 + $0x2ec] sm:$0xf] }
 0x2c2   :  { %v3459_v43 = vadd.f32 %v3458_v42, %v3135_v28  ;;  %2852 = vmatmul.bf16.gmra.mxu3 %v4238_v40  ;;  %v3468_v10 = vpop.f32.mrf.mxu0  ;;  %v4281_v42 = vld [vmem:[%s8669_s2 + $0x2c0] sm:$0xf]  ;;  %v4307_v40 = vld [vmem:[%s8669_s2 + $0x2f8] sm:$0xf0] }
 0x2c4   :  { %3743 = vst.msk [vmem:[%s8670_s3 + $0xa8] sm:$0xff] %vm3721_vm3, %v3459_v43  ;;  %v6608_v17 = vpop.f32.mrf.mxu2  ;;  %v4310_v43 = vor.u32 %v5103_v24, %v4307_v40  ;;  %v4315_v24 = vld [vmem:[%s8669_s2 + $0x310] sm:$0xf0] }
 0x2c5   :  { %v2813_v37 = vpop.f32.mrf.mxu3  ;;  %v6620_v29 = vpop.f32.mrf.mxu1 }
 0x2c6   :  { %v2814_v35 = vadd.f32 %v2813_v37, %v6490_v26  ;;  %v5100_v26 = vld [vmem:[%s8669_s2 + $0x2cc] sm:$0xf0] }
 0x2c7   :  { %v4282_v63 = vor.u32 %v5100_v26, %v4281_v42 }
 0x2c8   :  { %v3138_v11 = vadd.f32 %v6496_v45, %v2814_v35  ;;  %v5090_v45 = vld [vmem:[%s8669_s2 + $0x284] sm:$0xf] }
 0x2c9   :  { %2543 = vmatmul.bf16.gmra.mxu2 %v4282_v63  ;;  %v4254_v14 = vor.u32 %v5090_v45, %v4251_v38  ;;  %v5109_v38 = vld [vmem:[%s8669_s2 + $0x314] sm:$0xf0] }
 0x2ca   :  { %v3462_v55 = vadd.f32 %v6522_v19, %v3138_v11  ;;  %v6618_v4 = vpop.f32.mrf.mxu0 }
 0x2cc   :  { %3744 = vst.msk [vmem:[%s8670_s3 + $0xb0] sm:$0xff] %vm3721_vm3, %v3462_v55  ;;  %v6634_v23 = vpop.f32.mrf.mxu2  ;;  %v4321_v55 = vld [vmem:[%s8669_s2 + $0x308] sm:$0xf] }
 0x2cd   :  { %v2815_v61 = vpop.f32.mrf.mxu3  ;;  %4956 = vmatmul.msk.bf16.gmra.mxu0 %vm2235_vm2, %v4278_v53  ;;  %v6640_v12 = vpop.f32.mrf.mxu1 }
 0x2ce   :  { %v2816_v0 = vadd.f32 %v2815_v61, %v6512_v5  ;;  %v4322_v61 = vor.u32 %v5109_v38, %v4321_v55 }
 0x2d0   :  { %v3140_v7 = vadd.f32 %v6524_v9, %v2816_v0  ;;  %3191 = vmatmul.bf16.gmra.mxu1 %v4290_v8  ;;  %v5107_v0 = vld [vmem:[%s8669_s2 + $0x30c] sm:$0xf] }
 0x2d2   :  { %v3464_v19 = vadd.f32 %v3463_v21, %v3140_v7  ;;  %2857 = vmatmul.bf16.gmra.mxu3 %v4254_v14  ;;  %v3473_v3 = vpop.f32.mrf.mxu0  ;;  %v4297_v21 = vld [vmem:[%s8669_s2 + $0x2e0] sm:$0xf]  ;;  %v4323_v14 = vld [vmem:[%s8669_s2 + $0x318] sm:$0xf0] }
 0x2d4   :  { %3745 = vst.msk [vmem:[%s8670_s3 + $0xb8] sm:$0xff] %vm3721_vm3, %v3464_v19  ;;  %v6656_v1 = vpop.f32.mrf.mxu2  ;;  %v4326_v19 = vor.u32 %v5107_v0, %v4323_v14  ;;  %v4331_v0 = vld [vmem:[%s8669_s2 + $0x330] sm:$0xf0] }
 0x2d5   :  { %v2818_v5 = vpop.f32.mrf.mxu3  ;;  %v6668_v32 = vpop.f32.mrf.mxu1 }
 0x2d6   :  { %v2819_v9 = vadd.f32 %v2818_v5, %v6538_v2  ;;  %v5104_v2 = vld [vmem:[%s8669_s2 + $0x2ec] sm:$0xf0] }
 0x2d7   :  { %v4298_v22 = vor.u32 %v5104_v2, %v4297_v21 }
 0x2d8   :  { %v3143_v20 = vadd.f32 %v6544_v6, %v2819_v9  ;;  %v5094_v6 = vld [vmem:[%s8669_s2 + $0x2a4] sm:$0xf] }
 0x2d9   :  { %2548 = vmatmul.bf16.gmra.mxu2 %v4298_v22  ;;  %v4270_v30 = vor.u32 %v5094_v6, %v4267_v39  ;;  %v5113_v39 = vld [vmem:[%s8669_s2 + $0x334] sm:$0xf0] }
 0x2da   :  { %v3467_v33 = vadd.f32 %v6570_v48, %v3143_v20  ;;  %v6666_v51 = vpop.f32.mrf.mxu0 }
 0x2dc   :  { %3746 = vst.msk [vmem:[%s8670_s3 + $0xc0] sm:$0xff] %vm3721_vm3, %v3467_v33  ;;  %v6682_v59 = vpop.f32.mrf.mxu2  ;;  %v4337_v33 = vld [vmem:[%s8669_s2 + $0x328] sm:$0xf] }
 0x2dd   :  { %v2820_v41 = vpop.f32.mrf.mxu3  ;;  %4957 = vmatmul.msk.bf16.gmra.mxu0 %vm2235_vm2, %v4294_v54  ;;  %v6688_v49 = vpop.f32.mrf.mxu1 }
 0x2de   :  { %v2821_v36 = vadd.f32 %v2820_v41, %v6560_v15  ;;  %v4338_v41 = vor.u32 %v5113_v39, %v4337_v33 }
 0x2e0   :  { %v3145_v27 = vadd.f32 %v6572_v13, %v2821_v36  ;;  %3196 = vmatmul.bf16.gmra.mxu1 %v4306_v57  ;;  %v5111_v36 = vld [vmem:[%s8669_s2 + $0x32c] sm:$0xf] }
 0x2e2   :  { %v3469_v48 = vadd.f32 %v3468_v10, %v3145_v27  ;;  %2862 = vmatmul.bf16.gmra.mxu3 %v4270_v30  ;;  %v3478_v44 = vpop.f32.mrf.mxu0  ;;  %v4313_v10 = vld [vmem:[%s8669_s2 + $0x300] sm:$0xf]  ;;  %v4339_v30 = vld [vmem:[%s8669_s2 + $0x338] sm:$0xf0] }
 0x2e4   :  { %3747 = vst.msk [vmem:[%s8670_s3 + $0xc8] sm:$0xff] %vm3721_vm3, %v3469_v48  ;;  %v6704_v28 = vpop.f32.mrf.mxu2  ;;  %v4342_v48 = vor.u32 %v5111_v36, %v4339_v30  ;;  %v4347_v36 = vld [vmem:[%s8669_s2 + $0x350] sm:$0xf0] }
 0x2e5   :  { %v2823_v15 = vpop.f32.mrf.mxu3  ;;  %v6716_v37 = vpop.f32.mrf.mxu1 }
 0x2e6   :  { %v2824_v13 = vadd.f32 %v2823_v15, %v6586_v47  ;;  %v5108_v47 = vld [vmem:[%s8669_s2 + $0x30c] sm:$0xf0] }
 0x2e7   :  { %v4314_v35 = vor.u32 %v5108_v47, %v4313_v10 }
 0x2e8   :  { %v3148_v58 = vadd.f32 %v6592_v25, %v2824_v13  ;;  %v5098_v25 = vld [vmem:[%s8669_s2 + $0x2c4] sm:$0xf] }
 0x2e9   :  { %2553 = vmatmul.bf16.gmra.mxu2 %v4314_v35  ;;  %v4286_v53 = vor.u32 %v5098_v25, %v4283_v56  ;;  %v5117_v56 = vld [vmem:[%s8669_s2 + $0x354] sm:$0xf0] }
 0x2ea   :  { %v3472_v50 = vadd.f32 %v6618_v4, %v3148_v58  ;;  %v6714_v34 = vpop.f32.mrf.mxu0 }
 0x2ec   :  { %3748 = vst.msk [vmem:[%s8670_s3 + $0xd0] sm:$0xff] %vm3721_vm3, %v3472_v50  ;;  %v6730_v42 = vpop.f32.mrf.mxu2  ;;  %v4353_v50 = vld [vmem:[%s8669_s2 + $0x348] sm:$0xf] }
 0x2ed   :  { %v2825_v16 = vpop.f32.mrf.mxu3  ;;  %4958 = vmatmul.msk.bf16.gmra.mxu0 %vm2235_vm2, %v4310_v43  ;;  %v6736_v45 = vpop.f32.mrf.mxu1 }
 0x2ee   :  { %v2826_v11 = vadd.f32 %v2825_v16, %v6608_v17  ;;  %v4354_v16 = vor.u32 %v5117_v56, %v4353_v50 }
 0x2f0   :  { %v3150_v26 = vadd.f32 %v6620_v29, %v2826_v11  ;;  %3201 = vmatmul.bf16.gmra.mxu1 %v4322_v61  ;;  %v5115_v11 = vld [vmem:[%s8669_s2 + $0x34c] sm:$0xf] }
 0x2f2   :  { %v3474_v4 = vadd.f32 %v3473_v3, %v3150_v26  ;;  %2867 = vmatmul.bf16.gmra.mxu3 %v4286_v53  ;;  %v3483_v63 = vpop.f32.mrf.mxu0  ;;  %v4329_v3 = vld [vmem:[%s8669_s2 + $0x320] sm:$0xf]  ;;  %v4355_v53 = vld [vmem:[%s8669_s2 + $0x358] sm:$0xf0] }
 0x2f4   :  { %3749 = vst.msk [vmem:[%s8670_s3 + $0xd8] sm:$0xff] %vm3721_vm3, %v3474_v4  ;;  %v6752_v7 = vpop.f32.mrf.mxu2  ;;  %v4358_v4 = vor.u32 %v5115_v11, %v4355_v53  ;;  %v4363_v11 = vld [vmem:[%s8669_s2 + $0x370] sm:$0xf0] }
 0x2f5   :  { %v2828_v17 = vpop.f32.mrf.mxu3  ;;  %v6764_v5 = vpop.f32.mrf.mxu1 }
 0x2f6   :  { %v2829_v29 = vadd.f32 %v2828_v17, %v6634_v23  ;;  %v5112_v23 = vld [vmem:[%s8669_s2 + $0x32c] sm:$0xf0] }
 0x2f7   :  { %v4330_v9 = vor.u32 %v5112_v23, %v4329_v3 }
 0x2f8   :  { %v3153_v18 = vadd.f32 %v6640_v12, %v2829_v29  ;;  %v5102_v12 = vld [vmem:[%s8669_s2 + $0x2e4] sm:$0xf] }
 0x2f9   :  { %2558 = vmatmul.bf16.gmra.mxu2 %v4330_v9  ;;  %v4302_v54 = vor.u32 %v5102_v12, %v4299_v60  ;;  %v5121_v60 = vld [vmem:[%s8669_s2 + $0x374] sm:$0xf0] }
 0x2fa   :  { %v3477_v31 = vadd.f32 %v6666_v51, %v3153_v18  ;;  %v6762_v8 = vpop.f32.mrf.mxu0 }
 0x2fc   :  { %3750 = vst.msk [vmem:[%s8670_s3 + $0xe0] sm:$0xff] %vm3721_vm3, %v3477_v31  ;;  %v6778_v21 = vpop.f32.mrf.mxu2  ;;  %v4369_v31 = vld [vmem:[%s8669_s2 + $0x368] sm:$0xf] }
 0x2fd   :  { %v2830_v46 = vpop.f32.mrf.mxu3  ;;  %4959 = vmatmul.msk.bf16.gmra.mxu0 %vm2235_vm2, %v4326_v19  ;;  %v6784_v6 = vpop.f32.mrf.mxu1 }
 0x2fe   :  { %v2831_v20 = vadd.f32 %v2830_v46, %v6656_v1  ;;  %v4370_v46 = vor.u32 %v5121_v60, %v4369_v31 }
 0x300   :  { %v3155_v2 = vadd.f32 %v6668_v32, %v2831_v20  ;;  %3206 = vmatmul.bf16.gmra.mxu1 %v4338_v41  ;;  %v5119_v20 = vld [vmem:[%s8669_s2 + $0x36c] sm:$0xf] }
 0x302   :  { %v3479_v51 = vadd.f32 %v3478_v44, %v3155_v2  ;;  %2872 = vmatmul.bf16.gmra.mxu3 %v4302_v54  ;;  %v3488_v22 = vpop.f32.mrf.mxu0  ;;  %v4345_v44 = vld [vmem:[%s8669_s2 + $0x340] sm:$0xf]  ;;  %v4371_v54 = vld [vmem:[%s8669_s2 + $0x378] sm:$0xf0] }
 0x304   :  { %3751 = vst.msk [vmem:[%s8670_s3 + $0xe8] sm:$0xff] %vm3721_vm3, %v3479_v51  ;;  %v6800_v27 = vpop.f32.mrf.mxu2  ;;  %v4374_v51 = vor.u32 %v5119_v20, %v4371_v54  ;;  %v4379_v20 = vld [vmem:[%s8669_s2 + $0x390] sm:$0xf0] }
 0x305   :  { %v2833_v1 = vpop.f32.mrf.mxu3  ;;  %v6812_v15 = vpop.f32.mrf.mxu1 }
 0x306   :  { %v2834_v32 = vadd.f32 %v2833_v1, %v6682_v59  ;;  %v5116_v59 = vld [vmem:[%s8669_s2 + $0x34c] sm:$0xf0] }
 0x307   :  { %v4346_v13 = vor.u32 %v5116_v59, %v4345_v44 }
 0x308   :  { %v3158_v62 = vadd.f32 %v6688_v49, %v2834_v32  ;;  %v5106_v49 = vld [vmem:[%s8669_s2 + $0x304] sm:$0xf] }
 0x309   :  { %2563 = vmatmul.bf16.gmra.mxu2 %v4346_v13  ;;  %v4318_v43 = vor.u32 %v5106_v49, %v4315_v24  ;;  %v5125_v24 = vld [vmem:[%s8669_s2 + $0x394] sm:$0xf0] }
 0x30a   :  { %v3482_v52 = vadd.f32 %v6714_v34, %v3158_v62  ;;  %v6810_v57 = vpop.f32.mrf.mxu0 }
 0x30c   :  { %3752 = vst.msk [vmem:[%s8670_s3 + $0xf0] sm:$0xff] %vm3721_vm3, %v3482_v52  ;;  %v6826_v10 = vpop.f32.mrf.mxu2  ;;  %v4385_v52 = vld [vmem:[%s8669_s2 + $0x388] sm:$0xf] }
 0x30d   :  { %v2835_v40 = vpop.f32.mrf.mxu3  ;;  %4960 = vmatmul.msk.bf16.gmra.mxu0 %vm2235_vm2, %v4342_v48  ;;  %v6832_v25 = vpop.f32.mrf.mxu1 }
 0x30e   :  { %v2836_v58 = vadd.f32 %v2835_v40, %v6704_v28  ;;  %v4386_v40 = vor.u32 %v5125_v24, %v4385_v52 }
 0x310   :  { %v3160_v47 = vadd.f32 %v6716_v37, %v2836_v58  ;;  %3211 = vmatmul.bf16.gmra.mxu1 %v4354_v16  ;;  %v5123_v58 = vld [vmem:[%s8669_s2 + $0x38c] sm:$0xf] }
 0x312   :  { %v3484_v34 = vadd.f32 %v3483_v63, %v3160_v47  ;;  %2877 = vmatmul.bf16.gmra.mxu3 %v4318_v43  ;;  %v3493_v35 = vpop.f32.mrf.mxu0  ;;  %v4361_v63 = vld [vmem:[%s8669_s2 + $0x360] sm:$0xf]  ;;  %v4387_v43 = vld [vmem:[%s8669_s2 + $0x398] sm:$0xf0] }
 0x314   :  { %3753 = vst.msk [vmem:[%s8670_s3 + $0xf8] sm:$0xff] %vm3721_vm3, %v3484_v34  ;;  %v6848_v26 = vpop.f32.mrf.mxu2  ;;  %v4390_v34 = vor.u32 %v5123_v58, %v4387_v43  ;;  %v4395_v58 = vld [vmem:[%s8669_s2 + $0x3b0] sm:$0xf0] }
 0x315   :  { %v2838_v28 = vpop.f32.mrf.mxu3  ;;  %v6860_v17 = vpop.f32.mrf.mxu1 }
 0x316   :  { %v2839_v37 = vadd.f32 %v2838_v28, %v6730_v42  ;;  %v5120_v42 = vld [vmem:[%s8669_s2 + $0x36c] sm:$0xf0] }
 0x317   :  { %v4362_v29 = vor.u32 %v5120_v42, %v4361_v63 }
 0x318   :  { %v3163_v55 = vadd.f32 %v6736_v45, %v2839_v37  ;;  %v5110_v45 = vld [vmem:[%s8669_s2 + $0x324] sm:$0xf] }
 0x319   :  { %2568 = vmatmul.bf16.gmra.mxu2 %v4362_v29  ;;  %v4334_v19 = vor.u32 %v5110_v45, %v4331_v0  ;;  %v5129_v0 = vld [vmem:[%s8669_s2 + $0x3b4] sm:$0xf0] }
 0x31a   :  { %v3487_v38 = vadd.f32 %v6762_v8, %v3163_v55  ;;  %v6858_v61 = vpop.f32.mrf.mxu0 }
 0x31c   :  { %3754 = vst.msk [vmem:[%s8670_s3 + $0x100] sm:$0xff] %vm3721_vm3, %v3487_v38  ;;  %v6874_v3 = vpop.f32.mrf.mxu2  ;;  %v4401_v38 = vld [vmem:[%s8669_s2 + $0x3a8] sm:$0xf] }
 0x31d   :  { %v2840_v14 = vpop.f32.mrf.mxu3  ;;  %4961 = vmatmul.msk.bf16.gmra.mxu0 %vm2235_vm2, %v4358_v4  ;;  %v6880_v12 = vpop.f32.mrf.mxu1 }
 0x31e   :  { %v2841_v18 = vadd.f32 %v2840_v14, %v6752_v7  ;;  %v4402_v14 = vor.u32 %v5129_v0, %v4401_v38 }
 0x320   :  { %v3165_v23 = vadd.f32 %v6764_v5, %v2841_v18  ;;  %3216 = vmatmul.bf16.gmra.mxu1 %v4370_v46  ;;  %v5127_v18 = vld [vmem:[%s8669_s2 + $0x3ac] sm:$0xf] }
 0x322   :  { %v3489_v8 = vadd.f32 %v3488_v22, %v3165_v23  ;;  %2882 = vmatmul.bf16.gmra.mxu3 %v4334_v19  ;;  %v3498_v9 = vpop.f32.mrf.mxu0  ;;  %v4377_v22 = vld [vmem:[%s8669_s2 + $0x380] sm:$0xf]  ;;  %v4403_v19 = vld [vmem:[%s8669_s2 + $0x3b8] sm:$0xf0] }
 0x324   :  { %3755 = vst.msk [vmem:[%s8670_s3 + $0x108] sm:$0xff] %vm3721_vm3, %v3489_v8  ;;  %v6896_v2 = vpop.f32.mrf.mxu2  ;;  %v4406_v8 = vor.u32 %v5127_v18, %v4403_v19  ;;  %v4411_v18 = vld [vmem:[%s8669_s2 + $0x3d0] sm:$0xf0] }
 0x325   :  { %v2843_v7 = vpop.f32.mrf.mxu3  ;;  %v6908_v1 = vpop.f32.mrf.mxu1 }
 0x326   :  { %v2844_v5 = vadd.f32 %v2843_v7, %v6778_v21  ;;  %v5124_v21 = vld [vmem:[%s8669_s2 + $0x38c] sm:$0xf0] }
 0x327   :  { %v4378_v32 = vor.u32 %v5124_v21, %v4377_v22 }
 0x328   :  { %v3168_v33 = vadd.f32 %v6784_v6, %v2844_v5  ;;  %v5114_v6 = vld [vmem:[%s8669_s2 + $0x344] sm:$0xf] }
 0x329   :  { %2573 = vmatmul.bf16.gmra.mxu2 %v4378_v32  ;;  %v4350_v48 = vor.u32 %v5114_v6, %v4347_v36  ;;  %v5133_v36 = vld [vmem:[%s8669_s2 + $0x3d4] sm:$0xf0] }
 0x32a   :  { %v3492_v39 = vadd.f32 %v6810_v57, %v3168_v33  ;;  %v6906_v41 = vpop.f32.mrf.mxu0 }
 0x32c   :  { %3756 = vst.msk [vmem:[%s8670_s3 + $0x110] sm:$0xff] %vm3721_vm3, %v3492_v39  ;;  %v6922_v44 = vpop.f32.mrf.mxu2  ;;  %v4417_v39 = vld [vmem:[%s8669_s2 + $0x3c8] sm:$0xf] }
 0x32d   :  { %v2845_v30 = vpop.f32.mrf.mxu3  ;;  %4962 = vmatmul.msk.bf16.gmra.mxu0 %vm2235_vm2, %v4374_v51  ;;  %v6928_v49 = vpop.f32.mrf.mxu1 }
 0x32e   :  { %v2846_v62 = vadd.f32 %v2845_v30, %v6800_v27  ;;  %v4418_v30 = vor.u32 %v5133_v36, %v4417_v39 }
 0x330   :  { %v3170_v59 = vadd.f32 %v6812_v15, %v2846_v62  ;;  %3221 = vmatmul.bf16.gmra.mxu1 %v4386_v40  ;;  %v5131_v62 = vld [vmem:[%s8669_s2 + $0x3cc] sm:$0xf] }
 0x332   :  { %v3494_v57 = vadd.f32 %v3493_v35, %v3170_v59  ;;  %2887 = vmatmul.bf16.gmra.mxu3 %v4350_v48  ;;  %v3503_v13 = vpop.f32.mrf.mxu0  ;;  %v4393_v35 = vld [vmem:[%s8669_s2 + $0x3a0] sm:$0xf]  ;;  %v4419_v48 = vld [vmem:[%s8669_s2 + $0x3d8] sm:$0xf0] }
 0x334   :  { %3757 = vst.msk [vmem:[%s8670_s3 + $0x118] sm:$0xff] %vm3721_vm3, %v3494_v57  ;;  %v6944_v47 = vpop.f32.mrf.mxu2  ;;  %v4422_v57 = vor.u32 %v5131_v62, %v4419_v48  ;;  %v4427_v62 = vld [vmem:[%s8669_s2 + $0x3f0] sm:$0xf0] }
 0x335   :  { %v2848_v27 = vpop.f32.mrf.mxu3  ;;  %v6956_v28 = vpop.f32.mrf.mxu1 }
 0x336   :  { %v2849_v15 = vadd.f32 %v2848_v27, %v6826_v10  ;;  %v5128_v10 = vld [vmem:[%s8669_s2 + $0x3ac] sm:$0xf0] }
 0x337   :  { %v4394_v37 = vor.u32 %v5128_v10, %v4393_v35 }
 0x338   :  { %v3173_v50 = vadd.f32 %v6832_v25, %v2849_v15  ;;  %v5118_v25 = vld [vmem:[%s8669_s2 + $0x364] sm:$0xf] }
 0x339   :  { %2578 = vmatmul.bf16.gmra.mxu2 %v4394_v37  ;;  %v4366_v4 = vor.u32 %v5118_v25, %v4363_v11  ;;  %v5137_v11 = vld [vmem:[%s8669_s2 + $0x3f4] sm:$0xf0] }
 0x33a   :  { %v3497_v56 = vadd.f32 %v6858_v61, %v3173_v50  ;;  %v6954_v16 = vpop.f32.mrf.mxu0 }
 0x33c   :  { %3758 = vst.msk [vmem:[%s8670_s3 + $0x120] sm:$0xff] %vm3721_vm3, %v3497_v56  ;;  %v6970_v63 = vpop.f32.mrf.mxu2  ;;  %v4433_v56 = vld [vmem:[%s8669_s2 + $0x3e8] sm:$0xf] }
 0x33d   :  { %v2850_v53 = vpop.f32.mrf.mxu3  ;;  %4963 = vmatmul.msk.bf16.gmra.mxu0 %vm2235_vm2, %v4390_v34  ;;  %v6976_v45 = vpop.f32.mrf.mxu1 }
 0x33e   :  { %v2851_v55 = vadd.f32 %v2850_v53, %v6848_v26  ;;  %v4434_v53 = vor.u32 %v5137_v11, %v4433_v56 }
 0x340   :  { %v3175_v42 = vadd.f32 %v6860_v17, %v2851_v55  ;;  %3226 = vmatmul.bf16.gmra.mxu1 %v4402_v14  ;;  %v5135_v55 = vld [vmem:[%s8669_s2 + $0x3ec] sm:$0xf] }
 0x342   :  { %v3499_v61 = vadd.f32 %v3498_v9, %v3175_v42  ;;  %2892 = vmatmul.bf16.gmra.mxu3 %v4366_v4  ;;  %v3508_v29 = vpop.f32.mrf.mxu0  ;;  %v4409_v9 = vld [vmem:[%s8669_s2 + $0x3c0] sm:$0xf]  ;;  %v4435_v4 = vld [vmem:[%s8669_s2 + $0x3f8] sm:$0xf0] }
 0x344   :  { %3759 = vst.msk [vmem:[%s8670_s3 + $0x128] sm:$0xff] %vm3721_vm3, %v3499_v61  ;;  %v6992_v23 = vpop.f32.mrf.mxu2  ;;  %v4438_v61 = vor.u32 %v5135_v55, %v4435_v4  ;;  %v4443_v55 = vld [vmem:[%s8669_s2 + $0x410] sm:$0xf0] }
 0x345   :  { %v2853_v26 = vpop.f32.mrf.mxu3  ;;  %v7004_v7 = vpop.f32.mrf.mxu1 }
 0x346   :  { %v2854_v17 = vadd.f32 %v2853_v26, %v6874_v3  ;;  %v5132_v3 = vld [vmem:[%s8669_s2 + $0x3cc] sm:$0xf0] }
 0x347   :  { %v4410_v5 = vor.u32 %v5132_v3, %v4409_v9 }
 0x348   :  { %v3178_v31 = vadd.f32 %v6880_v12, %v2854_v17  ;;  %v5122_v12 = vld [vmem:[%s8669_s2 + $0x384] sm:$0xf] }
 0x349   :  { %2583 = vmatmul.bf16.gmra.mxu2 %v4410_v5  ;;  %v4382_v51 = vor.u32 %v5122_v12, %v4379_v20  ;;  %v5141_v20 = vld [vmem:[%s8669_s2 + $0x414] sm:$0xf0] }
 0x34a   :  { %v3502_v60 = vadd.f32 %v6906_v41, %v3178_v31  ;;  %v7002_v46 = vpop.f32.mrf.mxu0 }
 0x34c   :  { %3760 = vst.msk [vmem:[%s8670_s3 + $0x130] sm:$0xff] %vm3721_vm3, %v3502_v60  ;;  %v7018_v22 = vpop.f32.mrf.mxu2  ;;  %v4449_v60 = vld [vmem:[%s8669_s2 + $0x408] sm:$0xf] }
 0x34d   :  { %v2855_v54 = vpop.f32.mrf.mxu3  ;;  %4964 = vmatmul.msk.bf16.gmra.mxu0 %vm2235_vm2, %v4406_v8  ;;  %v7024_v6 = vpop.f32.mrf.mxu1 }
 0x34e   :  { %v2856_v33 = vadd.f32 %v2855_v54, %v6896_v2  ;;  %v4450_v54 = vor.u32 %v5141_v20, %v4449_v60 }
 0x350   :  { %v3180_v21 = vadd.f32 %v6908_v1, %v2856_v33  ;;  %3231 = vmatmul.bf16.gmra.mxu1 %v4418_v30  ;;  %v5139_v33 = vld [vmem:[%s8669_s2 + $0x40c] sm:$0xf] }
 0x352   :  { %v3504_v41 = vadd.f32 %v3503_v13, %v3180_v21  ;;  %2897 = vmatmul.bf16.gmra.mxu3 %v4382_v51  ;;  %v3513_v32 = vpop.f32.mrf.mxu0  ;;  %v4425_v13 = vld [vmem:[%s8669_s2 + $0x3e0] sm:$0xf]  ;;  %v4451_v51 = vld [vmem:[%s8669_s2 + $0x418] sm:$0xf0] }
 0x354   :  { %3761 = vst.msk [vmem:[%s8670_s3 + $0x138] sm:$0xff] %vm3721_vm3, %v3504_v41  ;;  %v7040_v59 = vpop.f32.mrf.mxu2  ;;  %v4454_v41 = vor.u32 %v5139_v33, %v4451_v51  ;;  %v4459_v33 = vld [vmem:[%s8669_s2 + $0x430] sm:$0xf0] }
 0x355   :  { %v2858_v2 = vpop.f32.mrf.mxu3  ;;  %v7052_v27 = vpop.f32.mrf.mxu1 }
 0x356   :  { %v2859_v1 = vadd.f32 %v2858_v2, %v6922_v44  ;;  %v5136_v44 = vld [vmem:[%s8669_s2 + $0x3ec] sm:$0xf0] }
 0x357   :  { %v4426_v15 = vor.u32 %v5136_v44, %v4425_v13 }
 0x358   :  { %v3183_v52 = vadd.f32 %v6928_v49, %v2859_v1  ;;  %v5126_v49 = vld [vmem:[%s8669_s2 + $0x3a4] sm:$0xf] }
 0x359   :  { %2588 = vmatmul.bf16.gmra.mxu2 %v4426_v15  ;;  %v4398_v34 = vor.u32 %v5126_v49, %v4395_v58  ;;  %v5145_v58 = vld [vmem:[%s8669_s2 + $0x434] sm:$0xf0] }
 0x35a   :  { %v3507_v24 = vadd.f32 %v6954_v16, %v3183_v52  ;;  %v7050_v40 = vpop.f32.mrf.mxu0 }
 0x35c   :  { %3762 = vst.msk [vmem:[%s8670_s3 + $0x140] sm:$0xff] %vm3721_vm3, %v3507_v24  ;;  %v7066_v35 = vpop.f32.mrf.mxu2  ;;  %v4465_v24 = vld [vmem:[%s8669_s2 + $0x428] sm:$0xf] }
 0x35d   :  { %v2860_v43 = vpop.f32.mrf.mxu3  ;;  %4965 = vmatmul.msk.bf16.gmra.mxu0 %vm2235_vm2, %v4422_v57  ;;  %v7072_v25 = vpop.f32.mrf.mxu1 }
 0x35e   :  { %v2861_v50 = vadd.f32 %v2860_v43, %v6944_v47  ;;  %v4466_v43 = vor.u32 %v5145_v58, %v4465_v24 }
 0x360   :  { %v3185_v10 = vadd.f32 %v6956_v28, %v2861_v50  ;;  %3236 = vmatmul.bf16.gmra.mxu1 %v4434_v53  ;;  %v5143_v50 = vld [vmem:[%s8669_s2 + $0x42c] sm:$0xf] }
 0x362   :  { %v3509_v16 = vadd.f32 %v3508_v29, %v3185_v10  ;;  %2902 = vmatmul.bf16.gmra.mxu3 %v4398_v34  ;;  %v3518_v37 = vpop.f32.mrf.mxu0  ;;  %v4441_v29 = vld [vmem:[%s8669_s2 + $0x400] sm:$0xf]  ;;  %v4467_v34 = vld [vmem:[%s8669_s2 + $0x438] sm:$0xf0] }
 0x364   :  { %3763 = vst.msk [vmem:[%s8670_s3 + $0x148] sm:$0xff] %vm3721_vm3, %v3509_v16  ;;  %v7088_v42 = vpop.f32.mrf.mxu2  ;;  %v4470_v16 = vor.u32 %v5143_v50, %v4467_v34  ;;  %v4475_v50 = vld [vmem:[%s8669_s2 + $0x450] sm:$0xf0] }
 0x365   :  { %v2863_v47 = vpop.f32.mrf.mxu3  ;;  %v7100_v26 = vpop.f32.mrf.mxu1 }
 0x366   :  { %v2864_v28 = vadd.f32 %v2863_v47, %v6970_v63  ;;  %v5140_v63 = vld [vmem:[%s8669_s2 + $0x40c] sm:$0xf0] }
 0x367   :  { %v4442_v17 = vor.u32 %v5140_v63, %v4441_v29 }
 0x368   :  { %v3188_v38 = vadd.f32 %v6976_v45, %v2864_v28  ;;  %v5130_v45 = vld [vmem:[%s8669_s2 + $0x3c4] sm:$0xf] }
 0x369   :  { %2593 = vmatmul.bf16.gmra.mxu2 %v4442_v17  ;;  %v4414_v8 = vor.u32 %v5130_v45, %v4411_v18  ;;  %v5149_v18 = vld [vmem:[%s8669_s2 + $0x454] sm:$0xf0] }
 0x36a   :  { %v3512_v0 = vadd.f32 %v7002_v46, %v3188_v38  ;;  %v7098_v14 = vpop.f32.mrf.mxu0 }
 0x36c   :  { %3764 = vst.msk [vmem:[%s8670_s3 + $0x150] sm:$0xff] %vm3721_vm3, %v3512_v0  ;;  %v7114_v9 = vpop.f32.mrf.mxu2  ;;  %v4481_v0 = vld [vmem:[%s8669_s2 + $0x448] sm:$0xf] }
 0x36d   :  { %v2865_v19 = vpop.f32.mrf.mxu3  ;;  %4966 = vmatmul.msk.bf16.gmra.mxu0 %vm2235_vm2, %v4438_v61  ;;  %v7120_v12 = vpop.f32.mrf.mxu1 }
 0x36e   :  { %v2866_v31 = vadd.f32 %v2865_v19, %v6992_v23  ;;  %v4482_v19 = vor.u32 %v5149_v18, %v4481_v0 }
 0x370   :  { %v3190_v3 = vadd.f32 %v7004_v7, %v2866_v31  ;;  %3241 = vmatmul.bf16.gmra.mxu1 %v4450_v54  ;;  %v5147_v31 = vld [vmem:[%s8669_s2 + $0x44c] sm:$0xf] }
 0x372   :  { %v3514_v46 = vadd.f32 %v3513_v32, %v3190_v3  ;;  %2907 = vmatmul.bf16.gmra.mxu3 %v4414_v8  ;;  %v3523_v5 = vpop.f32.mrf.mxu0  ;;  %v4457_v32 = vld [vmem:[%s8669_s2 + $0x420] sm:$0xf]  ;;  %v4483_v8 = vld [vmem:[%s8669_s2 + $0x458] sm:$0xf0] }
 0x374   :  { %3765 = vst.msk [vmem:[%s8670_s3 + $0x158] sm:$0xff] %vm3721_vm3, %v3514_v46  ;;  %v7136_v21 = vpop.f32.mrf.mxu2  ;;  %v4486_v46 = vor.u32 %v5147_v31, %v4483_v8  ;;  %v4491_v31 = vld [vmem:[%s8669_s2 + $0x470] sm:$0xf0] }
 0x375   :  { %v2868_v23 = vpop.f32.mrf.mxu3  ;;  %v7148_v2 = vpop.f32.mrf.mxu1 }
 0x376   :  { %v2869_v7 = vadd.f32 %v2868_v23, %v7018_v22  ;;  %v5144_v22 = vld [vmem:[%s8669_s2 + $0x42c] sm:$0xf0] }
 0x377   :  { %v4458_v1 = vor.u32 %v5144_v22, %v4457_v32 }
 0x378   :  { %v3193_v39 = vadd.f32 %v7024_v6, %v2869_v7  ;;  %v5134_v6 = vld [vmem:[%s8669_s2 + $0x3e4] sm:$0xf] }
 0x379   :  { %2598 = vmatmul.bf16.gmra.mxu2 %v4458_v1  ;;  %v4430_v57 = vor.u32 %v5134_v6, %v4427_v62  ;;  %v5153_v62 = vld [vmem:[%s8669_s2 + $0x474] sm:$0xf0] }
 0x37a   :  { %v3517_v36 = vadd.f32 %v7050_v40, %v3193_v39  ;;  %v7146_v30 = vpop.f32.mrf.mxu0 }
 0x37c   :  { %3766 = vst.msk [vmem:[%s8670_s3 + $0x160] sm:$0xff] %vm3721_vm3, %v3517_v36  ;;  %v7162_v13 = vpop.f32.mrf.mxu2  ;;  %v4497_v36 = vld [vmem:[%s8669_s2 + $0x468] sm:$0xf] }
 0x37d   :  { %v2870_v48 = vpop.f32.mrf.mxu3  ;;  %4967 = vmatmul.msk.bf16.gmra.mxu0 %vm2235_vm2, %v4454_v41  ;;  %v7168_v49 = vpop.f32.mrf.mxu1 }
 0x37e   :  { %v2871_v52 = vadd.f32 %v2870_v48, %v7040_v59  ;;  %v4498_v48 = vor.u32 %v5153_v62, %v4497_v36 }
 0x380   :  { %v3195_v44 = vadd.f32 %v7052_v27, %v2871_v52  ;;  %3246 = vmatmul.bf16.gmra.mxu1 %v4466_v43  ;;  %v5151_v52 = vld [vmem:[%s8669_s2 + $0x46c] sm:$0xf] }
 0x382   :  { %v3519_v40 = vadd.f32 %v3518_v37, %v3195_v44  ;;  %2912 = vmatmul.bf16.gmra.mxu3 %v4430_v57  ;;  %v3528_v15 = vpop.f32.mrf.mxu0  ;;  %v4473_v37 = vld [vmem:[%s8669_s2 + $0x440] sm:$0xf]  ;;  %v4499_v57 = vld [vmem:[%s8669_s2 + $0x478] sm:$0xf0] }
 0x384   :  { %3767 = vst.msk [vmem:[%s8670_s3 + $0x168] sm:$0xff] %vm3721_vm3, %v3519_v40  ;;  %v7184_v10 = vpop.f32.mrf.mxu2  ;;  %v4502_v40 = vor.u32 %v5151_v52, %v4499_v57  ;;  %v4507_v52 = vld [vmem:[%s8669_s2 + $0x490] sm:$0xf0] }
 0x385   :  { %v2873_v59 = vpop.f32.mrf.mxu3  ;;  %v7196_v47 = vpop.f32.mrf.mxu1 }
 0x386   :  { %v2874_v27 = vadd.f32 %v2873_v59, %v7066_v35  ;;  %v5148_v35 = vld [vmem:[%s8669_s2 + $0x44c] sm:$0xf0] }
 0x387   :  { %v4474_v28 = vor.u32 %v5148_v35, %v4473_v37 }
 0x388   :  { %v3198_v56 = vadd.f32 %v7072_v25, %v2874_v27  ;;  %v5138_v25 = vld [vmem:[%s8669_s2 + $0x404] sm:$0xf] }
 0x389   :  { %2603 = vmatmul.bf16.gmra.mxu2 %v4474_v28  ;;  %v4446_v61 = vor.u32 %v5138_v25, %v4443_v55  ;;  %v5157_v55 = vld [vmem:[%s8669_s2 + $0x494] sm:$0xf0] }
 0x38a   :  { %v3522_v11 = vadd.f32 %v7098_v14, %v3198_v56  ;;  %v7194_v53 = vpop.f32.mrf.mxu0 }
 0x38c   :  { %3768 = vst.msk [vmem:[%s8670_s3 + $0x170] sm:$0xff] %vm3721_vm3, %v3522_v11  ;;  %v7210_v29 = vpop.f32.mrf.mxu2  ;;  %v4513_v11 = vld [vmem:[%s8669_s2 + $0x488] sm:$0xf] }
 0x38d   :  { %v2875_v4 = vpop.f32.mrf.mxu3  ;;  %4968 = vmatmul.msk.bf16.gmra.mxu0 %vm2235_vm2, %v4470_v16  ;;  %v7216_v45 = vpop.f32.mrf.mxu1 }
 0x38e   :  { %v2876_v38 = vadd.f32 %v2875_v4, %v7088_v42  ;;  %v4514_v4 = vor.u32 %v5157_v55, %v4513_v11 }
 0x390   :  { %v3200_v63 = vadd.f32 %v7100_v26, %v2876_v38  ;;  %3251 = vmatmul.bf16.gmra.mxu1 %v4482_v19  ;;  %v5155_v38 = vld [vmem:[%s8669_s2 + $0x48c] sm:$0xf] }
 0x392   :  { %v3524_v14 = vadd.f32 %v3523_v5, %v3200_v63  ;;  %2917 = vmatmul.bf16.gmra.mxu3 %v4446_v61  ;;  %v3533_v17 = vpop.f32.mrf.mxu0  ;;  %v4489_v5 = vld [vmem:[%s8669_s2 + $0x460] sm:$0xf]  ;;  %v4515_v61 = vld [vmem:[%s8669_s2 + $0x498] sm:$0xf0] }
 0x394   :  { %3769 = vst.msk [vmem:[%s8670_s3 + $0x178] sm:$0xff] %vm3721_vm3, %v3524_v14  ;;  %v7232_v3 = vpop.f32.mrf.mxu2  ;;  %v4518_v14 = vor.u32 %v5155_v38, %v4515_v61  ;;  %v4523_v38 = vld [vmem:[%s8669_s2 + $0x4b0] sm:$0xf0] }
 0x395   :  { %v2878_v42 = vpop.f32.mrf.mxu3  ;;  %v7244_v23 = vpop.f32.mrf.mxu1 }
 0x396   :  { %v2879_v26 = vadd.f32 %v2878_v42, %v7114_v9  ;;  %v5152_v9 = vld [vmem:[%s8669_s2 + $0x46c] sm:$0xf0] }
 0x397   :  { %v4490_v7 = vor.u32 %v5152_v9, %v4489_v5 }
 0x398   :  { %v3203_v60 = vadd.f32 %v7120_v12, %v2879_v26  ;;  %v5142_v12 = vld [vmem:[%s8669_s2 + $0x424] sm:$0xf] }
 0x399   :  { %2608 = vmatmul.bf16.gmra.mxu2 %v4490_v7  ;;  %v4462_v41 = vor.u32 %v5142_v12, %v4459_v33  ;;  %v5161_v33 = vld [vmem:[%s8669_s2 + $0x4b4] sm:$0xf0] }
 0x39a   :  { %v3527_v20 = vadd.f32 %v7146_v30, %v3203_v60  ;;  %v7242_v54 = vpop.f32.mrf.mxu0 }
 0x39c   :  { %3770 = vst.msk [vmem:[%s8670_s3 + $0x180] sm:$0xff] %vm3721_vm3, %v3527_v20  ;;  %v7258_v32 = vpop.f32.mrf.mxu2  ;;  %v4529_v20 = vld [vmem:[%s8669_s2 + $0x4a8] sm:$0xf] }
 0x39d   :  { %v2880_v51 = vpop.f32.mrf.mxu3  ;;  %4969 = vmatmul.msk.bf16.gmra.mxu0 %vm2235_vm2, %v4486_v46  ;;  %v7264_v6 = vpop.f32.mrf.mxu1 }
 0x39e   :  { %v2881_v39 = vadd.f32 %v2880_v51, %v7136_v21  ;;  %v4530_v51 = vor.u32 %v5161_v33, %v4529_v20 }
 0x3a0   :  { %v3205_v22 = vadd.f32 %v7148_v2, %v2881_v39  ;;  %3256 = vmatmul.bf16.gmra.mxu1 %v4498_v48  ;;  %v5159_v39 = vld [vmem:[%s8669_s2 + $0x4ac] sm:$0xf] }
 0x3a2   :  { %v3529_v30 = vadd.f32 %v3528_v15, %v3205_v22  ;;  %2922 = vmatmul.bf16.gmra.mxu3 %v4462_v41  ;;  %v3538_v1 = vpop.f32.mrf.mxu0  ;;  %v4505_v15 = vld [vmem:[%s8669_s2 + $0x480] sm:$0xf]  ;;  %v4531_v41 = vld [vmem:[%s8669_s2 + $0x4b8] sm:$0xf0] }
 0x3a4   :  { %3771 = vst.msk [vmem:[%s8670_s3 + $0x188] sm:$0xff] %vm3721_vm3, %v3529_v30  ;;  %v7280_v44 = vpop.f32.mrf.mxu2  ;;  %v4534_v30 = vor.u32 %v5159_v39, %v4531_v41  ;;  %v4539_v39 = vld [vmem:[%s8669_s2 + $0x4d0] sm:$0xf0] }
 0x3a5   :  { %v2883_v21 = vpop.f32.mrf.mxu3  ;;  %v7292_v59 = vpop.f32.mrf.mxu1 }
 0x3a6   :  { %v2884_v2 = vadd.f32 %v2883_v21, %v7162_v13  ;;  %v5156_v13 = vld [vmem:[%s8669_s2 + $0x48c] sm:$0xf0] }
 0x3a7   :  { %v4506_v27 = vor.u32 %v5156_v13, %v4505_v15 }
 0x3a8   :  { %v3208_v24 = vadd.f32 %v7168_v49, %v2884_v2  ;;  %v5146_v49 = vld [vmem:[%s8669_s2 + $0x444] sm:$0xf] }
 0x3a9   :  { %2613 = vmatmul.bf16.gmra.mxu2 %v4506_v27  ;;  %v4478_v16 = vor.u32 %v5146_v49, %v4475_v50  ;;  %v5165_v50 = vld [vmem:[%s8669_s2 + $0x4d4] sm:$0xf0] }
 0x3aa   :  { %v3532_v58 = vadd.f32 %v7194_v53, %v3208_v24  ;;  %v7290_v43 = vpop.f32.mrf.mxu0 }
 0x3ac   :  { %3772 = vst.msk [vmem:[%s8670_s3 + $0x190] sm:$0xff] %vm3721_vm3, %v3532_v58  ;;  %v7306_v37 = vpop.f32.mrf.mxu2  ;;  %v4545_v58 = vld [vmem:[%s8669_s2 + $0x4c8] sm:$0xf] }
 0x3ad   :  { %v2885_v34 = vpop.f32.mrf.mxu3  ;;  %4970 = vmatmul.msk.bf16.gmra.mxu0 %vm2235_vm2, %v4502_v40  ;;  %v7312_v25 = vpop.f32.mrf.mxu1 }
 0x3ae   :  { %v2886_v56 = vadd.f32 %v2885_v34, %v7184_v10  ;;  %v4546_v34 = vor.u32 %v5165_v50, %v4545_v58 }
 0x3b0   :  { %v3210_v35 = vadd.f32 %v7196_v47, %v2886_v56  ;;  %3261 = vmatmul.bf16.gmra.mxu1 %v4514_v4  ;;  %v5163_v56 = vld [vmem:[%s8669_s2 + $0x4cc] sm:$0xf] }
 0x3b2   :  { %v3534_v53 = vadd.f32 %v3533_v17, %v3210_v35  ;;  %2927 = vmatmul.bf16.gmra.mxu3 %v4478_v16  ;;  %v3543_v28 = vpop.f32.mrf.mxu0  ;;  %v4521_v17 = vld [vmem:[%s8669_s2 + $0x4a0] sm:$0xf]  ;;  %v4547_v16 = vld [vmem:[%s8669_s2 + $0x4d8] sm:$0xf0] }
 0x3b4   :  { %3773 = vst.msk [vmem:[%s8670_s3 + $0x198] sm:$0xff] %vm3721_vm3, %v3534_v53  ;;  %v7328_v63 = vpop.f32.mrf.mxu2  ;;  %v4550_v53 = vor.u32 %v5163_v56, %v4547_v16  ;;  %v4555_v56 = vld [vmem:[%s8669_s2 + $0x4f0] sm:$0xf0] }
 0x3b5   :  { %v2888_v10 = vpop.f32.mrf.mxu3  ;;  %v7340_v42 = vpop.f32.mrf.mxu1 }
 0x3b6   :  { %v2889_v47 = vadd.f32 %v2888_v10, %v7210_v29  ;;  %v5160_v29 = vld [vmem:[%s8669_s2 + $0x4ac] sm:$0xf0] }
 0x3b7   :  { %v4522_v26 = vor.u32 %v5160_v29, %v4521_v17 }
 0x3b8   :  { %v3213_v0 = vadd.f32 %v7216_v45, %v2889_v47  ;;  %v5150_v45 = vld [vmem:[%s8669_s2 + $0x464] sm:$0xf] }
 0x3b9   :  { %2618 = vmatmul.bf16.gmra.mxu2 %v4522_v26  ;;  %v4494_v46 = vor.u32 %v5150_v45, %v4491_v31  ;;  %v5169_v31 = vld [vmem:[%s8669_s2 + $0x4f4] sm:$0xf0] }
 0x3ba   :  { %v3537_v18 = vadd.f32 %v7242_v54, %v3213_v0  ;;  %v7338_v19 = vpop.f32.mrf.mxu0 }
 0x3bc   :  { %3774 = vst.msk [vmem:[%s8670_s3 + $0x1a0] sm:$0xff] %vm3721_vm3, %v3537_v18  ;;  %v7354_v5 = vpop.f32.mrf.mxu2  ;;  %v4561_v18 = vld [vmem:[%s8669_s2 + $0x4e8] sm:$0xf] }
 0x3bd   :  { %v2890_v8 = vpop.f32.mrf.mxu3  ;;  %4971 = vmatmul.msk.bf16.gmra.mxu0 %vm2235_vm2, %v4518_v14  ;;  %v7360_v12 = vpop.f32.mrf.mxu1 }
 0x3be   :  { %v2891_v60 = vadd.f32 %v2890_v8, %v7232_v3  ;;  %v4562_v8 = vor.u32 %v5169_v31, %v4561_v18 }
 0x3c0   :  { %v3215_v9 = vadd.f32 %v7244_v23, %v2891_v60  ;;  %3266 = vmatmul.bf16.gmra.mxu1 %v4530_v51  ;;  %v5167_v60 = vld [vmem:[%s8669_s2 + $0x4ec] sm:$0xf] }
 0x3c2   :  { %v3539_v54 = vadd.f32 %v3538_v1, %v3215_v9  ;;  %2932 = vmatmul.bf16.gmra.mxu3 %v4494_v46  ;;  %v3548_v7 = vpop.f32.mrf.mxu0  ;;  %v4537_v1 = vld [vmem:[%s8669_s2 + $0x4c0] sm:$0xf]  ;;  %v4563_v46 = vld [vmem:[%s8669_s2 + $0x4f8] sm:$0xf0] }
 0x3c4   :  { %3775 = vst.msk [vmem:[%s8670_s3 + $0x1a8] sm:$0xff] %vm3721_vm3, %v3539_v54  ;;  %v7376_v22 = vpop.f32.mrf.mxu2  ;;  %v4566_v54 = vor.u32 %v5167_v60, %v4563_v46  ;;  %v4571_v60 = vld [vmem:[%s8669_s2 + $0x510] sm:$0xf0] }
 0x3c5   :  { %v2893_v3 = vpop.f32.mrf.mxu3  ;;  %v7388_v21 = vpop.f32.mrf.mxu1 }
 0x3c6   :  { %v2894_v23 = vadd.f32 %v2893_v3, %v7258_v32  ;;  %v5164_v32 = vld [vmem:[%s8669_s2 + $0x4cc] sm:$0xf0] }
 0x3c7   :  { %v4538_v2 = vor.u32 %v5164_v32, %v4537_v1 }
 0x3c8   :  { %v3218_v36 = vadd.f32 %v7264_v6, %v2894_v23  ;;  %v5154_v6 = vld [vmem:[%s8669_s2 + $0x484] sm:$0xf] }
 0x3c9   :  { %2623 = vmatmul.bf16.gmra.mxu2 %v4538_v2  ;;  %v4510_v40 = vor.u32 %v5154_v6, %v4507_v52  ;;  %v5173_v52 = vld [vmem:[%s8669_s2 + $0x514] sm:$0xf0] }
 0x3ca   :  { %v3542_v62 = vadd.f32 %v7290_v43, %v3218_v36  ;;  %v7386_v48 = vpop.f32.mrf.mxu0 }
 0x3cc   :  { %3776 = vst.msk [vmem:[%s8670_s3 + $0x1b0] sm:$0xff] %vm3721_vm3, %v3542_v62  ;;  %v7402_v15 = vpop.f32.mrf.mxu2  ;;  %v4577_v62 = vld [vmem:[%s8669_s2 + $0x508] sm:$0xf] }
 0x3cd   :  { %v2895_v57 = vpop.f32.mrf.mxu3  ;;  %4972 = vmatmul.msk.bf16.gmra.mxu0 %vm2235_vm2, %v4534_v30  ;;  %v7408_v49 = vpop.f32.mrf.mxu1 }
 0x3ce   :  { %v2896_v24 = vadd.f32 %v2895_v57, %v7280_v44  ;;  %v4578_v57 = vor.u32 %v5173_v52, %v4577_v62 }
 0x3d0   :  { %v3220_v13 = vadd.f32 %v7292_v59, %v2896_v24  ;;  %3271 = vmatmul.bf16.gmra.mxu1 %v4546_v34  ;;  %v5171_v24 = vld [vmem:[%s8669_s2 + $0x50c] sm:$0xf] }
 0x3d2   :  { %v3544_v43 = vadd.f32 %v3543_v28, %v3220_v13  ;;  %2937 = vmatmul.bf16.gmra.mxu3 %v4510_v40  ;;  %v3553_v27 = vpop.f32.mrf.mxu0  ;;  %v4553_v28 = vld [vmem:[%s8669_s2 + $0x4e0] sm:$0xf]  ;;  %v4579_v40 = vld [vmem:[%s8669_s2 + $0x518] sm:$0xf0] }
 0x3d4   :  { %3777 = vst.msk [vmem:[%s8670_s3 + $0x1b8] sm:$0xff] %vm3721_vm3, %v3544_v43  ;;  %v7424_v35 = vpop.f32.mrf.mxu2  ;;  %v4582_v43 = vor.u32 %v5171_v24, %v4579_v40  ;;  %v4587_v24 = vld [vmem:[%s8669_s2 + $0x530] sm:$0xf0] }
 0x3d5   :  { %v2898_v44 = vpop.f32.mrf.mxu3  ;;  %v7436_v10 = vpop.f32.mrf.mxu1 }
 0x3d6   :  { %v2899_v59 = vadd.f32 %v2898_v44, %v7306_v37  ;;  %v5168_v37 = vld [vmem:[%s8669_s2 + $0x4ec] sm:$0xf0] }
 0x3d7   :  { %v4554_v47 = vor.u32 %v5168_v37, %v4553_v28 }
 0x3d8   :  { %v3223_v11 = vadd.f32 %v7312_v25, %v2899_v59  ;;  %v5158_v25 = vld [vmem:[%s8669_s2 + $0x4a4] sm:$0xf] }
 0x3d9   :  { %2628 = vmatmul.bf16.gmra.mxu2 %v4554_v47  ;;  %v4526_v14 = vor.u32 %v5158_v25, %v4523_v38  ;;  %v5177_v38 = vld [vmem:[%s8669_s2 + $0x534] sm:$0xf0] }
 0x3da   :  { %v3547_v55 = vadd.f32 %v7338_v19, %v3223_v11  ;;  %v7434_v4 = vpop.f32.mrf.mxu0 }
 0x3dc   :  { %3778 = vst.msk [vmem:[%s8670_s3 + $0x1c0] sm:$0xff] %vm3721_vm3, %v3547_v55  ;;  %v7450_v17 = vpop.f32.mrf.mxu2  ;;  %v4593_v55 = vld [vmem:[%s8669_s2 + $0x528] sm:$0xf] }
 0x3dd   :  { %v2900_v61 = vpop.f32.mrf.mxu3  ;;  %4973 = vmatmul.msk.bf16.gmra.mxu0 %vm2235_vm2, %v4550_v53  ;;  %v7456_v45 = vpop.f32.mrf.mxu1 }
 0x3de   :  { %v2901_v0 = vadd.f32 %v2900_v61, %v7328_v63  ;;  %v4594_v61 = vor.u32 %v5177_v38, %v4593_v55 }
 0x3e0   :  { %v3225_v29 = vadd.f32 %v7340_v42, %v2901_v0  ;;  %3276 = vmatmul.bf16.gmra.mxu1 %v4562_v8  ;;  %v5175_v0 = vld [vmem:[%s8669_s2 + $0x52c] sm:$0xf] }
 0x3e2   :  { %v3549_v19 = vadd.f32 %v3548_v7, %v3225_v29  ;;  %2942 = vmatmul.bf16.gmra.mxu3 %v4526_v14  ;;  %v3558_v26 = vpop.f32.mrf.mxu0  ;;  %v4569_v7 = vld [vmem:[%s8669_s2 + $0x500] sm:$0xf]  ;;  %v4595_v14 = vld [vmem:[%s8669_s2 + $0x538] sm:$0xf0] }
 0x3e4   :  { %3779 = vst.msk [vmem:[%s8670_s3 + $0x1c8] sm:$0xff] %vm3721_vm3, %v3549_v19  ;;  %v7472_v9 = vpop.f32.mrf.mxu2  ;;  %v4598_v19 = vor.u32 %v5175_v0, %v4595_v14  ;;  %v4603_v0 = vld [vmem:[%s8669_s2 + $0x550] sm:$0xf0] }
 0x3e5   :  { %v2903_v63 = vpop.f32.mrf.mxu3  ;;  %v7484_v3 = vpop.f32.mrf.mxu1 }
 0x3e6   :  { %v2904_v42 = vadd.f32 %v2903_v63, %v7354_v5  ;;  %v5172_v5 = vld [vmem:[%s8669_s2 + $0x50c] sm:$0xf0] }
 0x3e7   :  { %v4570_v23 = vor.u32 %v5172_v5, %v4569_v7 }
 0x3e8   :  { %v3228_v20 = vadd.f32 %v7360_v12, %v2904_v42  ;;  %v5162_v12 = vld [vmem:[%s8669_s2 + $0x4c4] sm:$0xf] }
 0x3e9   :  { %2633 = vmatmul.bf16.gmra.mxu2 %v4570_v23  ;;  %v4542_v30 = vor.u32 %v5162_v12, %v4539_v39  ;;  %v5181_v39 = vld [vmem:[%s8669_s2 + $0x554] sm:$0xf0] }
 0x3ea   :  { %v3552_v33 = vadd.f32 %v7386_v48, %v3228_v20  ;;  %v7482_v51 = vpop.f32.mrf.mxu0 }
 0x3ec   :  { %3780 = vst.msk [vmem:[%s8670_s3 + $0x1d0] sm:$0xff] %vm3721_vm3, %v3552_v33  ;;  %v7498_v1 = vpop.f32.mrf.mxu2  ;;  %v4609_v33 = vld [vmem:[%s8669_s2 + $0x548] sm:$0xf] }
 0x3ed   :  { %v2905_v41 = vpop.f32.mrf.mxu3  ;;  %4974 = vmatmul.msk.bf16.gmra.mxu0 %vm2235_vm2, %v4566_v54  ;;  %v7504_v6 = vpop.f32.mrf.mxu1 }
 0x3ee   :  { %v2906_v36 = vadd.f32 %v2905_v41, %v7376_v22  ;;  %v4610_v41 = vor.u32 %v5181_v39, %v4609_v33 }
 0x3f0   :  { %v3230_v32 = vadd.f32 %v7388_v21, %v2906_v36  ;;  %3281 = vmatmul.bf16.gmra.mxu1 %v4578_v57  ;;  %v5179_v36 = vld [vmem:[%s8669_s2 + $0x54c] sm:$0xf] }
 0x3f2   :  { %v3554_v48 = vadd.f32 %v3553_v27, %v3230_v32  ;;  %2947 = vmatmul.bf16.gmra.mxu3 %v4542_v30  ;;  %v3563_v2 = vpop.f32.mrf.mxu0  ;;  %v4585_v27 = vld [vmem:[%s8669_s2 + $0x520] sm:$0xf]  ;;  %v4611_v30 = vld [vmem:[%s8669_s2 + $0x558] sm:$0xf0] }
 0x3f4   :  { %3781 = vst.msk [vmem:[%s8670_s3 + $0x1d8] sm:$0xff] %vm3721_vm3, %v3554_v48  ;;  %v7520_v13 = vpop.f32.mrf.mxu2  ;;  %v4614_v48 = vor.u32 %v5179_v36, %v4611_v30  ;;  %v4619_v36 = vld [vmem:[%s8669_s2 + $0x570] sm:$0xf0] }
 0x3f5   :  { %v2908_v22 = vpop.f32.mrf.mxu3  ;;  %v7532_v44 = vpop.f32.mrf.mxu1 }
 0x3f6   :  { %v2909_v21 = vadd.f32 %v2908_v22, %v7402_v15  ;;  %v5176_v15 = vld [vmem:[%s8669_s2 + $0x52c] sm:$0xf0] }
 0x3f7   :  { %v4586_v59 = vor.u32 %v5176_v15, %v4585_v27 }
 0x3f8   :  { %v3233_v58 = vadd.f32 %v7408_v49, %v2909_v21  ;;  %v5166_v49 = vld [vmem:[%s8669_s2 + $0x4e4] sm:$0xf] }
 0x3f9   :  { %2638 = vmatmul.bf16.gmra.mxu2 %v4586_v59  ;;  %v4558_v53 = vor.u32 %v5166_v49, %v4555_v56  ;;  %v5185_v56 = vld [vmem:[%s8669_s2 + $0x574] sm:$0xf0] }
 0x3fa   :  { %v3557_v50 = vadd.f32 %v7434_v4, %v3233_v58  ;;  %v7530_v34 = vpop.f32.mrf.mxu0 }
 0x3fc   :  { %3782 = vst.msk [vmem:[%s8670_s3 + $0x1e0] sm:$0xff] %vm3721_vm3, %v3557_v50  ;;  %v7546_v28 = vpop.f32.mrf.mxu2  ;;  %v4625_v50 = vld [vmem:[%s8669_s2 + $0x568] sm:$0xf] }
 0x3fd   :  { %v2910_v16 = vpop.f32.mrf.mxu3  ;;  %4975 = vmatmul.msk.bf16.gmra.mxu0 %vm2235_vm2, %v4582_v43  ;;  %v7552_v25 = vpop.f32.mrf.mxu1 }
 0x3fe   :  { %v2911_v11 = vadd.f32 %v2910_v16, %v7424_v35  ;;  %v4626_v16 = vor.u32 %v5185_v56, %v4625_v50 }
 0x400   :  { %v3235_v37 = vadd.f32 %v7436_v10, %v2911_v11  ;;  %3286 = vmatmul.bf16.gmra.mxu1 %v4594_v61  ;;  %v5183_v11 = vld [vmem:[%s8669_s2 + $0x56c] sm:$0xf] }
 0x402   :  { %v3559_v4 = vadd.f32 %v3558_v26, %v3235_v37  ;;  %2952 = vmatmul.bf16.gmra.mxu3 %v4558_v53  ;;  %v3568_v47 = vpop.f32.mrf.mxu0  ;;  %v4601_v26 = vld [vmem:[%s8669_s2 + $0x540] sm:$0xf]  ;;  %v4627_v53 = vld [vmem:[%s8669_s2 + $0x578] sm:$0xf0] }
 0x404   :  { %3783 = vst.msk [vmem:[%s8670_s3 + $0x1e8] sm:$0xff] %vm3721_vm3, %v3559_v4  ;;  %v7568_v29 = vpop.f32.mrf.mxu2  ;;  %v4630_v4 = vor.u32 %v5183_v11, %v4627_v53  ;;  %v4635_v11 = vld [vmem:[%s8669_s2 + $0x590] sm:$0xf0] }
 0x405   :  { %v2913_v35 = vpop.f32.mrf.mxu3  ;;  %v7580_v63 = vpop.f32.mrf.mxu1 }
 0x406   :  { %v2914_v10 = vadd.f32 %v2913_v35, %v7450_v17  ;;  %v5180_v17 = vld [vmem:[%s8669_s2 + $0x54c] sm:$0xf0] }
 0x407   :  { %v4602_v42 = vor.u32 %v5180_v17, %v4601_v26 }
 0x408   :  { %v3238_v18 = vadd.f32 %v7456_v45, %v2914_v10  ;;  %v5170_v45 = vld [vmem:[%s8669_s2 + $0x504] sm:$0xf] }
 0x409   :  { %2643 = vmatmul.bf16.gmra.mxu2 %v4602_v42  ;;  %v4574_v54 = vor.u32 %v5170_v45, %v4571_v60  ;;  %v5189_v60 = vld [vmem:[%s8669_s2 + $0x594] sm:$0xf0] }
 0x40a   :  { %v3562_v31 = vadd.f32 %v7482_v51, %v3238_v18  ;;  %v7578_v8 = vpop.f32.mrf.mxu0 }
 0x40c   :  { %3784 = vst.msk [vmem:[%s8670_s3 + $0x1f0] sm:$0xff] %vm3721_vm3, %v3562_v31  ;;  %v7594_v7 = vpop.f32.mrf.mxu2  ;;  %v4641_v31 = vld [vmem:[%s8669_s2 + $0x588] sm:$0xf] }
 0x40d   :  { %v2915_v46 = vpop.f32.mrf.mxu3  ;;  %4976 = vmatmul.msk.bf16.gmra.mxu0 %vm2235_vm2, %v4598_v19  ;;  %v7600_v12 = vpop.f32.mrf.mxu1 }
 0x40e   :  { %v2916_v20 = vadd.f32 %v2915_v46, %v7472_v9  ;;  %v4642_v46 = vor.u32 %v5189_v60, %v4641_v31 }
 0x410   :  { %v3240_v5 = vadd.f32 %v7484_v3, %v2916_v20  ;;  %3291 = vmatmul.bf16.gmra.mxu1 %v4610_v41  ;;  %v5187_v20 = vld [vmem:[%s8669_s2 + $0x58c] sm:$0xf] }
 0x412   :  { %v3564_v51 = vadd.f32 %v3563_v2, %v3240_v5  ;;  %2957 = vmatmul.bf16.gmra.mxu3 %v4574_v54  ;;  %v3573_v23 = vpop.f32.mrf.mxu0  ;;  %v4617_v2 = vld [vmem:[%s8669_s2 + $0x560] sm:$0xf]  ;;  %v4643_v54 = vld [vmem:[%s8669_s2 + $0x598] sm:$0xf0] }
 0x414   :  { %3785 = vst.msk [vmem:[%s8670_s3 + $0x1f8] sm:$0xff] %vm3721_vm3, %v3564_v51  ;;  %v7616_v32 = vpop.f32.mrf.mxu2  ;;  %v4646_v51 = vor.u32 %v5187_v20, %v4643_v54  ;;  %v4651_v20 = vld [vmem:[%s8669_s2 + $0x5b0] sm:$0xf0] }
 0x415   :  { %v2918_v9 = vpop.f32.mrf.mxu3  ;;  %v7628_v22 = vpop.f32.mrf.mxu1 }
 0x416   :  { %v2919_v3 = vadd.f32 %v2918_v9, %v7498_v1  ;;  %v5184_v1 = vld [vmem:[%s8669_s2 + $0x56c] sm:$0xf0] }
 0x417   :  { %v4618_v21 = vor.u32 %v5184_v1, %v4617_v2 }
 0x418   :  { %v3243_v62 = vadd.f32 %v7504_v6, %v2919_v3  ;;  %v5174_v6 = vld [vmem:[%s8669_s2 + $0x524] sm:$0xf] }
 0x419   :  { %2648 = vmatmul.bf16.gmra.mxu2 %v4618_v21  ;;  %v4590_v43 = vor.u32 %v5174_v6, %v4587_v24  ;;  %v5193_v24 = vld [vmem:[%s8669_s2 + $0x5b4] sm:$0xf0] }
 0x41a   :  { %v3567_v52 = vadd.f32 %v7530_v34, %v3243_v62  ;;  %v7626_v57 = vpop.f32.mrf.mxu0 }
 0x41c   :  { %3786 = vst.msk [vmem:[%s8670_s3 + $0x200] sm:$0xff] %vm3721_vm3, %v3567_v52  ;;  %v7642_v27 = vpop.f32.mrf.mxu2  ;;  %v4657_v52 = vld [vmem:[%s8669_s2 + $0x5a8] sm:$0xf] }
 0x41d   :  { %v2920_v40 = vpop.f32.mrf.mxu3  ;;  %4977 = vmatmul.msk.bf16.gmra.mxu0 %vm2235_vm2, %v4614_v48  ;;  %v7648_v49 = vpop.f32.mrf.mxu1 }
 0x41e   :  { %v2921_v58 = vadd.f32 %v2920_v40, %v7520_v13  ;;  %v4658_v40 = vor.u32 %v5193_v24, %v4657_v52 }
 0x420   :  { %v3245_v15 = vadd.f32 %v7532_v44, %v2921_v58  ;;  %3296 = vmatmul.bf16.gmra.mxu1 %v4626_v16  ;;  %v5191_v58 = vld [vmem:[%s8669_s2 + $0x5ac] sm:$0xf] }
 0x422   :  { %v3569_v34 = vadd.f32 %v3568_v47, %v3245_v15  ;;  %2962 = vmatmul.bf16.gmra.mxu3 %v4590_v43  ;;  %v3578_v59 = vpop.f32.mrf.mxu0  ;;  %v4633_v47 = vld [vmem:[%s8669_s2 + $0x580] sm:$0xf]  ;;  %v4659_v43 = vld [vmem:[%s8669_s2 + $0x5b8] sm:$0xf0] }
 0x424   :  { %3787 = vst.msk [vmem:[%s8670_s3 + $0x208] sm:$0xff] %vm3721_vm3, %v3569_v34  ;;  %v7664_v37 = vpop.f32.mrf.mxu2  ;;  %v4662_v34 = vor.u32 %v5191_v58, %v4659_v43  ;;  %v4667_v58 = vld [vmem:[%s8669_s2 + $0x5d0] sm:$0xf0] }
 0x425   :  { %v2923_v13 = vpop.f32.mrf.mxu3  ;;  %v7676_v35 = vpop.f32.mrf.mxu1 }
 0x426   :  { %v2924_v44 = vadd.f32 %v2923_v13, %v7546_v28  ;;  %v5188_v28 = vld [vmem:[%s8669_s2 + $0x58c] sm:$0xf0] }
 0x427   :  { %v4634_v10 = vor.u32 %v5188_v28, %v4633_v47 }
 0x428   :  { %v3248_v55 = vadd.f32 %v7552_v25, %v2924_v44  ;;  %v5178_v25 = vld [vmem:[%s8669_s2 + $0x544] sm:$0xf] }
 0x429   :  { %2653 = vmatmul.bf16.gmra.mxu2 %v4634_v10  ;;  %v4606_v19 = vor.u32 %v5178_v25, %v4603_v0  ;;  %v5197_v0 = vld [vmem:[%s8669_s2 + $0x5d4] sm:$0xf0] }
 0x42a   :  { %v3572_v38 = vadd.f32 %v7578_v8, %v3248_v55  ;;  %v7674_v61 = vpop.f32.mrf.mxu0 }
 0x42c   :  { %3788 = vst.msk [vmem:[%s8670_s3 + $0x210] sm:$0xff] %vm3721_vm3, %v3572_v38  ;;  %v7690_v26 = vpop.f32.mrf.mxu2  ;;  %v4673_v38 = vld [vmem:[%s8669_s2 + $0x5c8] sm:$0xf] }
 0x42d   :  { %v2925_v14 = vpop.f32.mrf.mxu3  ;;  %4978 = vmatmul.msk.bf16.gmra.mxu0 %vm2235_vm2, %v4630_v4  ;;  %v7696_v45 = vpop.f32.mrf.mxu1 }
 0x42e   :  { %v2926_v18 = vadd.f32 %v2925_v14, %v7568_v29  ;;  %v4674_v14 = vor.u32 %v5197_v0, %v4673_v38 }
 0x430   :  { %v3250_v17 = vadd.f32 %v7580_v63, %v2926_v18  ;;  %3301 = vmatmul.bf16.gmra.mxu1 %v4642_v46  ;;  %v5195_v18 = vld [vmem:[%s8669_s2 + $0x5cc] sm:$0xf] }
 0x432   :  { %v3574_v8 = vadd.f32 %v3573_v23, %v3250_v17  ;;  %2967 = vmatmul.bf16.gmra.mxu3 %v4606_v19  ;;  %v3583_v42 = vpop.f32.mrf.mxu0  ;;  %v4649_v23 = vld [vmem:[%s8669_s2 + $0x5a0] sm:$0xf]  ;;  %v4675_v19 = vld [vmem:[%s8669_s2 + $0x5d8] sm:$0xf0] }
 0x434   :  { %3789 = vst.msk [vmem:[%s8670_s3 + $0x218] sm:$0xff] %vm3721_vm3, %v3574_v8  ;;  %v7712_v5 = vpop.f32.mrf.mxu2  ;;  %v4678_v8 = vor.u32 %v5195_v18, %v4675_v19  ;;  %v4683_v18 = vld [vmem:[%s8669_s2 + $0x5f0] sm:$0xf0] }
 0x435   :  { %v2928_v29 = vpop.f32.mrf.mxu3  ;;  %v7724_v9 = vpop.f32.mrf.mxu1 }
 0x436   :  { %v2929_v63 = vadd.f32 %v2928_v29, %v7594_v7  ;;  %v5192_v7 = vld [vmem:[%s8669_s2 + $0x5ac] sm:$0xf0] }
 0x437   :  { %v4650_v3 = vor.u32 %v5192_v7, %v4649_v23 }
 0x438   :  { %v3253_v33 = vadd.f32 %v7600_v12, %v2929_v63  ;;  %v5182_v12 = vld [vmem:[%s8669_s2 + $0x564] sm:$0xf] }
 0x439   :  { %2658 = vmatmul.bf16.gmra.mxu2 %v4650_v3  ;;  %v4622_v48 = vor.u32 %v5182_v12, %v4619_v36  ;;  %v5201_v36 = vld [vmem:[%s8669_s2 + $0x5f4] sm:$0xf0] }
 0x43a   :  { %v3577_v39 = vadd.f32 %v7626_v57, %v3253_v33  ;;  %v7722_v41 = vpop.f32.mrf.mxu0 }
 0x43c   :  { %3790 = vst.msk [vmem:[%s8670_s3 + $0x220] sm:$0xff] %vm3721_vm3, %v3577_v39  ;;  %v7738_v2 = vpop.f32.mrf.mxu2  ;;  %v4689_v39 = vld [vmem:[%s8669_s2 + $0x5e8] sm:$0xf] }
 0x43d   :  { %v2930_v30 = vpop.f32.mrf.mxu3  ;;  %4979 = vmatmul.msk.bf16.gmra.mxu0 %vm2235_vm2, %v4646_v51  ;;  %v7744_v6 = vpop.f32.mrf.mxu1 }
 0x43e   :  { %v2931_v62 = vadd.f32 %v2930_v30, %v7616_v32  ;;  %v4690_v30 = vor.u32 %v5201_v36, %v4689_v39 }
 0x440   :  { %v3255_v1 = vadd.f32 %v7628_v22, %v2931_v62  ;;  %3306 = vmatmul.bf16.gmra.mxu1 %v4658_v40  ;;  %v5199_v62 = vld [vmem:[%s8669_s2 + $0x5ec] sm:$0xf] }
 0x442   :  { %v3579_v57 = vadd.f32 %v3578_v59, %v3255_v1  ;;  %2972 = vmatmul.bf16.gmra.mxu3 %v4622_v48  ;;  %v3588_v21 = vpop.f32.mrf.mxu0  ;;  %v4665_v59 = vld [vmem:[%s8669_s2 + $0x5c0] sm:$0xf]  ;;  %v4691_v48 = vld [vmem:[%s8669_s2 + $0x5f8] sm:$0xf0] }
 0x444   :  { %3791 = vst.msk [vmem:[%s8670_s3 + $0x228] sm:$0xff] %vm3721_vm3, %v3579_v57  ;;  %v7760_v15 = vpop.f32.mrf.mxu2  ;;  %v4694_v57 = vor.u32 %v5199_v62, %v4691_v48  ;;  %v4699_v62 = vld [vmem:[%s8669_s2 + $0x610] sm:$0xf0] }
 0x445   :  { %v2933_v32 = vpop.f32.mrf.mxu3  ;;  %v7772_v13 = vpop.f32.mrf.mxu1 }
 0x446   :  { %v2934_v22 = vadd.f32 %v2933_v32, %v7642_v27  ;;  %v5196_v27 = vld [vmem:[%s8669_s2 + $0x5cc] sm:$0xf0] }
 0x447   :  { %v4666_v44 = vor.u32 %v5196_v27, %v4665_v59 }
 0x448   :  { %v3258_v50 = vadd.f32 %v7648_v49, %v2934_v22  ;;  %v5186_v49 = vld [vmem:[%s8669_s2 + $0x584] sm:$0xf] }
 0x449   :  { %2663 = vmatmul.bf16.gmra.mxu2 %v4666_v44  ;;  %v4638_v4 = vor.u32 %v5186_v49, %v4635_v11  ;;  %v5205_v11 = vld [vmem:[%s8669_s2 + $0x614] sm:$0xf0] }
 0x44a   :  { %v3582_v56 = vadd.f32 %v7674_v61, %v3258_v50  ;;  %v7770_v16 = vpop.f32.mrf.mxu0 }
 0x44c   :  { %3792 = vst.msk [vmem:[%s8670_s3 + $0x230] sm:$0xff] %vm3721_vm3, %v3582_v56  ;;  %v7786_v47 = vpop.f32.mrf.mxu2  ;;  %v4705_v56 = vld [vmem:[%s8669_s2 + $0x608] sm:$0xf] }
 0x44d   :  { %v2935_v53 = vpop.f32.mrf.mxu3  ;;  %4980 = vmatmul.msk.bf16.gmra.mxu0 %vm2235_vm2, %v4662_v34  ;;  %v7792_v25 = vpop.f32.mrf.mxu1 }
 0x44e   :  { %v2936_v55 = vadd.f32 %v2935_v53, %v7664_v37  ;;  %v4706_v53 = vor.u32 %v5205_v11, %v4705_v56 }
 0x450   :  { %v3260_v28 = vadd.f32 %v7676_v35, %v2936_v55  ;;  %3311 = vmatmul.bf16.gmra.mxu1 %v4674_v14  ;;  %v5203_v55 = vld [vmem:[%s8669_s2 + $0x60c] sm:$0xf] }
 0x452   :  { %v3584_v61 = vadd.f32 %v3583_v42, %v3260_v28  ;;  %2977 = vmatmul.bf16.gmra.mxu3 %v4638_v4  ;;  %v3593_v10 = vpop.f32.mrf.mxu0  ;;  %v4681_v42 = vld [vmem:[%s8669_s2 + $0x5e0] sm:$0xf]  ;;  %v4707_v4 = vld [vmem:[%s8669_s2 + $0x618] sm:$0xf0] }
 0x454   :  { %3793 = vst.msk [vmem:[%s8670_s3 + $0x238] sm:$0xff] %vm3721_vm3, %v3584_v61  ;;  %v7808_v17 = vpop.f32.mrf.mxu2  ;;  %v4710_v61 = vor.u32 %v5203_v55, %v4707_v4  ;;  %v4715_v55 = vld [vmem:[%s8669_s2 + $0x630] sm:$0xf0] }
 0x455   :  { %v2938_v37 = vpop.f32.mrf.mxu3  ;;  %v7820_v29 = vpop.f32.mrf.mxu1 }
 0x456   :  { %v2939_v35 = vadd.f32 %v2938_v37, %v7690_v26  ;;  %v5200_v26 = vld [vmem:[%s8669_s2 + $0x5ec] sm:$0xf0] }
 0x457   :  { %v4682_v63 = vor.u32 %v5200_v26, %v4681_v42 }
 0x458   :  { %v3263_v31 = vadd.f32 %v7696_v45, %v2939_v35  ;;  %v5190_v45 = vld [vmem:[%s8669_s2 + $0x5a4] sm:$0xf] }
 0x459   :  { %2668 = vmatmul.bf16.gmra.mxu2 %v4682_v63  ;;  %v4654_v51 = vor.u32 %v5190_v45, %v4651_v20  ;;  %v5209_v20 = vld [vmem:[%s8669_s2 + $0x634] sm:$0xf0] }
 0x45a   :  { %v3587_v60 = vadd.f32 %v7722_v41, %v3263_v31  ;;  %v7818_v46 = vpop.f32.mrf.mxu0 }
 0x45c   :  { %3794 = vst.msk [vmem:[%s8670_s3 + $0x240] sm:$0xff] %vm3721_vm3, %v3587_v60  ;;  %v7834_v23 = vpop.f32.mrf.mxu2  ;;  %v4721_v60 = vld [vmem:[%s8669_s2 + $0x628] sm:$0xf] }
 0x45d   :  { %v2940_v54 = vpop.f32.mrf.mxu3  ;;  %4981 = vmatmul.msk.bf16.gmra.mxu0 %vm2235_vm2, %v4678_v8  ;;  %v7840_v12 = vpop.f32.mrf.mxu1 }
 0x45e   :  { %v2941_v33 = vadd.f32 %v2940_v54, %v7712_v5  ;;  %v4722_v54 = vor.u32 %v5209_v20, %v4721_v60 }
 0x460   :  { %v3265_v7 = vadd.f32 %v7724_v9, %v2941_v33  ;;  %3316 = vmatmul.bf16.gmra.mxu1 %v4690_v30  ;;  %v5207_v33 = vld [vmem:[%s8669_s2 + $0x62c] sm:$0xf] }
 0x462   :  { %v3589_v41 = vadd.f32 %v3588_v21, %v3265_v7  ;;  %2982 = vmatmul.bf16.gmra.mxu3 %v4654_v51  ;;  %v3598_v3 = vpop.f32.mrf.mxu0  ;;  %v4697_v21 = vld [vmem:[%s8669_s2 + $0x600] sm:$0xf]  ;;  %v4723_v51 = vld [vmem:[%s8669_s2 + $0x638] sm:$0xf0] }
 0x464   :  { %3795 = vst.msk [vmem:[%s8670_s3 + $0x248] sm:$0xff] %vm3721_vm3, %v3589_v41  ;;  %v7856_v1 = vpop.f32.mrf.mxu2  ;;  %v4726_v41 = vor.u32 %v5207_v33, %v4723_v51  ;;  %v4731_v33 = vld [vmem:[%s8669_s2 + $0x650] sm:$0xf0] }
 0x465   :  { %v2943_v5 = vpop.f32.mrf.mxu3  ;;  %v7868_v32 = vpop.f32.mrf.mxu1 }
 0x466   :  { %v2944_v9 = vadd.f32 %v2943_v5, %v7738_v2  ;;  %v5204_v2 = vld [vmem:[%s8669_s2 + $0x60c] sm:$0xf0] }
 0x467   :  { %v4698_v22 = vor.u32 %v5204_v2, %v4697_v21 }
 0x468   :  { %v3268_v52 = vadd.f32 %v7744_v6, %v2944_v9  ;;  %v5194_v6 = vld [vmem:[%s8669_s2 + $0x5c4] sm:$0xf] }
 0x469   :  { %2673 = vmatmul.bf16.gmra.mxu2 %v4698_v22  ;;  %v4670_v34 = vor.u32 %v5194_v6, %v4667_v58  ;;  %v5213_v58 = vld [vmem:[%s8669_s2 + $0x654] sm:$0xf0] }
 0x46a   :  { %v3592_v24 = vadd.f32 %v7770_v16, %v3268_v52  ;;  %v7866_v40 = vpop.f32.mrf.mxu0 }
 0x46c   :  { %3796 = vst.msk [vmem:[%s8670_s3 + $0x250] sm:$0xff] %vm3721_vm3, %v3592_v24  ;;  %v7882_v59 = vpop.f32.mrf.mxu2  ;;  %v4737_v24 = vld [vmem:[%s8669_s2 + $0x648] sm:$0xf] }
 0x46d   :  { %v2945_v43 = vpop.f32.mrf.mxu3  ;;  %4982 = vmatmul.msk.bf16.gmra.mxu0 %vm2235_vm2, %v4694_v57  ;;  %v7888_v49 = vpop.f32.mrf.mxu1 }
 0x46e   :  { %v2946_v50 = vadd.f32 %v2945_v43, %v7760_v15  ;;  %v4738_v43 = vor.u32 %v5213_v58, %v4737_v24 }
 0x470   :  { %v3270_v27 = vadd.f32 %v7772_v13, %v2946_v50  ;;  %3321 = vmatmul.bf16.gmra.mxu1 %v4706_v53  ;;  %v5211_v50 = vld [vmem:[%s8669_s2 + $0x64c] sm:$0xf] }
 0x472   :  { %v3594_v16 = vadd.f32 %v3593_v10, %v3270_v27  ;;  %2987 = vmatmul.bf16.gmra.mxu3 %v4670_v34  ;;  %v3603_v44 = vpop.f32.mrf.mxu0  ;;  %v4713_v10 = vld [vmem:[%s8669_s2 + $0x620] sm:$0xf]  ;;  %v4739_v34 = vld [vmem:[%s8669_s2 + $0x658] sm:$0xf0] }
 0x474   :  { %3797 = vst.msk [vmem:[%s8670_s3 + $0x258] sm:$0xff] %vm3721_vm3, %v3594_v16  ;;  %v7904_v28 = vpop.f32.mrf.mxu2  ;;  %v4742_v16 = vor.u32 %v5211_v50, %v4739_v34  ;;  %v4747_v50 = vld [vmem:[%s8669_s2 + $0x670] sm:$0xf0] }
 0x475   :  { %v2948_v15 = vpop.f32.mrf.mxu3  ;;  %v7916_v37 = vpop.f32.mrf.mxu1 }
 0x476   :  { %v2949_v13 = vadd.f32 %v2948_v15, %v7786_v47  ;;  %v5208_v47 = vld [vmem:[%s8669_s2 + $0x62c] sm:$0xf0] }
 0x477   :  { %v4714_v35 = vor.u32 %v5208_v47, %v4713_v10 }
 0x478   :  { %v3273_v38 = vadd.f32 %v7792_v25, %v2949_v13  ;;  %v5198_v25 = vld [vmem:[%s8669_s2 + $0x5e4] sm:$0xf] }
 0x479   :  { %2678 = vmatmul.bf16.gmra.mxu2 %v4714_v35  ;;  %v4686_v8 = vor.u32 %v5198_v25, %v4683_v18  ;;  %v5217_v18 = vld [vmem:[%s8669_s2 + $0x674] sm:$0xf0] }
 0x47a   :  { %v3597_v0 = vadd.f32 %v7818_v46, %v3273_v38  ;;  %v7914_v14 = vpop.f32.mrf.mxu0 }
 0x47c   :  { %3798 = vst.msk [vmem:[%s8670_s3 + $0x260] sm:$0xff] %vm3721_vm3, %v3597_v0  ;;  %v7930_v42 = vpop.f32.mrf.mxu2  ;;  %v4753_v0 = vld [vmem:[%s8669_s2 + $0x668] sm:$0xf] }
 0x47d   :  { %v2950_v19 = vpop.f32.mrf.mxu3  ;;  %4983 = vmatmul.msk.bf16.gmra.mxu0 %vm2235_vm2, %v4710_v61  ;;  %v7936_v45 = vpop.f32.mrf.mxu1 }
 0x47e   :  { %v2951_v31 = vadd.f32 %v2950_v19, %v7808_v17  ;;  %v4754_v19 = vor.u32 %v5217_v18, %v4753_v0 }
 0x480   :  { %v3275_v26 = vadd.f32 %v7820_v29, %v2951_v31  ;;  %3326 = vmatmul.bf16.gmra.mxu1 %v4722_v54  ;;  %v5215_v31 = vld [vmem:[%s8669_s2 + $0x66c] sm:$0xf] }
 0x482   :  { %v3599_v46 = vadd.f32 %v3598_v3, %v3275_v26  ;;  %2992 = vmatmul.bf16.gmra.mxu3 %v4686_v8  ;;  %v3608_v63 = vpop.f32.mrf.mxu0  ;;  %v4729_v3 = vld [vmem:[%s8669_s2 + $0x640] sm:$0xf]  ;;  %v4755_v8 = vld [vmem:[%s8669_s2 + $0x678] sm:$0xf0] }
 0x484   :  { %3799 = vst.msk [vmem:[%s8670_s3 + $0x268] sm:$0xff] %vm3721_vm3, %v3599_v46  ;;  %v7952_v7 = vpop.f32.mrf.mxu2  ;;  %v4758_v46 = vor.u32 %v5215_v31, %v4755_v8  ;;  %v4763_v31 = vld [vmem:[%s8669_s2 + $0x690] sm:$0xf0] }
 0x485   :  { %v2953_v17 = vpop.f32.mrf.mxu3  ;;  %v7964_v5 = vpop.f32.mrf.mxu1 }
 0x486   :  { %v2954_v29 = vadd.f32 %v2953_v17, %v7834_v23  ;;  %v5212_v23 = vld [vmem:[%s8669_s2 + $0x64c] sm:$0xf0] }
 0x487   :  { %v4730_v9 = vor.u32 %v5212_v23, %v4729_v3 }
 0x488   :  { %v3278_v39 = vadd.f32 %v7840_v12, %v2954_v29  ;;  %v5202_v12 = vld [vmem:[%s8669_s2 + $0x604] sm:$0xf] }
 0x489   :  { %2683 = vmatmul.bf16.gmra.mxu2 %v4730_v9  ;;  %v4702_v57 = vor.u32 %v5202_v12, %v4699_v62  ;;  %v5221_v62 = vld [vmem:[%s8669_s2 + $0x694] sm:$0xf0] }
 0x48a   :  { %v3602_v36 = vadd.f32 %v7866_v40, %v3278_v39  ;;  %v7962_v30 = vpop.f32.mrf.mxu0 }
 0x48c   :  { %3800 = vst.msk [vmem:[%s8670_s3 + $0x270] sm:$0xff] %vm3721_vm3, %v3602_v36  ;;  %v7978_v21 = vpop.f32.mrf.mxu2  ;;  %v4769_v36 = vld [vmem:[%s8669_s2 + $0x688] sm:$0xf] }
 0x48d   :  { %v2955_v48 = vpop.f32.mrf.mxu3  ;;  %4984 = vmatmul.msk.bf16.gmra.mxu0 %vm2235_vm2, %v4726_v41  ;;  %v7984_v6 = vpop.f32.mrf.mxu1 }
 0x48e   :  { %v2956_v52 = vadd.f32 %v2955_v48, %v7856_v1  ;;  %v4770_v48 = vor.u32 %v5221_v62, %v4769_v36 }
 0x490   :  { %v3280_v2 = vadd.f32 %v7868_v32, %v2956_v52  ;;  %3331 = vmatmul.bf16.gmra.mxu1 %v4738_v43  ;;  %v5219_v52 = vld [vmem:[%s8669_s2 + $0x68c] sm:$0xf] }
 0x492   :  { %v3604_v40 = vadd.f32 %v3603_v44, %v3280_v2  ;;  %2997 = vmatmul.bf16.gmra.mxu3 %v4702_v57  ;;  %v3613_v22 = vpop.f32.mrf.mxu0  ;;  %v4745_v44 = vld [vmem:[%s8669_s2 + $0x660] sm:$0xf]  ;;  %v4771_v57 = vld [vmem:[%s8669_s2 + $0x698] sm:$0xf0] }
 0x494   :  { %3801 = vst.msk [vmem:[%s8670_s3 + $0x278] sm:$0xff] %vm3721_vm3, %v3604_v40  ;;  %v8000_v27 = vpop.f32.mrf.mxu2  ;;  %v4774_v40 = vor.u32 %v5219_v52, %v4771_v57  ;;  %v4779_v52 = vld [vmem:[%s8669_s2 + $0x6b0] sm:$0xf0] }
 0x495   :  { %v2958_v1 = vpop.f32.mrf.mxu3  ;;  %v8012_v15 = vpop.f32.mrf.mxu1 }
 0x496   :  { %v2959_v32 = vadd.f32 %v2958_v1, %v7882_v59  ;;  %v5216_v59 = vld [vmem:[%s8669_s2 + $0x66c] sm:$0xf0] }
 0x497   :  { %v4746_v13 = vor.u32 %v5216_v59, %v4745_v44 }
 0x498   :  { %v3283_v56 = vadd.f32 %v7888_v49, %v2959_v32  ;;  %v5206_v49 = vld [vmem:[%s8669_s2 + $0x624] sm:$0xf] }
 0x499   :  { %2688 = vmatmul.bf16.gmra.mxu2 %v4746_v13  ;;  %v4718_v61 = vor.u32 %v5206_v49, %v4715_v55  ;;  %v5225_v55 = vld [vmem:[%s8669_s2 + $0x6b4] sm:$0xf0] }
 0x49a   :  { %v3607_v11 = vadd.f32 %v7914_v14, %v3283_v56  ;;  %v8010_v53 = vpop.f32.mrf.mxu0 }
 0x49c   :  { %3802 = vst.msk [vmem:[%s8670_s3 + $0x280] sm:$0xff] %vm3721_vm3, %v3607_v11  ;;  %v8026_v10 = vpop.f32.mrf.mxu2  ;;  %v4785_v11 = vld [vmem:[%s8669_s2 + $0x6a8] sm:$0xf] }
 0x49d   :  { %v2960_v4 = vpop.f32.mrf.mxu3  ;;  %4985 = vmatmul.msk.bf16.gmra.mxu0 %vm2235_vm2, %v4742_v16  ;;  %v8032_v25 = vpop.f32.mrf.mxu1 }
 0x49e   :  { %v2961_v38 = vadd.f32 %v2960_v4, %v7904_v28  ;;  %v4786_v4 = vor.u32 %v5225_v55, %v4785_v11 }
 0x4a0   :  { %v3285_v47 = vadd.f32 %v7916_v37, %v2961_v38  ;;  %3336 = vmatmul.bf16.gmra.mxu1 %v4754_v19  ;;  %v5223_v38 = vld [vmem:[%s8669_s2 + $0x6ac] sm:$0xf] }
 0x4a2   :  { %v3609_v14 = vadd.f32 %v3608_v63, %v3285_v47  ;;  %3002 = vmatmul.bf16.gmra.mxu3 %v4718_v61  ;;  %v3618_v35 = vpop.f32.mrf.mxu0  ;;  %v4761_v63 = vld [vmem:[%s8669_s2 + $0x680] sm:$0xf]  ;;  %v4787_v61 = vld [vmem:[%s8669_s2 + $0x6b8] sm:$0xf0] }
 0x4a4   :  { %3803 = vst.msk [vmem:[%s8670_s3 + $0x288] sm:$0xff] %vm3721_vm3, %v3609_v14  ;;  %v8048_v26 = vpop.f32.mrf.mxu2  ;;  %v4790_v14 = vor.u32 %v5223_v38, %v4787_v61  ;;  %v4795_v38 = vld [vmem:[%s8669_s2 + $0x6d0] sm:$0xf0] }
 0x4a5   :  { %v2963_v28 = vpop.f32.mrf.mxu3  ;;  %v8060_v17 = vpop.f32.mrf.mxu1 }
 0x4a6   :  { %v2964_v37 = vadd.f32 %v2963_v28, %v7930_v42  ;;  %v5220_v42 = vld [vmem:[%s8669_s2 + $0x68c] sm:$0xf0] }
 0x4a7   :  { %v4762_v29 = vor.u32 %v5220_v42, %v4761_v63 }
 0x4a8   :  { %v3288_v60 = vadd.f32 %v7936_v45, %v2964_v37  ;;  %v5210_v45 = vld [vmem:[%s8669_s2 + $0x644] sm:$0xf] }
 0x4a9   :  { %2693 = vmatmul.bf16.gmra.mxu2 %v4762_v29  ;;  %v4734_v41 = vor.u32 %v5210_v45, %v4731_v33  ;;  %v5229_v33 = vld [vmem:[%s8669_s2 + $0x6d4] sm:$0xf0] }
 0x4aa   :  { %v3612_v20 = vadd.f32 %v7962_v30, %v3288_v60  ;;  %v8058_v54 = vpop.f32.mrf.mxu0 }
 0x4ac   :  { %3804 = vst.msk [vmem:[%s8670_s3 + $0x290] sm:$0xff] %vm3721_vm3, %v3612_v20  ;;  %v8074_v3 = vpop.f32.mrf.mxu2  ;;  %v4801_v20 = vld [vmem:[%s8669_s2 + $0x6c8] sm:$0xf] }
 0x4ad   :  { %v2965_v51 = vpop.f32.mrf.mxu3  ;;  %4986 = vmatmul.msk.bf16.gmra.mxu0 %vm2235_vm2, %v4758_v46  ;;  %v8080_v12 = vpop.f32.mrf.mxu1 }
 0x4ae   :  { %v2966_v39 = vadd.f32 %v2965_v51, %v7952_v7  ;;  %v4802_v51 = vor.u32 %v5229_v33, %v4801_v20 }
 0x4b0   :  { %v3290_v23 = vadd.f32 %v7964_v5, %v2966_v39  ;;  %3341 = vmatmul.bf16.gmra.mxu1 %v4770_v48  ;;  %v5227_v39 = vld [vmem:[%s8669_s2 + $0x6cc] sm:$0xf] }
 0x4b2   :  { %v3614_v30 = vadd.f32 %v3613_v22, %v3290_v23  ;;  %3007 = vmatmul.bf16.gmra.mxu3 %v4734_v41  ;;  %v3623_v9 = vpop.f32.mrf.mxu0  ;;  %v4777_v22 = vld [vmem:[%s8669_s2 + $0x6a0] sm:$0xf]  ;;  %v4803_v41 = vld [vmem:[%s8669_s2 + $0x6d8] sm:$0xf0] }
 0x4b4   :  { %3805 = vst.msk [vmem:[%s8670_s3 + $0x298] sm:$0xff] %vm3721_vm3, %v3614_v30  ;;  %v8096_v2 = vpop.f32.mrf.mxu2  ;;  %v4806_v30 = vor.u32 %v5227_v39, %v4803_v41  ;;  %v4811_v39 = vld [vmem:[%s8669_s2 + $0x6f0] sm:$0xf0] }
 0x4b5   :  { %v2968_v7 = vpop.f32.mrf.mxu3  ;;  %v8108_v1 = vpop.f32.mrf.mxu1 }
 0x4b6   :  { %v2969_v5 = vadd.f32 %v2968_v7, %v7978_v21  ;;  %v5224_v21 = vld [vmem:[%s8669_s2 + $0x6ac] sm:$0xf0] }
 0x4b7   :  { %v4778_v32 = vor.u32 %v5224_v21, %v4777_v22 }
 0x4b8   :  { %v3293_v24 = vadd.f32 %v7984_v6, %v2969_v5  ;;  %v5214_v6 = vld [vmem:[%s8669_s2 + $0x664] sm:$0xf] }
 0x4b9   :  { %2698 = vmatmul.bf16.gmra.mxu2 %v4778_v32  ;;  %v4750_v16 = vor.u32 %v5214_v6, %v4747_v50  ;;  %v5233_v50 = vld [vmem:[%s8669_s2 + $0x6f4] sm:$0xf0] }
 0x4ba   :  { %v3617_v58 = vadd.f32 %v8010_v53, %v3293_v24  ;;  %v8106_v43 = vpop.f32.mrf.mxu0 }
 0x4bc   :  { %3806 = vst.msk [vmem:[%s8670_s3 + $0x2a0] sm:$0xff] %vm3721_vm3, %v3617_v58  ;;  %v8122_v44 = vpop.f32.mrf.mxu2  ;;  %v4817_v58 = vld [vmem:[%s8669_s2 + $0x6e8] sm:$0xf] }
 0x4bd   :  { %v2970_v34 = vpop.f32.mrf.mxu3  ;;  %4987 = vmatmul.msk.bf16.gmra.mxu0 %vm2235_vm2, %v4774_v40  ;;  %v8128_v49 = vpop.f32.mrf.mxu1 }
 0x4be   :  { %v2971_v56 = vadd.f32 %v2970_v34, %v8000_v27  ;;  %v4818_v34 = vor.u32 %v5233_v50, %v4817_v58 }
 0x4c0   :  { %v3295_v59 = vadd.f32 %v8012_v15, %v2971_v56  ;;  %3346 = vmatmul.bf16.gmra.mxu1 %v4786_v4  ;;  %v5231_v56 = vld [vmem:[%s8669_s2 + $0x6ec] sm:$0xf] }
 0x4c2   :  { %v3619_v53 = vadd.f32 %v3618_v35, %v3295_v59  ;;  %3012 = vmatmul.bf16.gmra.mxu3 %v4750_v16  ;;  %v3628_v13 = vpop.f32.mrf.mxu0  ;;  %v4793_v35 = vld [vmem:[%s8669_s2 + $0x6c0] sm:$0xf]  ;;  %v4819_v16 = vld [vmem:[%s8669_s2 + $0x6f8] sm:$0xf0] }
 0x4c4   :  { %3807 = vst.msk [vmem:[%s8670_s3 + $0x2a8] sm:$0xff] %vm3721_vm3, %v3619_v53  ;;  %v8144_v47 = vpop.f32.mrf.mxu2  ;;  %v4822_v53 = vor.u32 %v5231_v56, %v4819_v16  ;;  %v4827_v56 = vld [vmem:[%s8669_s2 + $0x710] sm:$0xf0] }
 0x4c5   :  { %v2973_v27 = vpop.f32.mrf.mxu3  ;;  %v8156_v28 = vpop.f32.mrf.mxu1 }
 0x4c6   :  { %v2974_v15 = vadd.f32 %v2973_v27, %v8026_v10  ;;  %v5228_v10 = vld [vmem:[%s8669_s2 + $0x6cc] sm:$0xf0] }
 0x4c7   :  { %v4794_v37 = vor.u32 %v5228_v10, %v4793_v35 }
 0x4c8   :  { %v3298_v0 = vadd.f32 %v8032_v25, %v2974_v15  ;;  %v5218_v25 = vld [vmem:[%s8669_s2 + $0x684] sm:$0xf] }
 0x4c9   :  { %2703 = vmatmul.bf16.gmra.mxu2 %v4794_v37  ;;  %v4766_v46 = vor.u32 %v5218_v25, %v4763_v31  ;;  %v5237_v31 = vld [vmem:[%s8669_s2 + $0x714] sm:$0xf0] }
 0x4ca   :  { %v3622_v18 = vadd.f32 %v8058_v54, %v3298_v0  ;;  %v8154_v19 = vpop.f32.mrf.mxu0 }
 0x4cc   :  { %3808 = vst.msk [vmem:[%s8670_s3 + $0x2b0] sm:$0xff] %vm3721_vm3, %v3622_v18  ;;  %v8170_v63 = vpop.f32.mrf.mxu2  ;;  %v4833_v18 = vld [vmem:[%s8669_s2 + $0x708] sm:$0xf] }
 0x4cd   :  { %v2975_v8 = vpop.f32.mrf.mxu3  ;;  %4988 = vmatmul.msk.bf16.gmra.mxu0 %vm2235_vm2, %v4790_v14  ;;  %v8176_v45 = vpop.f32.mrf.mxu1 }
 0x4ce   :  { %v2976_v60 = vadd.f32 %v2975_v8, %v8048_v26  ;;  %v4834_v8 = vor.u32 %v5237_v31, %v4833_v18 }
 0x4d0   :  { %v3300_v42 = vadd.f32 %v8060_v17, %v2976_v60  ;;  %3351 = vmatmul.bf16.gmra.mxu1 %v4802_v51  ;;  %v5235_v60 = vld [vmem:[%s8669_s2 + $0x70c] sm:$0xf] }
 0x4d2   :  { %v3624_v54 = vadd.f32 %v3623_v9, %v3300_v42  ;;  %3017 = vmatmul.bf16.gmra.mxu3 %v4766_v46  ;;  %v3633_v29 = vpop.f32.mrf.mxu0  ;;  %v4809_v9 = vld [vmem:[%s8669_s2 + $0x6e0] sm:$0xf]  ;;  %v4835_v46 = vld [vmem:[%s8669_s2 + $0x718] sm:$0xf0] }
 0x4d4   :  { %3809 = vst.msk [vmem:[%s8670_s3 + $0x2b8] sm:$0xff] %vm3721_vm3, %v3624_v54  ;;  %v8192_v23 = vpop.f32.mrf.mxu2  ;;  %v4838_v54 = vor.u32 %v5235_v60, %v4835_v46  ;;  %v4843_v60 = vld [vmem:[%s8669_s2 + $0x730] sm:$0xf0] }
 0x4d5   :  { %v2978_v26 = vpop.f32.mrf.mxu3  ;;  %v8204_v7 = vpop.f32.mrf.mxu1 }
 0x4d6   :  { %v2979_v17 = vadd.f32 %v2978_v26, %v8074_v3  ;;  %v5232_v3 = vld [vmem:[%s8669_s2 + $0x6ec] sm:$0xf0] }
 0x4d7   :  { %v4810_v5 = vor.u32 %v5232_v3, %v4809_v9 }
 0x4d8   :  { %v3303_v36 = vadd.f32 %v8080_v12, %v2979_v17  ;;  %v5222_v12 = vld [vmem:[%s8669_s2 + $0x6a4] sm:$0xf] }
 0x4d9   :  { %2708 = vmatmul.bf16.gmra.mxu2 %v4810_v5  ;;  %v4782_v40 = vor.u32 %v5222_v12, %v4779_v52  ;;  %v5241_v52 = vld [vmem:[%s8669_s2 + $0x734] sm:$0xf0] }
 0x4da   :  { %v3627_v62 = vadd.f32 %v8106_v43, %v3303_v36  ;;  %v8202_v48 = vpop.f32.mrf.mxu0 }
 0x4dc   :  { %3810 = vst.msk [vmem:[%s8670_s3 + $0x2c0] sm:$0xff] %vm3721_vm3, %v3627_v62  ;;  %v8218_v22 = vpop.f32.mrf.mxu2  ;;  %v4849_v62 = vld [vmem:[%s8669_s2 + $0x728] sm:$0xf] }
 0x4dd   :  { %v2980_v57 = vpop.f32.mrf.mxu3  ;;  %4989 = vmatmul.msk.bf16.gmra.mxu0 %vm2235_vm2, %v4806_v30  ;;  %v8224_v6 = vpop.f32.mrf.mxu1 }
 0x4de   :  { %v2981_v24 = vadd.f32 %v2980_v57, %v8096_v2  ;;  %v4850_v57 = vor.u32 %v5241_v52, %v4849_v62 }
 0x4e0   :  { %v3305_v21 = vadd.f32 %v8108_v1, %v2981_v24  ;;  %3356 = vmatmul.bf16.gmra.mxu1 %v4818_v34  ;;  %v5239_v24 = vld [vmem:[%s8669_s2 + $0x72c] sm:$0xf] }
 0x4e2   :  { %v3629_v43 = vadd.f32 %v3628_v13, %v3305_v21  ;;  %3022 = vmatmul.bf16.gmra.mxu3 %v4782_v40  ;;  %v3638_v32 = vpop.f32.mrf.mxu0  ;;  %v4825_v13 = vld [vmem:[%s8669_s2 + $0x700] sm:$0xf]  ;;  %v4851_v40 = vld [vmem:[%s8669_s2 + $0x738] sm:$0xf0] }
 0x4e4   :  { %3811 = vst.msk [vmem:[%s8670_s3 + $0x2c8] sm:$0xff] %vm3721_vm3, %v3629_v43  ;;  %v8240_v59 = vpop.f32.mrf.mxu2  ;;  %v4854_v43 = vor.u32 %v5239_v24, %v4851_v40  ;;  %v4859_v24 = vld [vmem:[%s8669_s2 + $0x750] sm:$0xf0] }
 0x4e5   :  { %v2983_v2 = vpop.f32.mrf.mxu3  ;;  %v8252_v27 = vpop.f32.mrf.mxu1 }
 0x4e6   :  { %v2984_v1 = vadd.f32 %v2983_v2, %v8122_v44  ;;  %v5236_v44 = vld [vmem:[%s8669_s2 + $0x70c] sm:$0xf0] }
 0x4e7   :  { %v4826_v15 = vor.u32 %v5236_v44, %v4825_v13 }
 0x4e8   :  { %v3308_v11 = vadd.f32 %v8128_v49, %v2984_v1  ;;  %v5226_v49 = vld [vmem:[%s8669_s2 + $0x6c4] sm:$0xf] }
 0x4e9   :  { %2713 = vmatmul.bf16.gmra.mxu2 %v4826_v15  ;;  %v4798_v14 = vor.u32 %v5226_v49, %v4795_v38  ;;  %v5245_v38 = vld [vmem:[%s8669_s2 + $0x754] sm:$0xf0] }
 0x4ea   :  { %v3632_v55 = vadd.f32 %v8154_v19, %v3308_v11  ;;  %v8250_v4 = vpop.f32.mrf.mxu0 }
 0x4ec   :  { %3812 = vst.msk [vmem:[%s8670_s3 + $0x2d0] sm:$0xff] %vm3721_vm3, %v3632_v55  ;;  %v8266_v35 = vpop.f32.mrf.mxu2  ;;  %v4865_v55 = vld [vmem:[%s8669_s2 + $0x748] sm:$0xf] }
 0x4ed   :  { %v2985_v61 = vpop.f32.mrf.mxu3  ;;  %4990 = vmatmul.msk.bf16.gmra.mxu0 %vm2235_vm2, %v4822_v53  ;;  %v8272_v25 = vpop.f32.mrf.mxu1 }
 0x4ee   :  { %v2986_v0 = vadd.f32 %v2985_v61, %v8144_v47  ;;  %v4866_v61 = vor.u32 %v5245_v38, %v4865_v55 }
 0x4f0   :  { %v3310_v10 = vadd.f32 %v8156_v28, %v2986_v0  ;;  %3361 = vmatmul.bf16.gmra.mxu1 %v4834_v8  ;;  %v5243_v0 = vld [vmem:[%s8669_s2 + $0x74c] sm:$0xf] }
 0x4f2   :  { %v3634_v19 = vadd.f32 %v3633_v29, %v3310_v10  ;;  %3027 = vmatmul.bf16.gmra.mxu3 %v4798_v14  ;;  %v3643_v37 = vpop.f32.mrf.mxu0  ;;  %v4841_v29 = vld [vmem:[%s8669_s2 + $0x720] sm:$0xf]  ;;  %v4867_v14 = vld [vmem:[%s8669_s2 + $0x758] sm:$0xf0] }
 0x4f4   :  { %3813 = vst.msk [vmem:[%s8670_s3 + $0x2d8] sm:$0xff] %vm3721_vm3, %v3634_v19  ;;  %v8288_v42 = vpop.f32.mrf.mxu2  ;;  %v4870_v19 = vor.u32 %v5243_v0, %v4867_v14  ;;  %v5246_v0 = vld [vmem:[%s8669_s2 + $0x764] sm:$0xf] }
 0x4f5   :  { %v2988_v47 = vpop.f32.mrf.mxu3  ;;  %v8300_v26 = vpop.f32.mrf.mxu1 }
 0x4f6   :  { %v2989_v28 = vadd.f32 %v2988_v47, %v8170_v63  ;;  %v5240_v63 = vld [vmem:[%s8669_s2 + $0x72c] sm:$0xf0] }
 0x4f7   :  { %v4842_v17 = vor.u32 %v5240_v63, %v4841_v29 }
 0x4f8   :  { %v3313_v20 = vadd.f32 %v8176_v45, %v2989_v28  ;;  %v5230_v45 = vld [vmem:[%s8669_s2 + $0x6e4] sm:$0xf] }
 0x4f9   :  { %2718 = vmatmul.bf16.gmra.mxu2 %v4842_v17  ;;  %v4814_v30 = vor.u32 %v5230_v45, %v4811_v39  ;;  %v5249_v39 = vld [vmem:[%s8669_s2 + $0x774] sm:$0xf0] }
 0x4fa   :  { %v3637_v33 = vadd.f32 %v8202_v48, %v3313_v20  ;;  %v8298_v51 = vpop.f32.mrf.mxu0 }
 0x4fc   :  { %3814 = vst.msk [vmem:[%s8670_s3 + $0x2e0] sm:$0xff] %vm3721_vm3, %v3637_v33  ;;  %v8314_v9 = vpop.f32.mrf.mxu2  ;;  %v4881_v33 = vld [vmem:[%s8669_s2 + $0x768] sm:$0xf] }
 0x4fd   :  { %v2990_v41 = vpop.f32.mrf.mxu3  ;;  %4991 = vmatmul.msk.bf16.gmra.mxu0 %vm2235_vm2, %v4838_v54  ;;  %v8320_v12 = vpop.f32.mrf.mxu1 }
 0x4fe   :  { %v2991_v36 = vadd.f32 %v2990_v41, %v8192_v23  ;;  %v4882_v41 = vor.u32 %v5249_v39, %v4881_v33 }
 0x500   :  { %v3315_v3 = vadd.f32 %v8204_v7, %v2991_v36  ;;  %3366 = vmatmul.bf16.gmra.mxu1 %v4850_v57  ;;  %v5247_v36 = vld [vmem:[%s8669_s2 + $0x76c] sm:$0xf] }
 0x502   :  { %v3639_v48 = vadd.f32 %v3638_v32, %v3315_v3  ;;  %3032 = vmatmul.bf16.gmra.mxu3 %v4814_v30  ;;  %v3648_v5 = vpop.f32.mrf.mxu0  ;;  %v4857_v32 = vld [vmem:[%s8669_s2 + $0x740] sm:$0xf]  ;;  %v4883_v30 = vld [vmem:[%s8669_s2 + $0x778] sm:$0xf0] }
 0x504   :  { %3815 = vst.msk [vmem:[%s8670_s3 + $0x2e8] sm:$0xff] %vm3721_vm3, %v3639_v48  ;;  %v8336_v21 = vpop.f32.mrf.mxu2  ;;  %v4886_v48 = vor.u32 %v5247_v36, %v4883_v30 }
 0x505   :  { %v2993_v23 = vpop.f32.mrf.mxu3  ;;  %v8348_v2 = vpop.f32.mrf.mxu1 }
 0x506   :  { %v2994_v7 = vadd.f32 %v2993_v23, %v8218_v22  ;;  %v5244_v22 = vld [vmem:[%s8669_s2 + $0x74c] sm:$0xf0] }
 0x507   :  { %v4858_v1 = vor.u32 %v5244_v22, %v4857_v32 }
 0x508   :  { %v3318_v58 = vadd.f32 %v8224_v6, %v2994_v7  ;;  %v5234_v6 = vld [vmem:[%s8669_s2 + $0x704] sm:$0xf] }
 0x509   :  { %2723 = vmatmul.bf16.gmra.mxu2 %v4858_v1  ;;  %v4830_v53 = vor.u32 %v5234_v6, %v4827_v56  ;;  %v5253_v56 = vld [vmem:[%s8669_s2 + $0x794] sm:$0xf0] }
 0x50a   :  { %v3642_v50 = vadd.f32 %v8250_v4, %v3318_v58  ;;  %v8346_v34 = vpop.f32.mrf.mxu0 }
 0x50c   :  { %3816 = vst.msk [vmem:[%s8670_s3 + $0x2f0] sm:$0xff] %vm3721_vm3, %v3642_v50  ;;  %v8362_v13 = vpop.f32.mrf.mxu2  ;;  %v4897_v50 = vld [vmem:[%s8669_s2 + $0x788] sm:$0xf] }
 0x50d   :  { %v2995_v16 = vpop.f32.mrf.mxu3  ;;  %4992 = vmatmul.msk.bf16.gmra.mxu0 %vm2235_vm2, %v4854_v43  ;;  %v8368_v49 = vpop.f32.mrf.mxu1 }
 0x50e   :  { %v2996_v11 = vadd.f32 %v2995_v16, %v8240_v59  ;;  %v4898_v16 = vor.u32 %v5253_v56, %v4897_v50  ;;  %v5254_v56 = vld [vmem:[%s8669_s2 + $0x7a4] sm:$0xf] }
 0x510   :  { %v3320_v44 = vadd.f32 %v8252_v27, %v2996_v11  ;;  %3371 = vmatmul.bf16.gmra.mxu1 %v4866_v61  ;;  %v5251_v11 = vld [vmem:[%s8669_s2 + $0x78c] sm:$0xf] }
 0x512   :  { %v3644_v4 = vadd.f32 %v3643_v37, %v3320_v44  ;;  %3037 = vmatmul.bf16.gmra.mxu3 %v4830_v53  ;;  %v3653_v15 = vpop.f32.mrf.mxu0  ;;  %v4873_v37 = vld [vmem:[%s8669_s2 + $0x760] sm:$0xf]  ;;  %v4899_v53 = vld [vmem:[%s8669_s2 + $0x798] sm:$0xf0] }
 0x514   :  { %3817 = vst.msk [vmem:[%s8670_s3 + $0x2f8] sm:$0xff] %vm3721_vm3, %v3644_v4  ;;  %v8384_v10 = vpop.f32.mrf.mxu2  ;;  %v4902_v4 = vor.u32 %v5251_v11, %v4899_v53 }
 0x515   :  { %v2998_v59 = vpop.f32.mrf.mxu3  ;;  %v8396_v47 = vpop.f32.mrf.mxu1 }
 0x516   :  { %v2999_v27 = vadd.f32 %v2998_v59, %v8266_v35  ;;  %v5248_v35 = vld [vmem:[%s8669_s2 + $0x76c] sm:$0xf0] }
 0x517   :  { %v4874_v28 = vor.u32 %v5248_v35, %v4873_v37 }
 0x518   :  { %v3323_v18 = vadd.f32 %v8272_v25, %v2999_v27  ;;  %v5238_v25 = vld [vmem:[%s8669_s2 + $0x724] sm:$0xf] }
 0x519   :  { %2728 = vmatmul.bf16.gmra.mxu2 %v4874_v28  ;;  %v4846_v54 = vor.u32 %v5238_v25, %v4843_v60  ;;  %v5257_v60 = vld [vmem:[%s8669_s2 + $0x7b4] sm:$0xf0] }
 0x51a   :  { %v3647_v31 = vadd.f32 %v8298_v51, %v3323_v18  ;;  %v8394_v8 = vpop.f32.mrf.mxu0 }
 0x51c   :  { %3818 = vst.msk [vmem:[%s8670_s3 + $0x300] sm:$0xff] %vm3721_vm3, %v3647_v31  ;;  %v8410_v29 = vpop.f32.mrf.mxu2  ;;  %v4913_v31 = vld [vmem:[%s8669_s2 + $0x7a8] sm:$0xf] }
 0x51d   :  { %v3000_v46 = vpop.f32.mrf.mxu3  ;;  %4993 = vmatmul.msk.bf16.gmra.mxu0 %vm2235_vm2, %v4870_v19  ;;  %v8416_v45 = vpop.f32.mrf.mxu1 }
 0x51e   :  { %v3001_v20 = vadd.f32 %v3000_v46, %v8288_v42  ;;  %v4914_v46 = vor.u32 %v5257_v60, %v4913_v31 }
 0x520   :  { %v3325_v63 = vadd.f32 %v8300_v26, %v3001_v20  ;;  %3376 = vmatmul.bf16.gmra.mxu1 %v4882_v41  ;;  %v5255_v20 = vld [vmem:[%s8669_s2 + $0x7ac] sm:$0xf] }
 0x522   :  { %v3649_v51 = vadd.f32 %v3648_v5, %v3325_v63  ;;  %3042 = vmatmul.bf16.gmra.mxu3 %v4846_v54  ;;  %v3658_v17 = vpop.f32.mrf.mxu0  ;;  %v4889_v5 = vld [vmem:[%s8669_s2 + $0x780] sm:$0xf]  ;;  %v4915_v54 = vld [vmem:[%s8669_s2 + $0x7b8] sm:$0xf0] }
 0x523   :  { %v4918_v33 = vor.u32 %v5255_v20, %v4915_v54 }
 0x524   :  { %3819 = vst.msk [vmem:[%s8670_s3 + $0x308] sm:$0xff] %vm3721_vm3, %v3649_v51  ;;  %v8432_v3 = vpop.f32.mrf.mxu2 }
 0x525   :  { %v3003_v42 = vpop.f32.mrf.mxu3  ;;  %v8444_v23 = vpop.f32.mrf.mxu1 }
 0x526   :  { %v3004_v26 = vadd.f32 %v3003_v42, %v8314_v9  ;;  %v5252_v9 = vld [vmem:[%s8669_s2 + $0x78c] sm:$0xf0] }
 0x527   :  { %v4890_v7 = vor.u32 %v5252_v9, %v4889_v5  ;;  %v4929_v9 = vld [vmem:[%s8669_s2 + $0x7c8] sm:$0xf] }
 0x528   :  { %v3328_v62 = vadd.f32 %v8320_v12, %v3004_v26  ;;  %v5242_v12 = vld [vmem:[%s8669_s2 + $0x744] sm:$0xf] }
 0x529   :  { %2733 = vmatmul.bf16.gmra.mxu2 %v4890_v7  ;;  %v4862_v43 = vor.u32 %v5242_v12, %v4859_v24  ;;  %v5250_v26 = vld [vmem:[%s8669_s2 + $0x784] sm:$0xf]  ;;  %v5261_v7 = vld [vmem:[%s8669_s2 + $0x7d4] sm:$0xf0] }
 0x52a   :  { %v3652_v52 = vadd.f32 %v8346_v34, %v3328_v62  ;;  %v8442_v57 = vpop.f32.mrf.mxu0  ;;  %v4930_v24 = vor.u32 %v5261_v7, %v4929_v9 }
 0x52c   :  { %3820 = vst.msk [vmem:[%s8670_s3 + $0x310] sm:$0xff] %vm3721_vm3, %v3652_v52  ;;  %v8458_v32 = vpop.f32.mrf.mxu2 }
 0x52d   :  { %v3005_v40 = vpop.f32.mrf.mxu3  ;;  %4994 = vmatmul.msk.bf16.gmra.mxu0 %vm2235_vm2, %v4886_v48  ;;  %v8464_v6 = vpop.f32.mrf.mxu1 }
 0x52e   :  { %v3006_v58 = vadd.f32 %v3005_v40, %v8336_v21 }
 0x530   :  { %v3330_v22 = vadd.f32 %v8348_v2, %v3006_v58  ;;  %3381 = vmatmul.bf16.gmra.mxu1 %v4898_v16  ;;  %v5259_v58 = vld [vmem:[%s8669_s2 + $0x7cc] sm:$0xf] }
 0x532   :  { %v3654_v34 = vadd.f32 %v3653_v15, %v3330_v22  ;;  %3047 = vmatmul.bf16.gmra.mxu3 %v4862_v43  ;;  %v3663_v1 = vpop.f32.mrf.mxu0  ;;  %v4905_v15 = vld [vmem:[%s8669_s2 + $0x7a0] sm:$0xf]  ;;  %v4931_v43 = vld [vmem:[%s8669_s2 + $0x7d8] sm:$0xf0] }
 0x533   :  { %v4934_v50 = vor.u32 %v5259_v58, %v4931_v43 }
 0x534   :  { %3821 = vst.msk [vmem:[%s8670_s3 + $0x318] sm:$0xff] %vm3721_vm3, %v3654_v34  ;;  %v8480_v44 = vpop.f32.mrf.mxu2 }
 0x535   :  { %v3008_v21 = vpop.f32.mrf.mxu3  ;;  %v8490_v59 = vpop.f32.mrf.mxu1 }
 0x536   :  { %v3009_v2 = vadd.f32 %v3008_v21, %v8362_v13  ;;  %v5256_v13 = vld [vmem:[%s8669_s2 + $0x7ac] sm:$0xf0] }
 0x537   :  { %v4906_v27 = vor.u32 %v5256_v13, %v4905_v15 }
 0x538   :  { %v3333_v55 = vadd.f32 %v8368_v49, %v3009_v2  ;;  %v4875_v49 = vld [vmem:[%s8669_s2 + $0x770] sm:$0xf0] }
 0x539   :  { %2738 = vmatmul.bf16.gmra.mxu2 %v4906_v27  ;;  %v4878_v19 = vor.u32 %v5246_v0, %v4875_v49 }
 0x53a   :  { %v3657_v38 = vadd.f32 %v8394_v8, %v3333_v55  ;;  %v3666_v61 = vpop.f32.mrf.mxu0 }
 0x53c   :  { %3822 = vst.msk [vmem:[%s8670_s3 + $0x320] sm:$0xff] %vm3721_vm3, %v3657_v38  ;;  %v8504_v37 = vpop.f32.mrf.mxu2 }
 0x53d   :  { %v3010_v14 = vpop.f32.mrf.mxu3  ;;  %4995 = vmatmul.msk.bf16.gmra.mxu0 %vm2235_vm2, %v4902_v4  ;;  %v3347_v25 = vpop.f32.mrf.mxu1 }
 0x53e   :  { %v3011_v18 = vadd.f32 %v3010_v14, %v8384_v10 }
 0x540   :  { %v3335_v35 = vadd.f32 %v8396_v47, %v3011_v18  ;;  %3386 = vmatmul.bf16.gmra.mxu1 %v4914_v46 }
 0x542   :  { %v3659_v8 = vadd.f32 %v3658_v17, %v3335_v35  ;;  %3052 = vmatmul.bf16.gmra.mxu3 %v4878_v19  ;;  %v3668_v28 = vpop.f32.mrf.mxu0  ;;  %v4921_v17 = vld [vmem:[%s8669_s2 + $0x7c0] sm:$0xf] }
 0x544   :  { %3823 = vst.msk [vmem:[%s8670_s3 + $0x328] sm:$0xff] %vm3721_vm3, %v3659_v8  ;;  %v2701_v51 = vpop.f32.mrf.mxu2 }
 0x545   :  { %v3013_v10 = vpop.f32.mrf.mxu3  ;;  %v3349_v36 = vpop.f32.mrf.mxu1 }
 0x546   :  { %v3014_v47 = vadd.f32 %v3013_v10, %v8410_v29  ;;  %v5260_v29 = vld [vmem:[%s8669_s2 + $0x7cc] sm:$0xf0] }
 0x547   :  { %v4922_v42 = vor.u32 %v5260_v29, %v4921_v17 }
 0x548   :  { %v3338_v63 = vadd.f32 %v8416_v45, %v3014_v47  ;;  %v4891_v45 = vld [vmem:[%s8669_s2 + $0x790] sm:$0xf0] }
 0x549   :  { %2743 = vmatmul.bf16.gmra.mxu2 %v4922_v42  ;;  %v4894_v48 = vor.u32 %v5250_v26, %v4891_v45 }
 0x54a   :  { %v3662_v39 = vadd.f32 %v8442_v57, %v3338_v63  ;;  %v3671_v41 = vpop.f32.mrf.mxu0 }
 0x54c   :  { %3824 = vst.msk [vmem:[%s8670_s3 + $0x330] sm:$0xff] %vm3721_vm3, %v3662_v39  ;;  %v2704_v12 = vpop.f32.mrf.mxu2 }
 0x54d   :  { %v3015_v30 = vpop.f32.mrf.mxu3  ;;  %4996 = vmatmul.msk.bf16.gmra.mxu0 %vm2235_vm2, %v4918_v33 }
 0x54e   :  { %v3016_v62 = vadd.f32 %v3015_v30, %v8432_v3 }
 0x550   :  { %v3340_v5 = vadd.f32 %v8444_v23, %v3016_v62  ;;  %v3352_v23 = vpop.f32.mrf.mxu1  ;;  %3391 = vmatmul.bf16.gmra.mxu1 %v4930_v24 }
 0x552   :  { %v3664_v52 = vadd.f32 %v3663_v1, %v3340_v5  ;;  %3057 = vmatmul.bf16.gmra.mxu3 %v4894_v48  ;;  %v3673_v57 = vpop.f32.mrf.mxu0 }
 0x554   :  { %3825 = vst.msk [vmem:[%s8670_s3 + $0x338] sm:$0xff] %vm3721_vm3, %v3664_v52 }
 0x555   :  { %v3018_v3 = vpop.f32.mrf.mxu3 }
 0x556   :  { %v3019_v40 = vadd.f32 %v3018_v3, %v8458_v32  ;;  %v4907_v32 = vld [vmem:[%s8669_s2 + $0x7b0] sm:$0xf0] }
 0x557   :  { %v4910_v2 = vor.u32 %v5254_v56, %v4907_v32 }
 0x558   :  { %v3343_v22 = vadd.f32 %v8464_v6, %v3019_v40  ;;  %v2706_v6 = vpop.f32.mrf.mxu2  ;;  %v3354_v11 = vpop.f32.mrf.mxu1 }
 0x55a   :  { %v3667_v34 = vadd.f32 %v3666_v61, %v3343_v22  ;;  %v3676_v1 = vpop.f32.mrf.mxu0 }
 0x55c   :  { %3826 = vst.msk [vmem:[%s8670_s3 + $0x340] sm:$0xff] %vm3721_vm3, %v3667_v34 }
 0x55d   :  { %v3020_v16 = vpop.f32.mrf.mxu3  ;;  %4997 = vmatmul.msk.bf16.gmra.mxu0 %vm2235_vm2, %v4934_v50 }
 0x55e   :  { %v3021_v21 = vadd.f32 %v3020_v16, %v8480_v44  ;;  %v5258_v44 = vld [vmem:[%s8669_s2 + $0x7c4] sm:$0xf] }
 0x560   :  { %v3345_v53 = vadd.f32 %v8490_v59, %v3021_v21  ;;  %v2709_v38 = vpop.f32.mrf.mxu2  ;;  %v3357_v27 = vpop.f32.mrf.mxu1  ;;  %v4923_v59 = vld [vmem:[%s8669_s2 + $0x7d0] sm:$0xf0] }
 0x561   :  { %v4926_v19 = vor.u32 %v5258_v44, %v4923_v59 }
 0x562   :  { %v3669_v55 = vadd.f32 %v3668_v28, %v3345_v53  ;;  %3062 = vmatmul.bf16.gmra.mxu3 %v4910_v2  ;;  %v3678_v4 = vpop.f32.mrf.mxu0 }
 0x564   :  { %3827 = vst.msk [vmem:[%s8670_s3 + $0x348] sm:$0xff] %vm3721_vm3, %v3669_v55 }
 0x565   :  { %v3023_v15 = vpop.f32.mrf.mxu3 }
 0x566   :  { %v3024_v13 = vadd.f32 %v3023_v15, %v8504_v37 }
 0x568   :  { %v3348_v61 = vadd.f32 %v3347_v25, %v3024_v13  ;;  %v2711_v35 = vpop.f32.mrf.mxu2  ;;  %v3359_v8 = vpop.f32.mrf.mxu1 }
 0x56a   :  { %v3672_v0 = vadd.f32 %v3671_v41, %v3348_v61  ;;  %v3681_v49 = vpop.f32.mrf.mxu0 }
 0x56c   :  { %3828 = vst.msk [vmem:[%s8670_s3 + $0x350] sm:$0xff] %vm3721_vm3, %v3672_v0 }
 0x56d   :  { %v3025_v14 = vpop.f32.mrf.mxu3 }
 0x56e   :  { %v3026_v18 = vadd.f32 %v3025_v14, %v2701_v51 }
 0x570   :  { %v3350_v37 = vadd.f32 %v3349_v36, %v3026_v18  ;;  %v2714_v47 = vpop.f32.mrf.mxu2  ;;  %v3362_v54 = vpop.f32.mrf.mxu1 }
 0x572   :  { %v3674_v31 = vadd.f32 %v3673_v57, %v3350_v37  ;;  %3067 = vmatmul.bf16.gmra.mxu3 %v4926_v19  ;;  %v3683_v25 = vpop.f32.mrf.mxu0 }
 0x574   :  { %3829 = vst.msk [vmem:[%s8670_s3 + $0x358] sm:$0xff] %vm3721_vm3, %v3674_v31 }
 0x575   :  { %v3028_v28 = vpop.f32.mrf.mxu3 }
 0x576   :  { %v3029_v60 = vadd.f32 %v3028_v28, %v2704_v12 }
 0x578   :  { %v3353_v46 = vadd.f32 %v3352_v23, %v3029_v60  ;;  %v2716_v39 = vpop.f32.mrf.mxu2  ;;  %v3364_v42 = vpop.f32.mrf.mxu1 }
 0x57a   :  { %v3677_v10 = vadd.f32 %v3676_v1, %v3353_v46  ;;  %v3686_v33 = vpop.f32.mrf.mxu0 }
 0x57c   :  { %3830 = vst.msk [vmem:[%s8670_s3 + $0x360] sm:$0xff] %vm3721_vm3, %v3677_v10 }
 0x57d   :  { %v3030_v20 = vpop.f32.mrf.mxu3 }
 0x57e   :  { %v3031_v63 = vadd.f32 %v3030_v20, %v2706_v6 }
 0x580   :  { %v3355_v51 = vadd.f32 %v3354_v11, %v3031_v63  ;;  %v2719_v48 = vpop.f32.mrf.mxu2  ;;  %v3367_v9 = vpop.f32.mrf.mxu1 }
 0x582   :  { %v3679_v17 = vadd.f32 %v3678_v4, %v3355_v51  ;;  %v3688_v45 = vpop.f32.mrf.mxu0 }
 0x584   :  { %3831 = vst.msk [vmem:[%s8670_s3 + $0x368] sm:$0xff] %vm3721_vm3, %v3679_v17 }
 0x585   :  { %v3033_v29 = vpop.f32.mrf.mxu3 }
 0x586   :  { %v3034_v41 = vadd.f32 %v3033_v29, %v2709_v38 }
 0x588   :  { %v3358_v26 = vadd.f32 %v3357_v27, %v3034_v41  ;;  %v2721_v3 = vpop.f32.mrf.mxu2  ;;  %v3369_v40 = vpop.f32.mrf.mxu1 }
 0x58a   :  { %v3682_v36 = vadd.f32 %v3681_v49, %v3358_v26  ;;  %v3691_v57 = vpop.f32.mrf.mxu0 }
 0x58c   :  { %3832 = vst.msk [vmem:[%s8670_s3 + $0x370] sm:$0xff] %vm3721_vm3, %v3682_v36 }
 0x58d   :  { %v3035_v30 = vpop.f32.mrf.mxu3 }
 0x58e   :  { %v3036_v62 = vadd.f32 %v3035_v30, %v2711_v35 }
 0x590   :  { %v3360_v5 = vadd.f32 %v3359_v8, %v3036_v62  ;;  %v2724_v1 = vpop.f32.mrf.mxu2  ;;  %v3372_v32 = vpop.f32.mrf.mxu1 }
 0x592   :  { %v3684_v52 = vadd.f32 %v3683_v25, %v3360_v5  ;;  %v3693_v43 = vpop.f32.mrf.mxu0 }
 0x594   :  { %3833 = vst.msk [vmem:[%s8670_s3 + $0x378] sm:$0xff] %vm3721_vm3, %v3684_v52 }
 0x595   :  { %v3038_v7 = vpop.f32.mrf.mxu3 }
 0x596   :  { %v3039_v12 = vadd.f32 %v3038_v7, %v2714_v47 }
 0x598   :  { %v3363_v24 = vadd.f32 %v3362_v54, %v3039_v12  ;;  %v2726_v53 = vpop.f32.mrf.mxu2  ;;  %v3374_v4 = vpop.f32.mrf.mxu1 }
 0x59a   :  { %v3687_v23 = vadd.f32 %v3686_v33, %v3363_v24  ;;  %v3696_v6 = vpop.f32.mrf.mxu0 }
 0x59c   :  { %3834 = vst.msk [vmem:[%s8670_s3 + $0x380] sm:$0xff] %vm3721_vm3, %v3687_v23 }
 0x59d   :  { %v3040_v58 = vpop.f32.mrf.mxu3 }
 0x59e   :  { %v3041_v22 = vadd.f32 %v3040_v58, %v2716_v39 }
 0x5a0   :  { %v3365_v50 = vadd.f32 %v3364_v42, %v3041_v22  ;;  %v2729_v0 = vpop.f32.mrf.mxu2  ;;  %v3377_v59 = vpop.f32.mrf.mxu1 }
 0x5a2   :  { %v3689_v34 = vadd.f32 %v3688_v45, %v3365_v50  ;;  %v3698_v13 = vpop.f32.mrf.mxu0 }
 0x5a4   :  { %3835 = vst.msk [vmem:[%s8670_s3 + $0x388] sm:$0xff] %vm3721_vm3, %v3689_v34 }
 0x5a5   :  { %v3043_v56 = vpop.f32.mrf.mxu3 }
 0x5a6   :  { %v3044_v16 = vadd.f32 %v3043_v56, %v2719_v48 }
 0x5a8   :  { %v3368_v21 = vadd.f32 %v3367_v9, %v3044_v16  ;;  %v2731_v35 = vpop.f32.mrf.mxu2  ;;  %v3379_v8 = vpop.f32.mrf.mxu1 }
 0x5aa   :  { %v3692_v2 = vadd.f32 %v3691_v57, %v3368_v21  ;;  %v3701_v14 = vpop.f32.mrf.mxu0 }
 0x5ac   :  { %3836 = vst.msk [vmem:[%s8670_s3 + $0x390] sm:$0xff] %vm3721_vm3, %v3692_v2 }
 0x5ad   :  { %v3045_v11 = vpop.f32.mrf.mxu3 }
 0x5ae   :  { %v3046_v55 = vadd.f32 %v3045_v11, %v2721_v3 }
 0x5b0   :  { %v3370_v15 = vadd.f32 %v3369_v40, %v3046_v55  ;;  %v2734_v47 = vpop.f32.mrf.mxu2  ;;  %v3382_v54 = vpop.f32.mrf.mxu1 }
 0x5b2   :  { %v3694_v38 = vadd.f32 %v3693_v43, %v3370_v15  ;;  %v3703_v25 = vpop.f32.mrf.mxu0 }
 0x5b4   :  { %3837 = vst.msk [vmem:[%s8670_s3 + $0x398] sm:$0xff] %vm3721_vm3, %v3694_v38 }
 0x5b5   :  { %v3048_v61 = vpop.f32.mrf.mxu3 }
 0x5b6   :  { %v3049_v27 = vadd.f32 %v3048_v61, %v2724_v1 }
 0x5b8   :  { %v3373_v44 = vadd.f32 %v3372_v32, %v3049_v27  ;;  %v2736_v39 = vpop.f32.mrf.mxu2  ;;  %v3384_v42 = vpop.f32.mrf.mxu1 }
 0x5ba   :  { %v3697_v49 = vadd.f32 %v3696_v6, %v3373_v44  ;;  %v3706_v33 = vpop.f32.mrf.mxu0 }
 0x5bc   :  { %3838 = vst.msk [vmem:[%s8670_s3 + $0x3a0] sm:$0xff] %vm3721_vm3, %v3697_v49 }
 0x5bd   :  { %v3050_v18 = vpop.f32.mrf.mxu3 }
 0x5be   :  { %v3051_v19 = vadd.f32 %v3050_v18, %v2726_v53 }
 0x5c0   :  { %v3375_v37 = vadd.f32 %v3374_v4, %v3051_v19  ;;  %v2739_v48 = vpop.f32.mrf.mxu2  ;;  %v3387_v9 = vpop.f32.mrf.mxu1 }
 0x5c2   :  { %v3699_v31 = vadd.f32 %v3698_v13, %v3375_v37  ;;  %v3708_v45 = vpop.f32.mrf.mxu0 }
 0x5c4   :  { %3839 = vst.msk [vmem:[%s8670_s3 + $0x3a8] sm:$0xff] %vm3721_vm3, %v3699_v31 }
 0x5c5   :  { %v3053_v28 = vpop.f32.mrf.mxu3 }
 0x5c6   :  { %v3054_v60 = vadd.f32 %v3053_v28, %v2729_v0 }
 0x5c8   :  { %v3378_v46 = vadd.f32 %v3377_v59, %v3054_v60  ;;  %v2741_v3 = vpop.f32.mrf.mxu2  ;;  %v3389_v40 = vpop.f32.mrf.mxu1 }
 0x5ca   :  { %v3702_v10 = vadd.f32 %v3701_v14, %v3378_v46  ;;  %v3711_v57 = vpop.f32.mrf.mxu0 }
 0x5cc   :  { %3840 = vst.msk [vmem:[%s8670_s3 + $0x3b0] sm:$0xff] %vm3721_vm3, %v3702_v10 }
 0x5cd   :  { %v3055_v20 = vpop.f32.mrf.mxu3 }
 0x5ce   :  { %v3056_v63 = vadd.f32 %v3055_v20, %v2731_v35 }
 0x5d0   :  { %v3380_v51 = vadd.f32 %v3379_v8, %v3056_v63  ;;  %v2744_v1 = vpop.f32.mrf.mxu2  ;;  %v3392_v32 = vpop.f32.mrf.mxu1 }
 0x5d2   :  { %v3704_v17 = vadd.f32 %v3703_v25, %v3380_v51  ;;  %v3713_v43 = vpop.f32.mrf.mxu0 }
 0x5d4   :  { %3841 = vst.msk [vmem:[%s8670_s3 + $0x3b8] sm:$0xff] %vm3721_vm3, %v3704_v17 }
 0x5d5   :  { %v3058_v29 = vpop.f32.mrf.mxu3 }
 0x5d6   :  { %v3059_v41 = vadd.f32 %v3058_v29, %v2734_v47 }
 0x5d8   :  { %v3383_v26 = vadd.f32 %v3382_v54, %v3059_v41  ;;  %v2746_v11 = vpop.f32.mrf.mxu2  ;;  %v3394_v4 = vpop.f32.mrf.mxu1 }
 0x5da   :  { %v3707_v36 = vadd.f32 %v3706_v33, %v3383_v26  ;;  %v3716_v6 = vpop.f32.mrf.mxu0 }
 0x5dc   :  { %3842 = vst.msk [vmem:[%s8670_s3 + $0x3c0] sm:$0xff] %vm3721_vm3, %v3707_v36 }
 0x5dd   :  { %v3060_v30 = vpop.f32.mrf.mxu3 }
 0x5de   :  { %v3061_v62 = vadd.f32 %v3060_v30, %v2736_v39 }
 0x5e0   :  { %v3385_v5 = vadd.f32 %v3384_v42, %v3061_v62 }
 0x5e2   :  { %v3709_v52 = vadd.f32 %v3708_v45, %v3385_v5  ;;  %v3718_v13 = vpop.f32.mrf.mxu0 }
 0x5e4   :  { %3843 = vst.msk [vmem:[%s8670_s3 + $0x3c8] sm:$0xff] %vm3721_vm3, %v3709_v52 }
 0x5e5   :  { %v3063_v7 = vpop.f32.mrf.mxu3 }
 0x5e6   :  { %v3064_v12 = vadd.f32 %v3063_v7, %v2739_v48 }
 0x5e8   :  { %v3388_v24 = vadd.f32 %v3387_v9, %v3064_v12 }
 0x5ea   :  { %v3712_v23 = vadd.f32 %v3711_v57, %v3388_v24 }
 0x5ec   :  { %3844 = vst.msk [vmem:[%s8670_s3 + $0x3d0] sm:$0xff] %vm3721_vm3, %v3712_v23 }
 0x5ed   :  { %v3065_v58 = vpop.f32.mrf.mxu3 }
 0x5ee   :  { %v3066_v22 = vadd.f32 %v3065_v58, %v2741_v3 }
 0x5f0   :  { %v3390_v50 = vadd.f32 %v3389_v40, %v3066_v22 }
 0x5f2   :  { %v3714_v34 = vadd.f32 %v3713_v43, %v3390_v50 }
 0x5f4   :  { %3845 = vst.msk [vmem:[%s8670_s3 + $0x3d8] sm:$0xff] %vm3721_vm3, %v3714_v34 }
 0x5f5   :  { %v3068_v56 = vpop.f32.mrf.mxu3 }
 0x5f6   :  { %v3069_v16 = vadd.f32 %v3068_v56, %v2744_v1 }
 0x5f8   :  { %v3393_v21 = vadd.f32 %v3392_v32, %v3069_v16 }
 0x5fa   :  { %v3717_v2 = vadd.f32 %v3716_v6, %v3393_v21 }
 0x5fc   :  { %3846 = vst.msk [vmem:[%s8670_s3 + $0x3e0] sm:$0xff] %vm3721_vm3, %v3717_v2 }
 0x5fd   :  { %v3070_v53 = vpop.f32.mrf.mxu3 }
 0x5fe   :  { %v3071_v55 = vadd.f32 %v3070_v53, %v2746_v11 }
 0x600   :  { %v3395_v15 = vadd.f32 %v3394_v4, %v3071_v55 }
 0x602   :  { %v3719_v38 = vadd.f32 %v3718_v13, %v3395_v15 }
 0x604   :  { %3847 = vst.msk [vmem:[%s8670_s3 + $0x3e8] sm:$0xff] %vm3721_vm3, %v3719_v38 }

</bundles_post_ra>
